<compile_context>
chip_gen: v7x
topology: tpu7x:2x2x1
jax: 0.10.0
libtpu: 0.0.40
codegen_flags: <defaults>
</compile_context>

<pallas_src>
import functools

import jax
import jax.numpy as jnp
from jax import lax
from jax.experimental import pallas as pl
from jax.experimental.pallas import tpu as pltpu


def _make_sinkhorn_kernel(n_iters: int, tb: int, j: int, k: int,
                          slack: bool, unroll):
    """Kernel: `n_iters` Sinkhorn iterations on a (tb, j, k) batch tile.

    With slack, the (J+1, K+1) padded formulation is carried implicitly:
      x  : (tb, j, k) main block
      sr : (tb, 1, k) slack row  (row index J, cols < K)
      sc : (tb, j, 1) slack col  (col index K, rows < J)
    The slack corner (J, K) is never read nor written by either step.
    """

    def kernel(x_ref, log_ref, exp_ref):
        x0 = x_ref[...]  # (tb, j, k) float32 (wrapper casts)

        if slack:
            sr0 = jnp.zeros((tb, 1, k), jnp.float32)
            sc0 = jnp.zeros((tb, j, 1), jnp.float32)

            def body(_, carry):
                x, sr, sc = carry
                # Row normalization: non-slack rows, logsumexp over all K+1
                # columns (slack column included); slack-col entries of those
                # rows are normalized too.
                m_r = jnp.maximum(jnp.max(x, axis=2, keepdims=True), sc)
                lse_r = m_r + jnp.log(
                    jnp.sum(jnp.exp(x - m_r), axis=2, keepdims=True)
                    + jnp.exp(sc - m_r))
                x = x - lse_r
                sc = sc - lse_r
                # Column normalization: non-slack cols, logsumexp over all J+1
                # rows (slack row included); slack-row entries of those cols
                # are normalized too.
                m_c = jnp.maximum(jnp.max(x, axis=1, keepdims=True), sr)
                lse_c = m_c + jnp.log(
                    jnp.sum(jnp.exp(x - m_c), axis=1, keepdims=True)
                    + jnp.exp(sr - m_c))
                x = x - lse_c
                sr = sr - lse_c
                return x, sr, sc

            x_final, _, _ = lax.fori_loop(0, n_iters, body, (x0, sr0, sc0),
                                          unroll=unroll)
        else:

            def body(_, x):
                m_r = jnp.max(x, axis=2, keepdims=True)
                x = x - (m_r + jnp.log(
                    jnp.sum(jnp.exp(x - m_r), axis=2, keepdims=True)))
                m_c = jnp.max(x, axis=1, keepdims=True)
                x = x - (m_c + jnp.log(
                    jnp.sum(jnp.exp(x - m_c), axis=1, keepdims=True)))
                return x

            x_final = lax.fori_loop(0, n_iters, body, x0, unroll=unroll)

        log_ref[...] = x_final
        exp_ref[...] = jnp.exp(x_final)  # fused downstream s = exp(log_s)

    return kernel


def _pick_tb(b: int, j: int, k: int) -> int:
    """Batch elements per grid step, capped by a conservative VMEM budget."""
    # f32 bytes per batch element per grid step (input + two outputs),
    # double-buffered by the Pallas pipeline, plus loop-state headroom.
    per_b = 4 * j * k * 3 * 2
    budget = 8 << 20  # well under the smallest (v7x) default scoped VMEM
    tb = max(1, budget // max(1, per_b))
    tb = min(tb, 32)  # keep the unrolled loop body compact
    if b >= 2:
        # Keep >= 2 grid steps so v7x can shard the parallel batch axis
        # across its two TensorCores (no cost on v5e/v6e).
        tb = min(tb, pl.cdiv(b, 2))
    return max(1, min(tb, b))


def _sinkhorn_pallas_impl(log_alpha, n_iters: int, slack: bool):
    x = log_alpha.astype(jnp.float32)
    b, j, k = x.shape
    tb = _pick_tb(b, j, k)
    nb = pl.cdiv(b, tb)
    bp = nb * tb
    if bp != b:
        x = jnp.pad(x, ((0, bp - b), (0, 0), (0, 0)))

    unroll = True if n_iters <= 32 else 4
    kernel = _make_sinkhorn_kernel(n_iters, tb, j, k, slack, unroll)

    # NOTE: block last-two dims equal the full (J, K) extent, so lane/sublane
    # padding is masked by Mosaic in the axis=1 / axis=2 reductions.
    # TODO(synk): K=16 keeps stores lane-sparse; a lane-dense repack of the
    # output would need an in-kernel relayout that costs more than it saves
    # at these small J,K.
    blk = pl.BlockSpec((tb, j, k), lambda i: (i, 0, 0))

    log_s, s = pl.pallas_call(
        kernel,
        out_shape=(jax.ShapeDtypeStruct((bp, j, k), jnp.float32),
                   jax.ShapeDtypeStruct((bp, j, k), jnp.float32)),
        grid_spec=pltpu.PrefetchScalarGridSpec(
            num_scalar_prefetch=0,
            grid=(nb,),
            in_specs=[blk],
            out_specs=[blk, blk],
        ),
        compiler_params=pltpu.CompilerParams(
            dimension_semantics=("parallel",),
        ),
    )(x)

    if bp != b:
        log_s = log_s[:b]
        s = s[:b]
    return log_s, s


@functools.partial(jax.jit, static_argnames=("n_iters", "slack"))
def sinkhorn_rpm_exp_pallas(log_alpha, n_iters: int = 5, slack: bool = True):
    """Returns (log_s, s=exp(log_s)) with exp fused into the kernel."""
    return _sinkhorn_pallas_impl(log_alpha, n_iters, slack)


@functools.partial(jax.jit, static_argnames=("n_iters", "slack"))
def sinkhorn_rpm_pallas(log_alpha, n_iters: int = 5, slack: bool = True):
    """Pallas equivalent of sinkhorn_rpm(log_alpha, n_iters, slack, eps=-1)."""
    log_s, _ = _sinkhorn_pallas_impl(log_alpha, n_iters, slack)
    return log_s


def sinkhorn_rpm_ref(log_alpha, n_iters: int = 5, slack: bool = True):
    """Pure-JAX reference mirroring the PyTorch sinkhorn_rpm exactly."""
    log_alpha = log_alpha.astype(jnp.float32)
    if slack:
        x = jnp.pad(log_alpha, ((0, 0), (0, 1), (0, 1)))
        for _ in range(n_iters):
            top = x[:, :-1, :] - jax.nn.logsumexp(x[:, :-1, :], axis=2,
                                                  keepdims=True)
            x = jnp.concatenate([top, x[:, -1:, :]], axis=1)
            left = x[:, :, :-1] - jax.nn.logsumexp(x[:, :, :-1], axis=1,
                                                   keepdims=True)
            x = jnp.concatenate([left, x[:, :, -1:]], axis=2)
        return x[:, :-1, :-1]
    else:
        x = log_alpha
        for _ in range(n_iters):
            x = x - jax.nn.logsumexp(x, axis=2, keepdims=True)
            x = x - jax.nn.logsumexp(x, axis=1, keepdims=True)
        return x


# TODO(synk): OverlapNet / DGCNN / Siamese_Gconv / Affinity / Transformer /
# RegNet / GraphSCNet / build_graphs / furthest_point_sample / hungarian /
# mask_point* / compute_edge_vectors are undefined external dependencies of
# Net.forward and cannot be translated; only sinkhorn_rpm (+ fused exp) is
# implemented in Pallas.


if __name__ == "__main__":
    key = jax.random.PRNGKey(0)
    # Small, forward-consistent shape: one per-layer affinity matrix s of
    # shape (B, J, K) fed into sinkhorn_rpm with n_iters=20, slack=True.
    B, J, K = 2, 16, 16
    log_alpha = jax.random.normal(key, (B, J, K), dtype=jnp.float32)

    # Fused path: log_s and s = exp(log_s) (as used in Net.forward).
    log_s, s = sinkhorn_rpm_exp_pallas(log_alpha, n_iters=20, slack=True)
    log_s = jax.block_until_ready(log_s)
    s = jax.block_until_ready(s)

    # Correctness checks against a pure-JAX reference of the PyTorch code.
    ref = sinkhorn_rpm_ref(log_alpha, n_iters=20, slack=True)
    assert jnp.allclose(log_s, ref, atol=1e-4, rtol=1e-4), "slack mismatch"
    assert jnp.allclose(s, jnp.exp(ref), atol=1e-5, rtol=1e-4), "exp mismatch"

    # Non-slack path as well.
    log_s_ns = sinkhorn_rpm_pallas(log_alpha, n_iters=20, slack=False)
    log_s_ns = jax.block_until_ready(log_s_ns)
    ref_ns = sinkhorn_rpm_ref(log_alpha, n_iters=20, slack=False)
    assert jnp.allclose(log_s_ns, ref_ns, atol=1e-4, rtol=1e-4), "no-slack mismatch"

    print("KERNEL_OK")
</pallas_src>

<mosaic_0001>
module attributes {stable_mosaic.version = 11 : i64} {
  func.func @kernel(%arg0: i32, %arg1: memref<1x16x16xf32, #tpu.memory_space<vmem>>, %arg2: memref<1x16x16xf32, #tpu.memory_space<vmem>>, %arg3: memref<1x16x16xf32, #tpu.memory_space<vmem>>) attributes {dimension_semantics = [#tpu.dimension_semantics<parallel>], iteration_bounds = array<i64: 2>, scalar_prefetch = 0 : i64, scratch_operands = 0 : i64, tpu.core_type = #tpu.core_type<tc>, window_params = [{transform_indices = @transform_0, window_bounds = array<i64: 1, 16, 16>}, {transform_indices = @transform_1, window_bounds = array<i64: 1, 16, 16>}, {transform_indices = @transform_2, window_bounds = array<i64: 1, 16, 16>}]} {
    %c0 = arith.constant 0 : index
    %c0_0 = arith.constant 0 : index
    %c0_1 = arith.constant 0 : index
    %0 = vector.load %arg1[%c0, %c0_0, %c0_1] : memref<1x16x16xf32, #tpu.memory_space<vmem>>, vector<1x16x16xf32>
    %cst = arith.constant 0.000000e+00 : f32
    %1 = vector.broadcast %cst : f32 to vector<1x1x16xf32>
    %cst_2 = arith.constant 0.000000e+00 : f32
    %2 = vector.broadcast %cst_2 : f32 to vector<1x16x1xf32>
    %c0_i32 = arith.constant 0 : i32
    %cst_3 = arith.constant dense<0xFF800000> : vector<1x16xf32>
    %3 = vector.multi_reduction <maximumf>, %0, %cst_3 [2] : vector<1x16x16xf32> to vector<1x16xf32>
    %4 = vector.shape_cast %3 : vector<1x16xf32> to vector<1x16x1xf32>
    %5 = arith.maximumf %4, %2 : vector<1x16x1xf32>
    %6 = vector.broadcast %5 : vector<1x16x1xf32> to vector<1x16x16xf32>
    %7 = arith.subf %0, %6 : vector<1x16x16xf32>
    %8 = math.exp %7 : vector<1x16x16xf32>
    %cst_4 = arith.constant dense<0.000000e+00> : vector<1x16xf32>
    %9 = vector.multi_reduction <add>, %8, %cst_4 [2] : vector<1x16x16xf32> to vector<1x16xf32>
    %10 = vector.shape_cast %9 : vector<1x16xf32> to vector<1x16x1xf32>
    %11 = arith.subf %2, %5 : vector<1x16x1xf32>
    %12 = math.exp %11 : vector<1x16x1xf32>
    %13 = arith.addf %10, %12 : vector<1x16x1xf32>
    %14 = math.log %13 : vector<1x16x1xf32>
    %15 = arith.addf %5, %14 : vector<1x16x1xf32>
    %16 = vector.broadcast %15 : vector<1x16x1xf32> to vector<1x16x16xf32>
    %17 = arith.subf %0, %16 : vector<1x16x16xf32>
    %18 = arith.subf %2, %15 : vector<1x16x1xf32>
    %cst_5 = arith.constant dense<0xFF800000> : vector<1x16xf32>
    %19 = vector.multi_reduction <maximumf>, %17, %cst_5 [1] : vector<1x16x16xf32> to vector<1x16xf32>
    %20 = vector.shape_cast %19 : vector<1x16xf32> to vector<1x1x16xf32>
    %21 = arith.maximumf %20, %1 : vector<1x1x16xf32>
    %22 = vector.broadcast %21 : vector<1x1x16xf32> to vector<1x16x16xf32>
    %23 = arith.subf %17, %22 : vector<1x16x16xf32>
    %24 = math.exp %23 : vector<1x16x16xf32>
    %cst_6 = arith.constant dense<0.000000e+00> : vector<1x16xf32>
    %25 = vector.multi_reduction <add>, %24, %cst_6 [1] : vector<1x16x16xf32> to vector<1x16xf32>
    %26 = vector.shape_cast %25 : vector<1x16xf32> to vector<1x1x16xf32>
    %27 = arith.subf %1, %21 : vector<1x1x16xf32>
    %28 = math.exp %27 : vector<1x1x16xf32>
    %29 = arith.addf %26, %28 : vector<1x1x16xf32>
    %30 = math.log %29 : vector<1x1x16xf32>
    %31 = arith.addf %21, %30 : vector<1x1x16xf32>
    %32 = vector.broadcast %31 : vector<1x1x16xf32> to vector<1x16x16xf32>
    %33 = arith.subf %17, %32 : vector<1x16x16xf32>
    %34 = arith.subf %1, %31 : vector<1x1x16xf32>
    %c1_i32 = arith.constant 1 : i32
    %cst_7 = arith.constant dense<0xFF800000> : vector<1x16xf32>
    %35 = vector.multi_reduction <maximumf>, %33, %cst_7 [2] : vector<1x16x16xf32> to vector<1x16xf32>
    %36 = vector.shape_cast %35 : vector<1x16xf32> to vector<1x16x1xf32>
    %37 = arith.maximumf %36, %18 : vector<1x16x1xf32>
    %38 = vector.broadcast %37 : vector<1x16x1xf32> to vector<1x16x16xf32>
    %39 = arith.subf %33, %38 : vector<1x16x16xf32>
    %40 = math.exp %39 : vector<1x16x16xf32>
    %cst_8 = arith.constant dense<0.000000e+00> : vector<1x16xf32>
    %41 = vector.multi_reduction <add>, %40, %cst_8 [2] : vector<1x16x16xf32> to vector<1x16xf32>
    %42 = vector.shape_cast %41 : vector<1x16xf32> to vector<1x16x1xf32>
    %43 = arith.subf %18, %37 : vector<1x16x1xf32>
    %44 = math.exp %43 : vector<1x16x1xf32>
    %45 = arith.addf %42, %44 : vector<1x16x1xf32>
    %46 = math.log %45 : vector<1x16x1xf32>
    %47 = arith.addf %37, %46 : vector<1x16x1xf32>
    %48 = vector.broadcast %47 : vector<1x16x1xf32> to vector<1x16x16xf32>
    %49 = arith.subf %33, %48 : vector<1x16x16xf32>
    %50 = arith.subf %18, %47 : vector<1x16x1xf32>
    %cst_9 = arith.constant dense<0xFF800000> : vector<1x16xf32>
    %51 = vector.multi_reduction <maximumf>, %49, %cst_9 [1] : vector<1x16x16xf32> to vector<1x16xf32>
    %52 = vector.shape_cast %51 : vector<1x16xf32> to vector<1x1x16xf32>
    %53 = arith.maximumf %52, %34 : vector<1x1x16xf32>
    %54 = vector.broadcast %53 : vector<1x1x16xf32> to vector<1x16x16xf32>
    %55 = arith.subf %49, %54 : vector<1x16x16xf32>
    %56 = math.exp %55 : vector<1x16x16xf32>
    %cst_10 = arith.constant dense<0.000000e+00> : vector<1x16xf32>
    %57 = vector.multi_reduction <add>, %56, %cst_10 [1] : vector<1x16x16xf32> to vector<1x16xf32>
    %58 = vector.shape_cast %57 : vector<1x16xf32> to vector<1x1x16xf32>
    %59 = arith.subf %34, %53 : vector<1x1x16xf32>
    %60 = math.exp %59 : vector<1x1x16xf32>
    %61 = arith.addf %58, %60 : vector<1x1x16xf32>
    %62 = math.log %61 : vector<1x1x16xf32>
    %63 = arith.addf %53, %62 : vector<1x1x16xf32>
    %64 = vector.broadcast %63 : vector<1x1x16xf32> to vector<1x16x16xf32>
    %65 = arith.subf %49, %64 : vector<1x16x16xf32>
    %66 = arith.subf %34, %63 : vector<1x1x16xf32>
    %c2_i32 = arith.constant 2 : i32
    %cst_11 = arith.constant dense<0xFF800000> : vector<1x16xf32>
    %67 = vector.multi_reduction <maximumf>, %65, %cst_11 [2] : vector<1x16x16xf32> to vector<1x16xf32>
    %68 = vector.shape_cast %67 : vector<1x16xf32> to vector<1x16x1xf32>
    %69 = arith.maximumf %68, %50 : vector<1x16x1xf32>
    %70 = vector.broadcast %69 : vector<1x16x1xf32> to vector<1x16x16xf32>
    %71 = arith.subf %65, %70 : vector<1x16x16xf32>
    %72 = math.exp %71 : vector<1x16x16xf32>
    %cst_12 = arith.constant dense<0.000000e+00> : vector<1x16xf32>
    %73 = vector.multi_reduction <add>, %72, %cst_12 [2] : vector<1x16x16xf32> to vector<1x16xf32>
    %74 = vector.shape_cast %73 : vector<1x16xf32> to vector<1x16x1xf32>
    %75 = arith.subf %50, %69 : vector<1x16x1xf32>
    %76 = math.exp %75 : vector<1x16x1xf32>
    %77 = arith.addf %74, %76 : vector<1x16x1xf32>
    %78 = math.log %77 : vector<1x16x1xf32>
    %79 = arith.addf %69, %78 : vector<1x16x1xf32>
    %80 = vector.broadcast %79 : vector<1x16x1xf32> to vector<1x16x16xf32>
    %81 = arith.subf %65, %80 : vector<1x16x16xf32>
    %82 = arith.subf %50, %79 : vector<1x16x1xf32>
    %cst_13 = arith.constant dense<0xFF800000> : vector<1x16xf32>
    %83 = vector.multi_reduction <maximumf>, %81, %cst_13 [1] : vector<1x16x16xf32> to vector<1x16xf32>
    %84 = vector.shape_cast %83 : vector<1x16xf32> to vector<1x1x16xf32>
    %85 = arith.maximumf %84, %66 : vector<1x1x16xf32>
    %86 = vector.broadcast %85 : vector<1x1x16xf32> to vector<1x16x16xf32>
    %87 = arith.subf %81, %86 : vector<1x16x16xf32>
    %88 = math.exp %87 : vector<1x16x16xf32>
    %cst_14 = arith.constant dense<0.000000e+00> : vector<1x16xf32>
    %89 = vector.multi_reduction <add>, %88, %cst_14 [1] : vector<1x16x16xf32> to vector<1x16xf32>
    %90 = vector.shape_cast %89 : vector<1x16xf32> to vector<1x1x16xf32>
    %91 = arith.subf %66, %85 : vector<1x1x16xf32>
    %92 = math.exp %91 : vector<1x1x16xf32>
    %93 = arith.addf %90, %92 : vector<1x1x16xf32>
    %94 = math.log %93 : vector<1x1x16xf32>
    %95 = arith.addf %85, %94 : vector<1x1x16xf32>
    %96 = vector.broadcast %95 : vector<1x1x16xf32> to vector<1x16x16xf32>
    %97 = arith.subf %81, %96 : vector<1x16x16xf32>
    %98 = arith.subf %66, %95 : vector<1x1x16xf32>
    %c3_i32 = arith.constant 3 : i32
    %cst_15 = arith.constant dense<0xFF800000> : vector<1x16xf32>
    %99 = vector.multi_reduction <maximumf>, %97, %cst_15 [2] : vector<1x16x16xf32> to vector<1x16xf32>
    %100 = vector.shape_cast %99 : vector<1x16xf32> to vector<1x16x1xf32>
    %101 = arith.maximumf %100, %82 : vector<1x16x1xf32>
    %102 = vector.broadcast %101 : vector<1x16x1xf32> to vector<1x16x16xf32>
    %103 = arith.subf %97, %102 : vector<1x16x16xf32>
    %104 = math.exp %103 : vector<1x16x16xf32>
    %cst_16 = arith.constant dense<0.000000e+00> : vector<1x16xf32>
    %105 = vector.multi_reduction <add>, %104, %cst_16 [2] : vector<1x16x16xf32> to vector<1x16xf32>
    %106 = vector.shape_cast %105 : vector<1x16xf32> to vector<1x16x1xf32>
    %107 = arith.subf %82, %101 : vector<1x16x1xf32>
    %108 = math.exp %107 : vector<1x16x1xf32>
    %109 = arith.addf %106, %108 : vector<1x16x1xf32>
    %110 = math.log %109 : vector<1x16x1xf32>
    %111 = arith.addf %101, %110 : vector<1x16x1xf32>
    %112 = vector.broadcast %111 : vector<1x16x1xf32> to vector<1x16x16xf32>
    %113 = arith.subf %97, %112 : vector<1x16x16xf32>
    %114 = arith.subf %82, %111 : vector<1x16x1xf32>
    %cst_17 = arith.constant dense<0xFF800000> : vector<1x16xf32>
    %115 = vector.multi_reduction <maximumf>, %113, %cst_17 [1] : vector<1x16x16xf32> to vector<1x16xf32>
    %116 = vector.shape_cast %115 : vector<1x16xf32> to vector<1x1x16xf32>
    %117 = arith.maximumf %116, %98 : vector<1x1x16xf32>
    %118 = vector.broadcast %117 : vector<1x1x16xf32> to vector<1x16x16xf32>
    %119 = arith.subf %113, %118 : vector<1x16x16xf32>
    %120 = math.exp %119 : vector<1x16x16xf32>
    %cst_18 = arith.constant dense<0.000000e+00> : vector<1x16xf32>
    %121 = vector.multi_reduction <add>, %120, %cst_18 [1] : vector<1x16x16xf32> to vector<1x16xf32>
    %122 = vector.shape_cast %121 : vector<1x16xf32> to vector<1x1x16xf32>
    %123 = arith.subf %98, %117 : vector<1x1x16xf32>
    %124 = math.exp %123 : vector<1x1x16xf32>
    %125 = arith.addf %122, %124 : vector<1x1x16xf32>
    %126 = math.log %125 : vector<1x1x16xf32>
    %127 = arith.addf %117, %126 : vector<1x1x16xf32>
    %128 = vector.broadcast %127 : vector<1x1x16xf32> to vector<1x16x16xf32>
    %129 = arith.subf %113, %128 : vector<1x16x16xf32>
    %130 = arith.subf %98, %127 : vector<1x1x16xf32>
    %c4_i32 = arith.constant 4 : i32
    %cst_19 = arith.constant dense<0xFF800000> : vector<1x16xf32>
    %131 = vector.multi_reduction <maximumf>, %129, %cst_19 [2] : vector<1x16x16xf32> to vector<1x16xf32>
    %132 = vector.shape_cast %131 : vector<1x16xf32> to vector<1x16x1xf32>
    %133 = arith.maximumf %132, %114 : vector<1x16x1xf32>
    %134 = vector.broadcast %133 : vector<1x16x1xf32> to vector<1x16x16xf32>
    %135 = arith.subf %129, %134 : vector<1x16x16xf32>
    %136 = math.exp %135 : vector<1x16x16xf32>
    %cst_20 = arith.constant dense<0.000000e+00> : vector<1x16xf32>
    %137 = vector.multi_reduction <add>, %136, %cst_20 [2] : vector<1x16x16xf32> to vector<1x16xf32>
    %138 = vector.shape_cast %137 : vector<1x16xf32> to vector<1x16x1xf32>
    %139 = arith.subf %114, %133 : vector<1x16x1xf32>
    %140 = math.exp %139 : vector<1x16x1xf32>
    %141 = arith.addf %138, %140 : vector<1x16x1xf32>
    %142 = math.log %141 : vector<1x16x1xf32>
    %143 = arith.addf %133, %142 : vector<1x16x1xf32>
    %144 = vector.broadcast %143 : vector<1x16x1xf32> to vector<1x16x16xf32>
    %145 = arith.subf %129, %144 : vector<1x16x16xf32>
    %146 = arith.subf %114, %143 : vector<1x16x1xf32>
    %cst_21 = arith.constant dense<0xFF800000> : vector<1x16xf32>
    %147 = vector.multi_reduction <maximumf>, %145, %cst_21 [1] : vector<1x16x16xf32> to vector<1x16xf32>
    %148 = vector.shape_cast %147 : vector<1x16xf32> to vector<1x1x16xf32>
    %149 = arith.maximumf %148, %130 : vector<1x1x16xf32>
    %150 = vector.broadcast %149 : vector<1x1x16xf32> to vector<1x16x16xf32>
    %151 = arith.subf %145, %150 : vector<1x16x16xf32>
    %152 = math.exp %151 : vector<1x16x16xf32>
    %cst_22 = arith.constant dense<0.000000e+00> : vector<1x16xf32>
    %153 = vector.multi_reduction <add>, %152, %cst_22 [1] : vector<1x16x16xf32> to vector<1x16xf32>
    %154 = vector.shape_cast %153 : vector<1x16xf32> to vector<1x1x16xf32>
    %155 = arith.subf %130, %149 : vector<1x1x16xf32>
    %156 = math.exp %155 : vector<1x1x16xf32>
    %157 = arith.addf %154, %156 : vector<1x1x16xf32>
    %158 = math.log %157 : vector<1x1x16xf32>
    %159 = arith.addf %149, %158 : vector<1x1x16xf32>
    %160 = vector.broadcast %159 : vector<1x1x16xf32> to vector<1x16x16xf32>
    %161 = arith.subf %145, %160 : vector<1x16x16xf32>
    %162 = arith.subf %130, %159 : vector<1x1x16xf32>
    %c5_i32 = arith.constant 5 : i32
    %cst_23 = arith.constant dense<0xFF800000> : vector<1x16xf32>
    %163 = vector.multi_reduction <maximumf>, %161, %cst_23 [2] : vector<1x16x16xf32> to vector<1x16xf32>
    %164 = vector.shape_cast %163 : vector<1x16xf32> to vector<1x16x1xf32>
    %165 = arith.maximumf %164, %146 : vector<1x16x1xf32>
    %166 = vector.broadcast %165 : vector<1x16x1xf32> to vector<1x16x16xf32>
    %167 = arith.subf %161, %166 : vector<1x16x16xf32>
    %168 = math.exp %167 : vector<1x16x16xf32>
    %cst_24 = arith.constant dense<0.000000e+00> : vector<1x16xf32>
    %169 = vector.multi_reduction <add>, %168, %cst_24 [2] : vector<1x16x16xf32> to vector<1x16xf32>
    %170 = vector.shape_cast %169 : vector<1x16xf32> to vector<1x16x1xf32>
    %171 = arith.subf %146, %165 : vector<1x16x1xf32>
    %172 = math.exp %171 : vector<1x16x1xf32>
    %173 = arith.addf %170, %172 : vector<1x16x1xf32>
    %174 = math.log %173 : vector<1x16x1xf32>
    %175 = arith.addf %165, %174 : vector<1x16x1xf32>
    %176 = vector.broadcast %175 : vector<1x16x1xf32> to vector<1x16x16xf32>
    %177 = arith.subf %161, %176 : vector<1x16x16xf32>
    %178 = arith.subf %146, %175 : vector<1x16x1xf32>
    %cst_25 = arith.constant dense<0xFF800000> : vector<1x16xf32>
    %179 = vector.multi_reduction <maximumf>, %177, %cst_25 [1] : vector<1x16x16xf32> to vector<1x16xf32>
    %180 = vector.shape_cast %179 : vector<1x16xf32> to vector<1x1x16xf32>
    %181 = arith.maximumf %180, %162 : vector<1x1x16xf32>
    %182 = vector.broadcast %181 : vector<1x1x16xf32> to vector<1x16x16xf32>
    %183 = arith.subf %177, %182 : vector<1x16x16xf32>
    %184 = math.exp %183 : vector<1x16x16xf32>
    %cst_26 = arith.constant dense<0.000000e+00> : vector<1x16xf32>
    %185 = vector.multi_reduction <add>, %184, %cst_26 [1] : vector<1x16x16xf32> to vector<1x16xf32>
    %186 = vector.shape_cast %185 : vector<1x16xf32> to vector<1x1x16xf32>
    %187 = arith.subf %162, %181 : vector<1x1x16xf32>
    %188 = math.exp %187 : vector<1x1x16xf32>
    %189 = arith.addf %186, %188 : vector<1x1x16xf32>
    %190 = math.log %189 : vector<1x1x16xf32>
    %191 = arith.addf %181, %190 : vector<1x1x16xf32>
    %192 = vector.broadcast %191 : vector<1x1x16xf32> to vector<1x16x16xf32>
    %193 = arith.subf %177, %192 : vector<1x16x16xf32>
    %194 = arith.subf %162, %191 : vector<1x1x16xf32>
    %c6_i32 = arith.constant 6 : i32
    %cst_27 = arith.constant dense<0xFF800000> : vector<1x16xf32>
    %195 = vector.multi_reduction <maximumf>, %193, %cst_27 [2] : vector<1x16x16xf32> to vector<1x16xf32>
    %196 = vector.shape_cast %195 : vector<1x16xf32> to vector<1x16x1xf32>
    %197 = arith.maximumf %196, %178 : vector<1x16x1xf32>
    %198 = vector.broadcast %197 : vector<1x16x1xf32> to vector<1x16x16xf32>
    %199 = arith.subf %193, %198 : vector<1x16x16xf32>
    %200 = math.exp %199 : vector<1x16x16xf32>
    %cst_28 = arith.constant dense<0.000000e+00> : vector<1x16xf32>
    %201 = vector.multi_reduction <add>, %200, %cst_28 [2] : vector<1x16x16xf32> to vector<1x16xf32>
    %202 = vector.shape_cast %201 : vector<1x16xf32> to vector<1x16x1xf32>
    %203 = arith.subf %178, %197 : vector<1x16x1xf32>
    %204 = math.exp %203 : vector<1x16x1xf32>
    %205 = arith.addf %202, %204 : vector<1x16x1xf32>
    %206 = math.log %205 : vector<1x16x1xf32>
    %207 = arith.addf %197, %206 : vector<1x16x1xf32>
    %208 = vector.broadcast %207 : vector<1x16x1xf32> to vector<1x16x16xf32>
    %209 = arith.subf %193, %208 : vector<1x16x16xf32>
    %210 = arith.subf %178, %207 : vector<1x16x1xf32>
    %cst_29 = arith.constant dense<0xFF800000> : vector<1x16xf32>
    %211 = vector.multi_reduction <maximumf>, %209, %cst_29 [1] : vector<1x16x16xf32> to vector<1x16xf32>
    %212 = vector.shape_cast %211 : vector<1x16xf32> to vector<1x1x16xf32>
    %213 = arith.maximumf %212, %194 : vector<1x1x16xf32>
    %214 = vector.broadcast %213 : vector<1x1x16xf32> to vector<1x16x16xf32>
    %215 = arith.subf %209, %214 : vector<1x16x16xf32>
    %216 = math.exp %215 : vector<1x16x16xf32>
    %cst_30 = arith.constant dense<0.000000e+00> : vector<1x16xf32>
    %217 = vector.multi_reduction <add>, %216, %cst_30 [1] : vector<1x16x16xf32> to vector<1x16xf32>
    %218 = vector.shape_cast %217 : vector<1x16xf32> to vector<1x1x16xf32>
    %219 = arith.subf %194, %213 : vector<1x1x16xf32>
    %220 = math.exp %219 : vector<1x1x16xf32>
    %221 = arith.addf %218, %220 : vector<1x1x16xf32>
    %222 = math.log %221 : vector<1x1x16xf32>
    %223 = arith.addf %213, %222 : vector<1x1x16xf32>
    %224 = vector.broadcast %223 : vector<1x1x16xf32> to vector<1x16x16xf32>
    %225 = arith.subf %209, %224 : vector<1x16x16xf32>
    %226 = arith.subf %194, %223 : vector<1x1x16xf32>
    %c7_i32 = arith.constant 7 : i32
    %cst_31 = arith.constant dense<0xFF800000> : vector<1x16xf32>
    %227 = vector.multi_reduction <maximumf>, %225, %cst_31 [2] : vector<1x16x16xf32> to vector<1x16xf32>
    %228 = vector.shape_cast %227 : vector<1x16xf32> to vector<1x16x1xf32>
    %229 = arith.maximumf %228, %210 : vector<1x16x1xf32>
    %230 = vector.broadcast %229 : vector<1x16x1xf32> to vector<1x16x16xf32>
    %231 = arith.subf %225, %230 : vector<1x16x16xf32>
    %232 = math.exp %231 : vector<1x16x16xf32>
    %cst_32 = arith.constant dense<0.000000e+00> : vector<1x16xf32>
    %233 = vector.multi_reduction <add>, %232, %cst_32 [2] : vector<1x16x16xf32> to vector<1x16xf32>
    %234 = vector.shape_cast %233 : vector<1x16xf32> to vector<1x16x1xf32>
    %235 = arith.subf %210, %229 : vector<1x16x1xf32>
    %236 = math.exp %235 : vector<1x16x1xf32>
    %237 = arith.addf %234, %236 : vector<1x16x1xf32>
    %238 = math.log %237 : vector<1x16x1xf32>
    %239 = arith.addf %229, %238 : vector<1x16x1xf32>
    %240 = vector.broadcast %239 : vector<1x16x1xf32> to vector<1x16x16xf32>
    %241 = arith.subf %225, %240 : vector<1x16x16xf32>
    %242 = arith.subf %210, %239 : vector<1x16x1xf32>
    %cst_33 = arith.constant dense<0xFF800000> : vector<1x16xf32>
    %243 = vector.multi_reduction <maximumf>, %241, %cst_33 [1] : vector<1x16x16xf32> to vector<1x16xf32>
    %244 = vector.shape_cast %243 : vector<1x16xf32> to vector<1x1x16xf32>
    %245 = arith.maximumf %244, %226 : vector<1x1x16xf32>
    %246 = vector.broadcast %245 : vector<1x1x16xf32> to vector<1x16x16xf32>
    %247 = arith.subf %241, %246 : vector<1x16x16xf32>
    %248 = math.exp %247 : vector<1x16x16xf32>
    %cst_34 = arith.constant dense<0.000000e+00> : vector<1x16xf32>
    %249 = vector.multi_reduction <add>, %248, %cst_34 [1] : vector<1x16x16xf32> to vector<1x16xf32>
    %250 = vector.shape_cast %249 : vector<1x16xf32> to vector<1x1x16xf32>
    %251 = arith.subf %226, %245 : vector<1x1x16xf32>
    %252 = math.exp %251 : vector<1x1x16xf32>
    %253 = arith.addf %250, %252 : vector<1x1x16xf32>
    %254 = math.log %253 : vector<1x1x16xf32>
    %255 = arith.addf %245, %254 : vector<1x1x16xf32>
    %256 = vector.broadcast %255 : vector<1x1x16xf32> to vector<1x16x16xf32>
    %257 = arith.subf %241, %256 : vector<1x16x16xf32>
    %258 = arith.subf %226, %255 : vector<1x1x16xf32>
    %c8_i32 = arith.constant 8 : i32
    %cst_35 = arith.constant dense<0xFF800000> : vector<1x16xf32>
    %259 = vector.multi_reduction <maximumf>, %257, %cst_35 [2] : vector<1x16x16xf32> to vector<1x16xf32>
    %260 = vector.shape_cast %259 : vector<1x16xf32> to vector<1x16x1xf32>
    %261 = arith.maximumf %260, %242 : vector<1x16x1xf32>
    %262 = vector.broadcast %261 : vector<1x16x1xf32> to vector<1x16x16xf32>
    %263 = arith.subf %257, %262 : vector<1x16x16xf32>
    %264 = math.exp %263 : vector<1x16x16xf32>
    %cst_36 = arith.constant dense<0.000000e+00> : vector<1x16xf32>
    %265 = vector.multi_reduction <add>, %264, %cst_36 [2] : vector<1x16x16xf32> to vector<1x16xf32>
    %266 = vector.shape_cast %265 : vector<1x16xf32> to vector<1x16x1xf32>
    %267 = arith.subf %242, %261 : vector<1x16x1xf32>
    %268 = math.exp %267 : vector<1x16x1xf32>
    %269 = arith.addf %266, %268 : vector<1x16x1xf32>
    %270 = math.log %269 : vector<1x16x1xf32>
    %271 = arith.addf %261, %270 : vector<1x16x1xf32>
    %272 = vector.broadcast %271 : vector<1x16x1xf32> to vector<1x16x16xf32>
    %273 = arith.subf %257, %272 : vector<1x16x16xf32>
    %274 = arith.subf %242, %271 : vector<1x16x1xf32>
    %cst_37 = arith.constant dense<0xFF800000> : vector<1x16xf32>
    %275 = vector.multi_reduction <maximumf>, %273, %cst_37 [1] : vector<1x16x16xf32> to vector<1x16xf32>
    %276 = vector.shape_cast %275 : vector<1x16xf32> to vector<1x1x16xf32>
    %277 = arith.maximumf %276, %258 : vector<1x1x16xf32>
    %278 = vector.broadcast %277 : vector<1x1x16xf32> to vector<1x16x16xf32>
    %279 = arith.subf %273, %278 : vector<1x16x16xf32>
    %280 = math.exp %279 : vector<1x16x16xf32>
    %cst_38 = arith.constant dense<0.000000e+00> : vector<1x16xf32>
    %281 = vector.multi_reduction <add>, %280, %cst_38 [1] : vector<1x16x16xf32> to vector<1x16xf32>
    %282 = vector.shape_cast %281 : vector<1x16xf32> to vector<1x1x16xf32>
    %283 = arith.subf %258, %277 : vector<1x1x16xf32>
    %284 = math.exp %283 : vector<1x1x16xf32>
    %285 = arith.addf %282, %284 : vector<1x1x16xf32>
    %286 = math.log %285 : vector<1x1x16xf32>
    %287 = arith.addf %277, %286 : vector<1x1x16xf32>
    %288 = vector.broadcast %287 : vector<1x1x16xf32> to vector<1x16x16xf32>
    %289 = arith.subf %273, %288 : vector<1x16x16xf32>
    %290 = arith.subf %258, %287 : vector<1x1x16xf32>
    %c9_i32 = arith.constant 9 : i32
    %cst_39 = arith.constant dense<0xFF800000> : vector<1x16xf32>
    %291 = vector.multi_reduction <maximumf>, %289, %cst_39 [2] : vector<1x16x16xf32> to vector<1x16xf32>
    %292 = vector.shape_cast %291 : vector<1x16xf32> to vector<1x16x1xf32>
    %293 = arith.maximumf %292, %274 : vector<1x16x1xf32>
    %294 = vector.broadcast %293 : vector<1x16x1xf32> to vector<1x16x16xf32>
    %295 = arith.subf %289, %294 : vector<1x16x16xf32>
    %296 = math.exp %295 : vector<1x16x16xf32>
    %cst_40 = arith.constant dense<0.000000e+00> : vector<1x16xf32>
    %297 = vector.multi_reduction <add>, %296, %cst_40 [2] : vector<1x16x16xf32> to vector<1x16xf32>
    %298 = vector.shape_cast %297 : vector<1x16xf32> to vector<1x16x1xf32>
    %299 = arith.subf %274, %293 : vector<1x16x1xf32>
    %300 = math.exp %299 : vector<1x16x1xf32>
    %301 = arith.addf %298, %300 : vector<1x16x1xf32>
    %302 = math.log %301 : vector<1x16x1xf32>
    %303 = arith.addf %293, %302 : vector<1x16x1xf32>
    %304 = vector.broadcast %303 : vector<1x16x1xf32> to vector<1x16x16xf32>
    %305 = arith.subf %289, %304 : vector<1x16x16xf32>
    %306 = arith.subf %274, %303 : vector<1x16x1xf32>
    %cst_41 = arith.constant dense<0xFF800000> : vector<1x16xf32>
    %307 = vector.multi_reduction <maximumf>, %305, %cst_41 [1] : vector<1x16x16xf32> to vector<1x16xf32>
    %308 = vector.shape_cast %307 : vector<1x16xf32> to vector<1x1x16xf32>
    %309 = arith.maximumf %308, %290 : vector<1x1x16xf32>
    %310 = vector.broadcast %309 : vector<1x1x16xf32> to vector<1x16x16xf32>
    %311 = arith.subf %305, %310 : vector<1x16x16xf32>
    %312 = math.exp %311 : vector<1x16x16xf32>
    %cst_42 = arith.constant dense<0.000000e+00> : vector<1x16xf32>
    %313 = vector.multi_reduction <add>, %312, %cst_42 [1] : vector<1x16x16xf32> to vector<1x16xf32>
    %314 = vector.shape_cast %313 : vector<1x16xf32> to vector<1x1x16xf32>
    %315 = arith.subf %290, %309 : vector<1x1x16xf32>
    %316 = math.exp %315 : vector<1x1x16xf32>
    %317 = arith.addf %314, %316 : vector<1x1x16xf32>
    %318 = math.log %317 : vector<1x1x16xf32>
    %319 = arith.addf %309, %318 : vector<1x1x16xf32>
    %320 = vector.broadcast %319 : vector<1x1x16xf32> to vector<1x16x16xf32>
    %321 = arith.subf %305, %320 : vector<1x16x16xf32>
    %322 = arith.subf %290, %319 : vector<1x1x16xf32>
    %c10_i32 = arith.constant 10 : i32
    %cst_43 = arith.constant dense<0xFF800000> : vector<1x16xf32>
    %323 = vector.multi_reduction <maximumf>, %321, %cst_43 [2] : vector<1x16x16xf32> to vector<1x16xf32>
    %324 = vector.shape_cast %323 : vector<1x16xf32> to vector<1x16x1xf32>
    %325 = arith.maximumf %324, %306 : vector<1x16x1xf32>
    %326 = vector.broadcast %325 : vector<1x16x1xf32> to vector<1x16x16xf32>
    %327 = arith.subf %321, %326 : vector<1x16x16xf32>
    %328 = math.exp %327 : vector<1x16x16xf32>
    %cst_44 = arith.constant dense<0.000000e+00> : vector<1x16xf32>
    %329 = vector.multi_reduction <add>, %328, %cst_44 [2] : vector<1x16x16xf32> to vector<1x16xf32>
    %330 = vector.shape_cast %329 : vector<1x16xf32> to vector<1x16x1xf32>
    %331 = arith.subf %306, %325 : vector<1x16x1xf32>
    %332 = math.exp %331 : vector<1x16x1xf32>
    %333 = arith.addf %330, %332 : vector<1x16x1xf32>
    %334 = math.log %333 : vector<1x16x1xf32>
    %335 = arith.addf %325, %334 : vector<1x16x1xf32>
    %336 = vector.broadcast %335 : vector<1x16x1xf32> to vector<1x16x16xf32>
    %337 = arith.subf %321, %336 : vector<1x16x16xf32>
    %338 = arith.subf %306, %335 : vector<1x16x1xf32>
    %cst_45 = arith.constant dense<0xFF800000> : vector<1x16xf32>
    %339 = vector.multi_reduction <maximumf>, %337, %cst_45 [1] : vector<1x16x16xf32> to vector<1x16xf32>
    %340 = vector.shape_cast %339 : vector<1x16xf32> to vector<1x1x16xf32>
    %341 = arith.maximumf %340, %322 : vector<1x1x16xf32>
    %342 = vector.broadcast %341 : vector<1x1x16xf32> to vector<1x16x16xf32>
    %343 = arith.subf %337, %342 : vector<1x16x16xf32>
    %344 = math.exp %343 : vector<1x16x16xf32>
    %cst_46 = arith.constant dense<0.000000e+00> : vector<1x16xf32>
    %345 = vector.multi_reduction <add>, %344, %cst_46 [1] : vector<1x16x16xf32> to vector<1x16xf32>
    %346 = vector.shape_cast %345 : vector<1x16xf32> to vector<1x1x16xf32>
    %347 = arith.subf %322, %341 : vector<1x1x16xf32>
    %348 = math.exp %347 : vector<1x1x16xf32>
    %349 = arith.addf %346, %348 : vector<1x1x16xf32>
    %350 = math.log %349 : vector<1x1x16xf32>
    %351 = arith.addf %341, %350 : vector<1x1x16xf32>
    %352 = vector.broadcast %351 : vector<1x1x16xf32> to vector<1x16x16xf32>
    %353 = arith.subf %337, %352 : vector<1x16x16xf32>
    %354 = arith.subf %322, %351 : vector<1x1x16xf32>
    %c11_i32 = arith.constant 11 : i32
    %cst_47 = arith.constant dense<0xFF800000> : vector<1x16xf32>
    %355 = vector.multi_reduction <maximumf>, %353, %cst_47 [2] : vector<1x16x16xf32> to vector<1x16xf32>
    %356 = vector.shape_cast %355 : vector<1x16xf32> to vector<1x16x1xf32>
    %357 = arith.maximumf %356, %338 : vector<1x16x1xf32>
    %358 = vector.broadcast %357 : vector<1x16x1xf32> to vector<1x16x16xf32>
    %359 = arith.subf %353, %358 : vector<1x16x16xf32>
    %360 = math.exp %359 : vector<1x16x16xf32>
    %cst_48 = arith.constant dense<0.000000e+00> : vector<1x16xf32>
    %361 = vector.multi_reduction <add>, %360, %cst_48 [2] : vector<1x16x16xf32> to vector<1x16xf32>
    %362 = vector.shape_cast %361 : vector<1x16xf32> to vector<1x16x1xf32>
    %363 = arith.subf %338, %357 : vector<1x16x1xf32>
    %364 = math.exp %363 : vector<1x16x1xf32>
    %365 = arith.addf %362, %364 : vector<1x16x1xf32>
    %366 = math.log %365 : vector<1x16x1xf32>
    %367 = arith.addf %357, %366 : vector<1x16x1xf32>
    %368 = vector.broadcast %367 : vector<1x16x1xf32> to vector<1x16x16xf32>
    %369 = arith.subf %353, %368 : vector<1x16x16xf32>
    %370 = arith.subf %338, %367 : vector<1x16x1xf32>
    %cst_49 = arith.constant dense<0xFF800000> : vector<1x16xf32>
    %371 = vector.multi_reduction <maximumf>, %369, %cst_49 [1] : vector<1x16x16xf32> to vector<1x16xf32>
    %372 = vector.shape_cast %371 : vector<1x16xf32> to vector<1x1x16xf32>
    %373 = arith.maximumf %372, %354 : vector<1x1x16xf32>
    %374 = vector.broadcast %373 : vector<1x1x16xf32> to vector<1x16x16xf32>
    %375 = arith.subf %369, %374 : vector<1x16x16xf32>
    %376 = math.exp %375 : vector<1x16x16xf32>
    %cst_50 = arith.constant dense<0.000000e+00> : vector<1x16xf32>
    %377 = vector.multi_reduction <add>, %376, %cst_50 [1] : vector<1x16x16xf32> to vector<1x16xf32>
    %378 = vector.shape_cast %377 : vector<1x16xf32> to vector<1x1x16xf32>
    %379 = arith.subf %354, %373 : vector<1x1x16xf32>
    %380 = math.exp %379 : vector<1x1x16xf32>
    %381 = arith.addf %378, %380 : vector<1x1x16xf32>
    %382 = math.log %381 : vector<1x1x16xf32>
    %383 = arith.addf %373, %382 : vector<1x1x16xf32>
    %384 = vector.broadcast %383 : vector<1x1x16xf32> to vector<1x16x16xf32>
    %385 = arith.subf %369, %384 : vector<1x16x16xf32>
    %386 = arith.subf %354, %383 : vector<1x1x16xf32>
    %c12_i32 = arith.constant 12 : i32
    %cst_51 = arith.constant dense<0xFF800000> : vector<1x16xf32>
    %387 = vector.multi_reduction <maximumf>, %385, %cst_51 [2] : vector<1x16x16xf32> to vector<1x16xf32>
    %388 = vector.shape_cast %387 : vector<1x16xf32> to vector<1x16x1xf32>
    %389 = arith.maximumf %388, %370 : vector<1x16x1xf32>
    %390 = vector.broadcast %389 : vector<1x16x1xf32> to vector<1x16x16xf32>
    %391 = arith.subf %385, %390 : vector<1x16x16xf32>
    %392 = math.exp %391 : vector<1x16x16xf32>
    %cst_52 = arith.constant dense<0.000000e+00> : vector<1x16xf32>
    %393 = vector.multi_reduction <add>, %392, %cst_52 [2] : vector<1x16x16xf32> to vector<1x16xf32>
    %394 = vector.shape_cast %393 : vector<1x16xf32> to vector<1x16x1xf32>
    %395 = arith.subf %370, %389 : vector<1x16x1xf32>
    %396 = math.exp %395 : vector<1x16x1xf32>
    %397 = arith.addf %394, %396 : vector<1x16x1xf32>
    %398 = math.log %397 : vector<1x16x1xf32>
    %399 = arith.addf %389, %398 : vector<1x16x1xf32>
    %400 = vector.broadcast %399 : vector<1x16x1xf32> to vector<1x16x16xf32>
    %401 = arith.subf %385, %400 : vector<1x16x16xf32>
    %402 = arith.subf %370, %399 : vector<1x16x1xf32>
    %cst_53 = arith.constant dense<0xFF800000> : vector<1x16xf32>
    %403 = vector.multi_reduction <maximumf>, %401, %cst_53 [1] : vector<1x16x16xf32> to vector<1x16xf32>
    %404 = vector.shape_cast %403 : vector<1x16xf32> to vector<1x1x16xf32>
    %405 = arith.maximumf %404, %386 : vector<1x1x16xf32>
    %406 = vector.broadcast %405 : vector<1x1x16xf32> to vector<1x16x16xf32>
    %407 = arith.subf %401, %406 : vector<1x16x16xf32>
    %408 = math.exp %407 : vector<1x16x16xf32>
    %cst_54 = arith.constant dense<0.000000e+00> : vector<1x16xf32>
    %409 = vector.multi_reduction <add>, %408, %cst_54 [1] : vector<1x16x16xf32> to vector<1x16xf32>
    %410 = vector.shape_cast %409 : vector<1x16xf32> to vector<1x1x16xf32>
    %411 = arith.subf %386, %405 : vector<1x1x16xf32>
    %412 = math.exp %411 : vector<1x1x16xf32>
    %413 = arith.addf %410, %412 : vector<1x1x16xf32>
    %414 = math.log %413 : vector<1x1x16xf32>
    %415 = arith.addf %405, %414 : vector<1x1x16xf32>
    %416 = vector.broadcast %415 : vector<1x1x16xf32> to vector<1x16x16xf32>
    %417 = arith.subf %401, %416 : vector<1x16x16xf32>
    %418 = arith.subf %386, %415 : vector<1x1x16xf32>
    %c13_i32 = arith.constant 13 : i32
    %cst_55 = arith.constant dense<0xFF800000> : vector<1x16xf32>
    %419 = vector.multi_reduction <maximumf>, %417, %cst_55 [2] : vector<1x16x16xf32> to vector<1x16xf32>
    %420 = vector.shape_cast %419 : vector<1x16xf32> to vector<1x16x1xf32>
    %421 = arith.maximumf %420, %402 : vector<1x16x1xf32>
    %422 = vector.broadcast %421 : vector<1x16x1xf32> to vector<1x16x16xf32>
    %423 = arith.subf %417, %422 : vector<1x16x16xf32>
    %424 = math.exp %423 : vector<1x16x16xf32>
    %cst_56 = arith.constant dense<0.000000e+00> : vector<1x16xf32>
    %425 = vector.multi_reduction <add>, %424, %cst_56 [2] : vector<1x16x16xf32> to vector<1x16xf32>
    %426 = vector.shape_cast %425 : vector<1x16xf32> to vector<1x16x1xf32>
    %427 = arith.subf %402, %421 : vector<1x16x1xf32>
    %428 = math.exp %427 : vector<1x16x1xf32>
    %429 = arith.addf %426, %428 : vector<1x16x1xf32>
    %430 = math.log %429 : vector<1x16x1xf32>
    %431 = arith.addf %421, %430 : vector<1x16x1xf32>
    %432 = vector.broadcast %431 : vector<1x16x1xf32> to vector<1x16x16xf32>
    %433 = arith.subf %417, %432 : vector<1x16x16xf32>
    %434 = arith.subf %402, %431 : vector<1x16x1xf32>
    %cst_57 = arith.constant dense<0xFF800000> : vector<1x16xf32>
    %435 = vector.multi_reduction <maximumf>, %433, %cst_57 [1] : vector<1x16x16xf32> to vector<1x16xf32>
    %436 = vector.shape_cast %435 : vector<1x16xf32> to vector<1x1x16xf32>
    %437 = arith.maximumf %436, %418 : vector<1x1x16xf32>
    %438 = vector.broadcast %437 : vector<1x1x16xf32> to vector<1x16x16xf32>
    %439 = arith.subf %433, %438 : vector<1x16x16xf32>
    %440 = math.exp %439 : vector<1x16x16xf32>
    %cst_58 = arith.constant dense<0.000000e+00> : vector<1x16xf32>
    %441 = vector.multi_reduction <add>, %440, %cst_58 [1] : vector<1x16x16xf32> to vector<1x16xf32>
    %442 = vector.shape_cast %441 : vector<1x16xf32> to vector<1x1x16xf32>
    %443 = arith.subf %418, %437 : vector<1x1x16xf32>
    %444 = math.exp %443 : vector<1x1x16xf32>
    %445 = arith.addf %442, %444 : vector<1x1x16xf32>
    %446 = math.log %445 : vector<1x1x16xf32>
    %447 = arith.addf %437, %446 : vector<1x1x16xf32>
    %448 = vector.broadcast %447 : vector<1x1x16xf32> to vector<1x16x16xf32>
    %449 = arith.subf %433, %448 : vector<1x16x16xf32>
    %450 = arith.subf %418, %447 : vector<1x1x16xf32>
    %c14_i32 = arith.constant 14 : i32
    %cst_59 = arith.constant dense<0xFF800000> : vector<1x16xf32>
    %451 = vector.multi_reduction <maximumf>, %449, %cst_59 [2] : vector<1x16x16xf32> to vector<1x16xf32>
    %452 = vector.shape_cast %451 : vector<1x16xf32> to vector<1x16x1xf32>
    %453 = arith.maximumf %452, %434 : vector<1x16x1xf32>
    %454 = vector.broadcast %453 : vector<1x16x1xf32> to vector<1x16x16xf32>
    %455 = arith.subf %449, %454 : vector<1x16x16xf32>
    %456 = math.exp %455 : vector<1x16x16xf32>
    %cst_60 = arith.constant dense<0.000000e+00> : vector<1x16xf32>
    %457 = vector.multi_reduction <add>, %456, %cst_60 [2] : vector<1x16x16xf32> to vector<1x16xf32>
    %458 = vector.shape_cast %457 : vector<1x16xf32> to vector<1x16x1xf32>
    %459 = arith.subf %434, %453 : vector<1x16x1xf32>
    %460 = math.exp %459 : vector<1x16x1xf32>
    %461 = arith.addf %458, %460 : vector<1x16x1xf32>
    %462 = math.log %461 : vector<1x16x1xf32>
    %463 = arith.addf %453, %462 : vector<1x16x1xf32>
    %464 = vector.broadcast %463 : vector<1x16x1xf32> to vector<1x16x16xf32>
    %465 = arith.subf %449, %464 : vector<1x16x16xf32>
    %466 = arith.subf %434, %463 : vector<1x16x1xf32>
    %cst_61 = arith.constant dense<0xFF800000> : vector<1x16xf32>
    %467 = vector.multi_reduction <maximumf>, %465, %cst_61 [1] : vector<1x16x16xf32> to vector<1x16xf32>
    %468 = vector.shape_cast %467 : vector<1x16xf32> to vector<1x1x16xf32>
    %469 = arith.maximumf %468, %450 : vector<1x1x16xf32>
    %470 = vector.broadcast %469 : vector<1x1x16xf32> to vector<1x16x16xf32>
    %471 = arith.subf %465, %470 : vector<1x16x16xf32>
    %472 = math.exp %471 : vector<1x16x16xf32>
    %cst_62 = arith.constant dense<0.000000e+00> : vector<1x16xf32>
    %473 = vector.multi_reduction <add>, %472, %cst_62 [1] : vector<1x16x16xf32> to vector<1x16xf32>
    %474 = vector.shape_cast %473 : vector<1x16xf32> to vector<1x1x16xf32>
    %475 = arith.subf %450, %469 : vector<1x1x16xf32>
    %476 = math.exp %475 : vector<1x1x16xf32>
    %477 = arith.addf %474, %476 : vector<1x1x16xf32>
    %478 = math.log %477 : vector<1x1x16xf32>
    %479 = arith.addf %469, %478 : vector<1x1x16xf32>
    %480 = vector.broadcast %479 : vector<1x1x16xf32> to vector<1x16x16xf32>
    %481 = arith.subf %465, %480 : vector<1x16x16xf32>
    %482 = arith.subf %450, %479 : vector<1x1x16xf32>
    %c15_i32 = arith.constant 15 : i32
    %cst_63 = arith.constant dense<0xFF800000> : vector<1x16xf32>
    %483 = vector.multi_reduction <maximumf>, %481, %cst_63 [2] : vector<1x16x16xf32> to vector<1x16xf32>
    %484 = vector.shape_cast %483 : vector<1x16xf32> to vector<1x16x1xf32>
    %485 = arith.maximumf %484, %466 : vector<1x16x1xf32>
    %486 = vector.broadcast %485 : vector<1x16x1xf32> to vector<1x16x16xf32>
    %487 = arith.subf %481, %486 : vector<1x16x16xf32>
    %488 = math.exp %487 : vector<1x16x16xf32>
    %cst_64 = arith.constant dense<0.000000e+00> : vector<1x16xf32>
    %489 = vector.multi_reduction <add>, %488, %cst_64 [2] : vector<1x16x16xf32> to vector<1x16xf32>
    %490 = vector.shape_cast %489 : vector<1x16xf32> to vector<1x16x1xf32>
    %491 = arith.subf %466, %485 : vector<1x16x1xf32>
    %492 = math.exp %491 : vector<1x16x1xf32>
    %493 = arith.addf %490, %492 : vector<1x16x1xf32>
    %494 = math.log %493 : vector<1x16x1xf32>
    %495 = arith.addf %485, %494 : vector<1x16x1xf32>
    %496 = vector.broadcast %495 : vector<1x16x1xf32> to vector<1x16x16xf32>
    %497 = arith.subf %481, %496 : vector<1x16x16xf32>
    %498 = arith.subf %466, %495 : vector<1x16x1xf32>
    %cst_65 = arith.constant dense<0xFF800000> : vector<1x16xf32>
    %499 = vector.multi_reduction <maximumf>, %497, %cst_65 [1] : vector<1x16x16xf32> to vector<1x16xf32>
    %500 = vector.shape_cast %499 : vector<1x16xf32> to vector<1x1x16xf32>
    %501 = arith.maximumf %500, %482 : vector<1x1x16xf32>
    %502 = vector.broadcast %501 : vector<1x1x16xf32> to vector<1x16x16xf32>
    %503 = arith.subf %497, %502 : vector<1x16x16xf32>
    %504 = math.exp %503 : vector<1x16x16xf32>
    %cst_66 = arith.constant dense<0.000000e+00> : vector<1x16xf32>
    %505 = vector.multi_reduction <add>, %504, %cst_66 [1] : vector<1x16x16xf32> to vector<1x16xf32>
    %506 = vector.shape_cast %505 : vector<1x16xf32> to vector<1x1x16xf32>
    %507 = arith.subf %482, %501 : vector<1x1x16xf32>
    %508 = math.exp %507 : vector<1x1x16xf32>
    %509 = arith.addf %506, %508 : vector<1x1x16xf32>
    %510 = math.log %509 : vector<1x1x16xf32>
    %511 = arith.addf %501, %510 : vector<1x1x16xf32>
    %512 = vector.broadcast %511 : vector<1x1x16xf32> to vector<1x16x16xf32>
    %513 = arith.subf %497, %512 : vector<1x16x16xf32>
    %514 = arith.subf %482, %511 : vector<1x1x16xf32>
    %c16_i32 = arith.constant 16 : i32
    %cst_67 = arith.constant dense<0xFF800000> : vector<1x16xf32>
    %515 = vector.multi_reduction <maximumf>, %513, %cst_67 [2] : vector<1x16x16xf32> to vector<1x16xf32>
    %516 = vector.shape_cast %515 : vector<1x16xf32> to vector<1x16x1xf32>
    %517 = arith.maximumf %516, %498 : vector<1x16x1xf32>
    %518 = vector.broadcast %517 : vector<1x16x1xf32> to vector<1x16x16xf32>
    %519 = arith.subf %513, %518 : vector<1x16x16xf32>
    %520 = math.exp %519 : vector<1x16x16xf32>
    %cst_68 = arith.constant dense<0.000000e+00> : vector<1x16xf32>
    %521 = vector.multi_reduction <add>, %520, %cst_68 [2] : vector<1x16x16xf32> to vector<1x16xf32>
    %522 = vector.shape_cast %521 : vector<1x16xf32> to vector<1x16x1xf32>
    %523 = arith.subf %498, %517 : vector<1x16x1xf32>
    %524 = math.exp %523 : vector<1x16x1xf32>
    %525 = arith.addf %522, %524 : vector<1x16x1xf32>
    %526 = math.log %525 : vector<1x16x1xf32>
    %527 = arith.addf %517, %526 : vector<1x16x1xf32>
    %528 = vector.broadcast %527 : vector<1x16x1xf32> to vector<1x16x16xf32>
    %529 = arith.subf %513, %528 : vector<1x16x16xf32>
    %530 = arith.subf %498, %527 : vector<1x16x1xf32>
    %cst_69 = arith.constant dense<0xFF800000> : vector<1x16xf32>
    %531 = vector.multi_reduction <maximumf>, %529, %cst_69 [1] : vector<1x16x16xf32> to vector<1x16xf32>
    %532 = vector.shape_cast %531 : vector<1x16xf32> to vector<1x1x16xf32>
    %533 = arith.maximumf %532, %514 : vector<1x1x16xf32>
    %534 = vector.broadcast %533 : vector<1x1x16xf32> to vector<1x16x16xf32>
    %535 = arith.subf %529, %534 : vector<1x16x16xf32>
    %536 = math.exp %535 : vector<1x16x16xf32>
    %cst_70 = arith.constant dense<0.000000e+00> : vector<1x16xf32>
    %537 = vector.multi_reduction <add>, %536, %cst_70 [1] : vector<1x16x16xf32> to vector<1x16xf32>
    %538 = vector.shape_cast %537 : vector<1x16xf32> to vector<1x1x16xf32>
    %539 = arith.subf %514, %533 : vector<1x1x16xf32>
    %540 = math.exp %539 : vector<1x1x16xf32>
    %541 = arith.addf %538, %540 : vector<1x1x16xf32>
    %542 = math.log %541 : vector<1x1x16xf32>
    %543 = arith.addf %533, %542 : vector<1x1x16xf32>
    %544 = vector.broadcast %543 : vector<1x1x16xf32> to vector<1x16x16xf32>
    %545 = arith.subf %529, %544 : vector<1x16x16xf32>
    %546 = arith.subf %514, %543 : vector<1x1x16xf32>
    %c17_i32 = arith.constant 17 : i32
    %cst_71 = arith.constant dense<0xFF800000> : vector<1x16xf32>
    %547 = vector.multi_reduction <maximumf>, %545, %cst_71 [2] : vector<1x16x16xf32> to vector<1x16xf32>
    %548 = vector.shape_cast %547 : vector<1x16xf32> to vector<1x16x1xf32>
    %549 = arith.maximumf %548, %530 : vector<1x16x1xf32>
    %550 = vector.broadcast %549 : vector<1x16x1xf32> to vector<1x16x16xf32>
    %551 = arith.subf %545, %550 : vector<1x16x16xf32>
    %552 = math.exp %551 : vector<1x16x16xf32>
    %cst_72 = arith.constant dense<0.000000e+00> : vector<1x16xf32>
    %553 = vector.multi_reduction <add>, %552, %cst_72 [2] : vector<1x16x16xf32> to vector<1x16xf32>
    %554 = vector.shape_cast %553 : vector<1x16xf32> to vector<1x16x1xf32>
    %555 = arith.subf %530, %549 : vector<1x16x1xf32>
    %556 = math.exp %555 : vector<1x16x1xf32>
    %557 = arith.addf %554, %556 : vector<1x16x1xf32>
    %558 = math.log %557 : vector<1x16x1xf32>
    %559 = arith.addf %549, %558 : vector<1x16x1xf32>
    %560 = vector.broadcast %559 : vector<1x16x1xf32> to vector<1x16x16xf32>
    %561 = arith.subf %545, %560 : vector<1x16x16xf32>
    %562 = arith.subf %530, %559 : vector<1x16x1xf32>
    %cst_73 = arith.constant dense<0xFF800000> : vector<1x16xf32>
    %563 = vector.multi_reduction <maximumf>, %561, %cst_73 [1] : vector<1x16x16xf32> to vector<1x16xf32>
    %564 = vector.shape_cast %563 : vector<1x16xf32> to vector<1x1x16xf32>
    %565 = arith.maximumf %564, %546 : vector<1x1x16xf32>
    %566 = vector.broadcast %565 : vector<1x1x16xf32> to vector<1x16x16xf32>
    %567 = arith.subf %561, %566 : vector<1x16x16xf32>
    %568 = math.exp %567 : vector<1x16x16xf32>
    %cst_74 = arith.constant dense<0.000000e+00> : vector<1x16xf32>
    %569 = vector.multi_reduction <add>, %568, %cst_74 [1] : vector<1x16x16xf32> to vector<1x16xf32>
    %570 = vector.shape_cast %569 : vector<1x16xf32> to vector<1x1x16xf32>
    %571 = arith.subf %546, %565 : vector<1x1x16xf32>
    %572 = math.exp %571 : vector<1x1x16xf32>
    %573 = arith.addf %570, %572 : vector<1x1x16xf32>
    %574 = math.log %573 : vector<1x1x16xf32>
    %575 = arith.addf %565, %574 : vector<1x1x16xf32>
    %576 = vector.broadcast %575 : vector<1x1x16xf32> to vector<1x16x16xf32>
    %577 = arith.subf %561, %576 : vector<1x16x16xf32>
    %578 = arith.subf %546, %575 : vector<1x1x16xf32>
    %c18_i32 = arith.constant 18 : i32
    %cst_75 = arith.constant dense<0xFF800000> : vector<1x16xf32>
    %579 = vector.multi_reduction <maximumf>, %577, %cst_75 [2] : vector<1x16x16xf32> to vector<1x16xf32>
    %580 = vector.shape_cast %579 : vector<1x16xf32> to vector<1x16x1xf32>
    %581 = arith.maximumf %580, %562 : vector<1x16x1xf32>
    %582 = vector.broadcast %581 : vector<1x16x1xf32> to vector<1x16x16xf32>
    %583 = arith.subf %577, %582 : vector<1x16x16xf32>
    %584 = math.exp %583 : vector<1x16x16xf32>
    %cst_76 = arith.constant dense<0.000000e+00> : vector<1x16xf32>
    %585 = vector.multi_reduction <add>, %584, %cst_76 [2] : vector<1x16x16xf32> to vector<1x16xf32>
    %586 = vector.shape_cast %585 : vector<1x16xf32> to vector<1x16x1xf32>
    %587 = arith.subf %562, %581 : vector<1x16x1xf32>
    %588 = math.exp %587 : vector<1x16x1xf32>
    %589 = arith.addf %586, %588 : vector<1x16x1xf32>
    %590 = math.log %589 : vector<1x16x1xf32>
    %591 = arith.addf %581, %590 : vector<1x16x1xf32>
    %592 = vector.broadcast %591 : vector<1x16x1xf32> to vector<1x16x16xf32>
    %593 = arith.subf %577, %592 : vector<1x16x16xf32>
    %594 = arith.subf %562, %591 : vector<1x16x1xf32>
    %cst_77 = arith.constant dense<0xFF800000> : vector<1x16xf32>
    %595 = vector.multi_reduction <maximumf>, %593, %cst_77 [1] : vector<1x16x16xf32> to vector<1x16xf32>
    %596 = vector.shape_cast %595 : vector<1x16xf32> to vector<1x1x16xf32>
    %597 = arith.maximumf %596, %578 : vector<1x1x16xf32>
    %598 = vector.broadcast %597 : vector<1x1x16xf32> to vector<1x16x16xf32>
    %599 = arith.subf %593, %598 : vector<1x16x16xf32>
    %600 = math.exp %599 : vector<1x16x16xf32>
    %cst_78 = arith.constant dense<0.000000e+00> : vector<1x16xf32>
    %601 = vector.multi_reduction <add>, %600, %cst_78 [1] : vector<1x16x16xf32> to vector<1x16xf32>
    %602 = vector.shape_cast %601 : vector<1x16xf32> to vector<1x1x16xf32>
    %603 = arith.subf %578, %597 : vector<1x1x16xf32>
    %604 = math.exp %603 : vector<1x1x16xf32>
    %605 = arith.addf %602, %604 : vector<1x1x16xf32>
    %606 = math.log %605 : vector<1x1x16xf32>
    %607 = arith.addf %597, %606 : vector<1x1x16xf32>
    %608 = vector.broadcast %607 : vector<1x1x16xf32> to vector<1x16x16xf32>
    %609 = arith.subf %593, %608 : vector<1x16x16xf32>
    %610 = arith.subf %578, %607 : vector<1x1x16xf32>
    %c19_i32 = arith.constant 19 : i32
    %cst_79 = arith.constant dense<0xFF800000> : vector<1x16xf32>
    %611 = vector.multi_reduction <maximumf>, %609, %cst_79 [2] : vector<1x16x16xf32> to vector<1x16xf32>
    %612 = vector.shape_cast %611 : vector<1x16xf32> to vector<1x16x1xf32>
    %613 = arith.maximumf %612, %594 : vector<1x16x1xf32>
    %614 = vector.broadcast %613 : vector<1x16x1xf32> to vector<1x16x16xf32>
    %615 = arith.subf %609, %614 : vector<1x16x16xf32>
    %616 = math.exp %615 : vector<1x16x16xf32>
    %cst_80 = arith.constant dense<0.000000e+00> : vector<1x16xf32>
    %617 = vector.multi_reduction <add>, %616, %cst_80 [2] : vector<1x16x16xf32> to vector<1x16xf32>
    %618 = vector.shape_cast %617 : vector<1x16xf32> to vector<1x16x1xf32>
    %619 = arith.subf %594, %613 : vector<1x16x1xf32>
    %620 = math.exp %619 : vector<1x16x1xf32>
    %621 = arith.addf %618, %620 : vector<1x16x1xf32>
    %622 = math.log %621 : vector<1x16x1xf32>
    %623 = arith.addf %613, %622 : vector<1x16x1xf32>
    %624 = vector.broadcast %623 : vector<1x16x1xf32> to vector<1x16x16xf32>
    %625 = arith.subf %609, %624 : vector<1x16x16xf32>
    %626 = arith.subf %594, %623 : vector<1x16x1xf32>
    %cst_81 = arith.constant dense<0xFF800000> : vector<1x16xf32>
    %627 = vector.multi_reduction <maximumf>, %625, %cst_81 [1] : vector<1x16x16xf32> to vector<1x16xf32>
    %628 = vector.shape_cast %627 : vector<1x16xf32> to vector<1x1x16xf32>
    %629 = arith.maximumf %628, %610 : vector<1x1x16xf32>
    %630 = vector.broadcast %629 : vector<1x1x16xf32> to vector<1x16x16xf32>
    %631 = arith.subf %625, %630 : vector<1x16x16xf32>
    %632 = math.exp %631 : vector<1x16x16xf32>
    %cst_82 = arith.constant dense<0.000000e+00> : vector<1x16xf32>
    %633 = vector.multi_reduction <add>, %632, %cst_82 [1] : vector<1x16x16xf32> to vector<1x16xf32>
    %634 = vector.shape_cast %633 : vector<1x16xf32> to vector<1x1x16xf32>
    %635 = arith.subf %610, %629 : vector<1x1x16xf32>
    %636 = math.exp %635 : vector<1x1x16xf32>
    %637 = arith.addf %634, %636 : vector<1x1x16xf32>
    %638 = math.log %637 : vector<1x1x16xf32>
    %639 = arith.addf %629, %638 : vector<1x1x16xf32>
    %640 = vector.broadcast %639 : vector<1x1x16xf32> to vector<1x16x16xf32>
    %641 = arith.subf %625, %640 : vector<1x16x16xf32>
    %642 = arith.subf %610, %639 : vector<1x1x16xf32>
    %c0_83 = arith.constant 0 : index
    %c0_84 = arith.constant 0 : index
    %c0_85 = arith.constant 0 : index
    %643 = vector.load %arg2[%c0_83, %c0_84, %c0_85] : memref<1x16x16xf32, #tpu.memory_space<vmem>>, vector<1x16x16xf32>
    tpu.vector_store %arg2[%c0_83, %c0_84, %c0_85], %641 {strides = array<i32>} : memref<1x16x16xf32, #tpu.memory_space<vmem>>, vector<1x16x16xf32>,
    %644 = math.exp %641 : vector<1x16x16xf32>
    %c0_86 = arith.constant 0 : index
    %c0_87 = arith.constant 0 : index
    %c0_88 = arith.constant 0 : index
    %645 = vector.load %arg3[%c0_86, %c0_87, %c0_88] : memref<1x16x16xf32, #tpu.memory_space<vmem>>, vector<1x16x16xf32>
    tpu.vector_store %arg3[%c0_86, %c0_87, %c0_88], %644 {strides = array<i32>} : memref<1x16x16xf32, #tpu.memory_space<vmem>>, vector<1x16x16xf32>,
    return
  }
  func.func @transform_0(%arg0: i32) -> (i32, i32, i32) {
    %c0_i32 = arith.constant 0 : i32
    %c0_i32_0 = arith.constant 0 : i32
    %c0_i32_1 = arith.constant 0 : i32
    return %arg0, %c0_i32, %c0_i32_0 : i32, i32, i32
  }
  func.func @transform_1(%arg0: i32) -> (i32, i32, i32) {
    %c0_i32 = arith.constant 0 : i32
    %c0_i32_0 = arith.constant 0 : i32
    %c0_i32_1 = arith.constant 0 : i32
    return %arg0, %c0_i32, %c0_i32_0 : i32, i32, i32
  }
  func.func @transform_2(%arg0: i32) -> (i32, i32, i32) {
    %c0_i32 = arith.constant 0 : i32
    %c0_i32_0 = arith.constant 0 : i32
    %c0_i32_1 = arith.constant 0 : i32
    return %arg0, %c0_i32, %c0_i32_0 : i32, i32, i32
  }
}

</mosaic_0001>

<bundles_post_ra>
// kernel: sinkhorn_rpm_exp_pallas.1
= control target key start
LH: loop header
LB: loop body
LE: loop exit
PB: predicated region body
PF: predicated region fallthrough
CT: control target
= control target key end

     0   :  { %8 = vsyncpa [#allocation3], 0  ;;  %s3054_s0 = inlined_call_operand.hbm [shape: f32[2,16,16], index: 0, kind: input, shape index: {}]   ;;  %s3055_s1 = inlined_call_operand.hbm [shape: f32[2,16,16], index: 1, kind: output, shape index: {0}]   ;;  %s3056_s2 = inlined_call_operand.hbm [shape: f32[2,16,16], index: 2, kind: output, shape index: {1}]  }
   0x1   :  { %10 = vsyncpa [#allocation3 + $0x1], 0 }
   0x2   :  { %11 = vsyncpa [#allocation4], 0 }
   0x3   :  { %13 = vsyncpa [#allocation4 + $0x1], 0 }
   0x4   :  { %14 = vsyncpa [#allocation7], 0 }
   0x5   :  { %16 = vsyncpa [#allocation7 + $0x1], 0  ;;  %s2413_s9 = smov 0   ;;  %s2415_s10 = smov 0  }
   0x6   :  { %s2417_s11 = smov 0   ;;  %s2419_s12 = smov 0  }
   0x7 LB: > { %s2434_s13 = sadd.s32 4294967295, %s2389_s12   ;;  %s1781_s14 = sadd.s32 4294967294, %s2389_s12   ;;  %s2389_s12 = sphi %s2419_s12, %s3069_s12   ;;  %s2385_s11 = sphi %s2417_s11, %s3068_s11   ;;  %s2381_s10 = sphi %s2415_s10, %s3067_s10   ;;  %s2377_s9 = sphi %s2413_s9, %s3066_s9  }
   0x8   : > { %s2438_s15 = sadd.s32 1, %s2389_s12   ;;  %s29_s16 = sadd.s32 1, %s2385_s11 }
   0x9   : > { %s26_s17 = ssub.s32 %s2389_s12, %s2438_s15  ;;  %p36_p0 = scmp.ne.s32.totalorder %s2385_s11, %s2381_s10 }
   0xa   : > { %p27_p1 = scmp.eq.s32.totalorder %s26_s17, 0  ;;  %p37_p2 = scmp.eq.s32.totalorder %s2389_s12, 0 }
   0xb   : > { %p42_p3 = scmp.ne.s32.totalorder %s2381_s10, %s2377_s9  ;;  %p43_p4 = scmp.eq.s32.totalorder %s2434_s13, 0 }
   0xc   : > { %s2450_s18 = scalar_select %p27_p1, %s2385_s11, %s29_s16  }
   0xd   : > { %p2452_p5 = por %p37_p2, %p36_p0  ;;  %p2456_p6 = por %p43_p4, %p42_p3 }
   0xe   : > { %p66_p7 = scmp.eq.s32.totalorder %s2434_s13, 1  ;;  %p72_p8 = scmp.eq.s32.totalorder %s1781_s14, 1 }
   0xf   : > { %p1819_p10 = scmp.lt.s32.totalorder %s2389_s12, 2  ;;  %s118_s23 = sand.u32 1, %s2385_s11  }
  0x10   : > { %p2463_p11 = por %p66_p7, %p36_p0  ;;  %p2467_p12 = por %p72_p8, %p42_p3 }
  0x11   : > { %s1799_s24 = sshll.u32 %s2389_s12, 8  ;;  %s1784_s25 = sshll.u32 %s118_s23, 4 }
  0x12   : > { %s3060_s21 = scalar_select %p2463_p11, 1, 0 }
  0x13   : > { %s3061_s22 = scalar_select %p2467_p12, 1, 0 }
  0x14   : > { %s2476_s28 = scalar_lea.hbm %s3054_s0, %s1799_s24  ;;  %s122_s29 = scalar_lea.vmem [#allocation2], %s1784_s25 }
  0x15   : > { %s129_s30 = sshll.u32 %s122_s29, 4  ;;  %p2480_p13 = pnand %p1819_p10, %p2452_p5  ;;  %s2484_s30 = int_to_ptr.vmem [resolvable:$true] %s129_s30 }
  0x16   : > { %s2486_s4 = scalar_lea.sflag [#allocation3], %s118_s23  ;;  %s2261_s5 = scalar_lea.hbm %s2476_s28, 256 }
  0x17   : > { %p2262_p0 = scmp.ne.s32.totalorder %s2476_s28, %s2261_s5  ;;  %p2263_p1 = pneg %p2480_p13 }
  0x18   : > { %s2266_s8 = scalar_lea.hbm %s3054_s0, 512  ;;  %p2267_p4 = scmp.lt.u32.totalorder %s2476_s28, %s3054_s0 }
  0x19   : > { %p2264_p2 = pnand %p2263_p1, %p2262_p0  ;;  %p2268_p5 = scmp.lt.u32.totalorder %s2266_s8, %s2261_s5 }
  0x1a   : > { %p2270_p8 = scmp.lt.u32.totalorder %s2261_s5, %s2476_s28 }
  0x1b   : > { %p2265_p3 = pneg %p2264_p2  ;;  %p2269_p7 = por %p2268_p5, %p2267_p4 }
  0x1d   : > { %p2271_p10 = por %p2270_p8, %p2269_p7 }
  0x1f   : > { %p2272_p9 = pnand %p2271_p10, %p2265_p3 }
  0x21   : > { %2275 = shalt.err (!%p2272_p9)
}
  0x22   : > { %s2276_s17 = scalar_lea.vmem %s2484_s30, 256  ;;  %s2391_s19 = smov [#allocation2]  }
  0x23   : > { %p2277_p0 = scmp.ne.s32.totalorder %s2484_s30, %s2276_s17  ;;  %s2281_s23 = sshll.u32 %s2391_s19, 4  ;;  %s2282_s23 = int_to_ptr.vmem [resolvable:$false] %s2281_s23 }
  0x24   : > { %s2283_s24 = scalar_lea.vmem %s2282_s23, 512  ;;  %p2284_p11 = scmp.lt.s32.totalorder %s2484_s30, %s2282_s23 }
  0x25   : > { %p2279_p2 = pnand %p2277_p0, %p2263_p1  ;;  %p2285_p4 = scmp.lt.s32.totalorder %s2283_s24, %s2276_s17 }
  0x27   : > { %p2280_p12 = pneg %p2279_p2  ;;  %p2286_p5 = por %p2285_p4, %p2284_p11 }
  0x29   : > { %p2287_p7 = pnand %p2286_p5, %p2280_p12 }
  0x2b   : > { %2290 = shalt.err (!%p2287_p7)
}
  0x2c   : > { %s2392_s25 = smov 128   ;;  %s2393_s26 = smov 8  }
  0x2d   : > { %1811 = dma.hbm_to_vmem [thread:$0]  (!%p2480_p13), %s2476_s28, 256, %s2484_s30, %s2486_s4, %s2392_s25, %s2392_s25, %s2393_s26  }
  0x2e   : > { %p1787_p9 = scmp.ge.s32.totalorder %s2389_s12, 1  ;;  %p137_p1 = scmp.lt.s32.totalorder %s2389_s12, 3 }
  0x30   : > { %p138_p3 = pnand %p1787_p9, %p137_p1 }
  0x31   : > { %s2517_s27 = sand.u32 (!%p138_p3), 1, %s2381_s10  }
  0x32   : > { %141 = sbr.rel (%p138_p3) target bundleno = 7901 (0x1edd), region = 24  ;;  %s2520_s29 = sshll.u32 (!%p138_p3), %s2517_s27, 4 }
  0x33   : > { %s144_s5 = scalar_lea.sflag (!%p138_p3), [#allocation3], %s2517_s27  ;;  %s147_s6 = scalar_lea.vmem (!%p138_p3), [#allocation2], %s2520_s29 }
  0x39   : > { %2364 = dma.done.wait (%p2456_p6), %s144_s5, 256  }
  0x3a   : > { %2366 = vsyncadd (%p2456_p6), %s144_s5, 4294967040  ;;  %vm175_vm0 = vcmask 130048   ;;  %v173_v0 = vld [vmem:[%s147_s6] sm:$0xff]  ;;  %v174_v1 = vld [vmem:[%s147_s6 + $0x8] sm:$0xff]  ;;  %s1800_s20 = sshll.u32 %s2434_s13, 8  ;;  %s165_s28 = scalar_lea.vmem [#allocation5], %s2520_s29 }
  0x3b   : > { %v176_v2 = vsel %vm175_vm0, %v173_v0, -inf  ;;  %v179_v3 = vsel %vm175_vm0, %v174_v1, -inf  ;;  %s1660_s30 = sshll.u32 %s165_s28, 4  ;;  %s2964_s7 = scalar_lea.hbm %s3055_s1, %s1800_s20  ;;  %s2966_s30 = int_to_ptr.vmem [resolvable:$true] %s1660_s30 }
  0x3c   : > { %177 = vmax.xlane.f32.xlu0 %v176_v2  ;;  %s1642_s8 = scalar_lea.sflag [#allocation4], %s2517_s27  ;;  %s2291_s14 = scalar_lea.vmem %s2966_s30, 256 }
  0x3d   : > { %p2292_p6 = scmp.ne.s32.totalorder %s2966_s30, %s2291_s14  ;;  %p3063_p11 = scmp.ne.s32.totalorder %s3060_s21, 0 }
  0x3e   : > { %s2394_s16 = smov [#allocation5]  }
  0x3f   : > { %p2293_p12 = pnand %p2292_p6, %p3063_p11  ;;  %s2295_s17 = sshll.u32 %s2394_s16, 4  ;;  %s2296_s17 = int_to_ptr.vmem [resolvable:$false] %s2295_s17 }
  0x40   : > { %180 = vmax.xlane.f32.xlu0 %v179_v3  ;;  %s2297_s19 = scalar_lea.vmem %s2296_s17, 512  ;;  %p2298_p8 = scmp.lt.s32.totalorder %s2966_s30, %s2296_s17 }
  0x41   : > { %p2294_p13 = pneg %p2293_p12  ;;  %p2299_p10 = scmp.lt.s32.totalorder %s2297_s19, %s2291_s14 }
  0x43   : > { %p2300_p0 = por %p2299_p10, %p2298_p8 }
  0x45   : > { %p2301_p2 = pnand %p2300_p0, %p2294_p13 }
  0xc9   : > { %v178_v4 = vpop.xlane.xlu0 %177 }
  0xca   : > { %v182_v5 = vmax.f32 %v178_v4, 0.0 }
  0xcc   : > { %v184_v6 = vsub.f32 %v173_v0, %v182_v5  ;;  %v196_v16 = vsub.f32 0.0, %v182_v5 }
  0xcd   : > { %v181_v7 = vpop.xlane.xlu0 %180 }
  0xce   : > { %v186_v8 = vmul.f32 1.442695, %v184_v6  ;;  %v183_v9 = vmax.f32 %v181_v7, 0.0  ;;  %v198_v17 = vmul.f32 1.442695, %v196_v16 }
  0xd0   : > { %1857 = vpow2.f32 %v186_v8  ;;  %v185_v10 = vsub.f32 %v174_v1, %v183_v9  ;;  %v197_v18 = vsub.f32 0.0, %v183_v9 }
  0xd2   : > { %v188_v11 = vmul.f32 1.442695, %v185_v10  ;;  %v200_v19 = vmul.f32 1.442695, %v197_v18 }
  0xd4   : > { %1859 = vpow2.f32 %v188_v11 }
  0xd5   : > { %1861 = vpow2.f32 %v198_v17 }
  0xd6   : > { %1863 = vpow2.f32 %v200_v19 }
  0xda   : > { %v1858_v12 = vpop.eup %1857 }
  0xdb   : > { %v190_v13 = vsel %vm175_vm0, %v1858_v12, 0.0 }
  0xdc   : > { %191 = vadd.xlane.f32.xlu1 %v190_v13 }
  0xde   : > { %v1860_v14 = vpop.eup %1859 }
  0xdf   : > { %v193_v15 = vsel %vm175_vm0, %v1860_v14, 0.0  ;;  %v1862_v20 = vpop.eup %1861 }
  0xe0   : > { %194 = vadd.xlane.f32.xlu1 %v193_v15  ;;  %v1864_v23 = vpop.eup %1863 }
 0x169   : > { %v192_v21 = vpop.xlane.xlu1 %191 }
 0x16a   : > { %v202_v22 = vadd.f32 %v1862_v20, %v192_v21 }
 0x16c   : > { %1865 = vlog2.f32 %v202_v22 }
 0x16d   : > { %v195_v24 = vpop.xlane.xlu1 %194 }
 0x16e   : > { %v203_v25 = vadd.f32 %v1864_v23, %v195_v24 }
 0x170   : > { %1867 = vlog2.f32 %v203_v25 }
 0x176   : > { %v1866_v26 = vpop.eup %1865 }
 0x177   : > { %v205_v27 = vmul.f32 0.6931472, %v1866_v26 }
 0x179   : > { %v208_v28 = vadd.f32 %v205_v27, %v182_v5 }
 0x17a   : > { %v1868_v29 = vpop.eup %1867 }
 0x17b   : > { %v207_v30 = vmul.f32 0.6931472, %v1868_v29  ;;  %v210_v31 = vsub.f32 %v173_v0, %v208_v28  ;;  %v2540_v7 = vsub.f32 0.0, %v208_v28 }
 0x17d   : > { %v209_v32 = vadd.f32 %v207_v30, %v183_v9  ;;  %v214_v34 = vsel %vm175_vm0, %v210_v31, -inf }
 0x17f   : > { %v211_v33 = vsub.f32 %v174_v1, %v209_v32  ;;  %v2538_v6 = vsub.f32 0.0, %v209_v32 }
 0x181   : > { %v215_v35 = vsel %vm175_vm0, %v211_v33, -inf }
 0x182   : > { %v216_v36 = vmax.f32 %v214_v34, %v215_v35 }
 0x184   : > { %v217_v37 = vrot.slane %v216_v36, 4 }
 0x186   : > { %v218_v38 = vmax.f32 %v216_v36, %v217_v37 }
 0x188   : > { %v219_v39 = vrot.slane %v218_v38, 2 }
 0x18a   : > { %v220_v40 = vmax.f32 %v218_v38, %v219_v39 }
 0x18c   : > { %v221_v41 = vrot.slane %v220_v40, 1 }
 0x18e   : > { %v222_v42 = vmax.f32 %v220_v40, %v221_v41 }
 0x190   : > { %v223_v43 = vmax.f32 %v222_v42, 0.0 }
 0x192   : > { %v224_v44 = vsub.f32 %v210_v31, %v223_v43  ;;  %v225_v45 = vsub.f32 %v211_v33, %v223_v43  ;;  %v239_v48 = vsub.f32 0.0, %v223_v43 }
 0x194   : > { %v226_v46 = vmul.f32 1.442695, %v224_v44  ;;  %v228_v47 = vmul.f32 1.442695, %v225_v45  ;;  %v240_v53 = vmul.f32 1.442695, %v239_v48 }
 0x196   : > { %1869 = vpow2.f32 %v226_v46 }
 0x197   : > { %1871 = vpow2.f32 %v228_v47 }
 0x198   : > { %1873 = vpow2.f32 %v240_v53 }
 0x1a0   : > { %v1870_v49 = vpop.eup %1869 }
 0x1a1   : > { %v1872_v50 = vpop.eup %1871  ;;  %v230_v51 = vsel %vm175_vm0, %v1870_v49, 0.0 }
 0x1a2   : > { %v231_v52 = vsel %vm175_vm0, %v1872_v50, 0.0  ;;  %v1874_v61 = vpop.eup %1873 }
 0x1a3   : > { %v232_v54 = vadd.f32 %v231_v52, %v230_v51 }
 0x1a5   : > { %v233_v55 = vrot.slane %v232_v54, 4 }
 0x1a7   : > { %v234_v56 = vadd.f32 %v233_v55, %v232_v54 }
 0x1a9   : > { %v235_v57 = vrot.slane %v234_v56, 2 }
 0x1ab   : > { %v236_v58 = vadd.f32 %v235_v57, %v234_v56 }
 0x1ad   : > { %v237_v59 = vrot.slane %v236_v58, 1 }
 0x1af   : > { %v238_v60 = vadd.f32 %v237_v59, %v236_v58 }
 0x1b1   : > { %v242_v62 = vadd.f32 %v1874_v61, %v238_v60 }
 0x1b3   : > { %1875 = vlog2.f32 %v242_v62 }
 0x1bd   : > { %v1876_v63 = vpop.eup %1875 }
 0x1be   : > { %v244_v0 = vmul.f32 0.6931472, %v1876_v63 }
 0x1c0   : > { %v245_v1 = vadd.f32 %v244_v0, %v223_v43 }
 0x1c2   : > { %v247_v2 = vsub.f32 %v211_v33, %v245_v1  ;;  %v246_v3 = vsub.f32 %v210_v31, %v245_v1  ;;  %v248_v46 = vsub.f32 0.0, %v245_v1 }
 0x1c4   : > { %v252_v4 = vsel %vm175_vm0, %v247_v2, -inf  ;;  %v249_v5 = vsel %vm175_vm0, %v246_v3, -inf }
 0x1c5   : > { %253 = vmax.xlane.f32.xlu1 %v252_v4  ;;  %250 = vmax.xlane.f32.xlu0 %v249_v5 }
 0x252   : > { %v254_v8 = vpop.xlane.xlu1 %253  ;;  %v251_v9 = vpop.xlane.xlu0 %250 }
 0x253   : > { %v256_v10 = vmax.f32 %v254_v8, %v2538_v6  ;;  %v255_v11 = vmax.f32 %v251_v9, %v2540_v7 }
 0x255   : > { %v258_v12 = vsub.f32 %v247_v2, %v256_v10  ;;  %v257_v13 = vsub.f32 %v246_v3, %v255_v11  ;;  %v270_v20 = vsub.f32 %v2538_v6, %v256_v10  ;;  %v269_v21 = vsub.f32 %v2540_v7, %v255_v11 }
 0x257   : > { %v261_v14 = vmul.f32 1.442695, %v258_v12  ;;  %v259_v15 = vmul.f32 1.442695, %v257_v13  ;;  %v273_v22 = vmul.f32 1.442695, %v270_v20 }
 0x258   : > { %v271_v23 = vmul.f32 1.442695, %v269_v21 }
 0x259   : > { %1877 = vpow2.f32 %v261_v14 }
 0x25a   : > { %1879 = vpow2.f32 %v259_v15 }
 0x25b   : > { %1881 = vpow2.f32 %v273_v22 }
 0x25c   : > { %1883 = vpow2.f32 %v271_v23 }
 0x263   : > { %v1878_v16 = vpop.eup %1877 }
 0x264   : > { %v266_v17 = vsel %vm175_vm0, %v1878_v16, 0.0  ;;  %v1880_v18 = vpop.eup %1879 }
 0x265   : > { %267 = vadd.xlane.f32.xlu1 %v266_v17  ;;  %v263_v19 = vsel %vm175_vm0, %v1880_v18, 0.0  ;;  %v1882_v24 = vpop.eup %1881 }
 0x266   : > { %264 = vadd.xlane.f32.xlu0 %v263_v19  ;;  %v1884_v27 = vpop.eup %1883 }
 0x2f2   : > { %v268_v25 = vpop.xlane.xlu1 %267 }
 0x2f3   : > { %v276_v26 = vadd.f32 %v1882_v24, %v268_v25  ;;  %v265_v28 = vpop.xlane.xlu0 %264 }
 0x2f4   : > { %v275_v29 = vadd.f32 %v1884_v27, %v265_v28 }
 0x2f5   : > { %1885 = vlog2.f32 %v276_v26 }
 0x2f6   : > { %1887 = vlog2.f32 %v275_v29 }
 0x2ff   : > { %v1886_v30 = vpop.eup %1885 }
 0x300   : > { %v280_v31 = vmul.f32 0.6931472, %v1886_v30  ;;  %v1888_v32 = vpop.eup %1887 }
 0x301   : > { %v278_v34 = vmul.f32 0.6931472, %v1888_v32 }
 0x302   : > { %v282_v33 = vadd.f32 %v280_v31, %v256_v10 }
 0x303   : > { %v281_v36 = vadd.f32 %v278_v34, %v255_v11 }
 0x304   : > { %v284_v35 = vsub.f32 %v247_v2, %v282_v33  ;;  %v2557_v14 = vsub.f32 %v2538_v6, %v282_v33 }
 0x305   : > { %v283_v38 = vsub.f32 %v246_v3, %v281_v36  ;;  %v2560_v15 = vsub.f32 %v2540_v7, %v281_v36 }
 0x306   : > { %v288_v37 = vsel %vm175_vm0, %v284_v35, -inf }
 0x307   : > { %v287_v39 = vsel %vm175_vm0, %v283_v38, -inf }
 0x308   : > { %v289_v40 = vmax.f32 %v287_v39, %v288_v37 }
 0x30a   : > { %v290_v41 = vrot.slane %v289_v40, 4 }
 0x30c   : > { %v291_v42 = vmax.f32 %v289_v40, %v290_v41 }
 0x30e   : > { %v292_v43 = vrot.slane %v291_v42, 2 }
 0x310   : > { %v293_v44 = vmax.f32 %v291_v42, %v292_v43 }
 0x312   : > { %v294_v45 = vrot.slane %v293_v44, 1 }
 0x314   : > { %v295_v47 = vmax.f32 %v293_v44, %v294_v45 }
 0x316   : > { %v296_v48 = vmax.f32 %v295_v47, %v248_v46 }
 0x318   : > { %v297_v49 = vsub.f32 %v283_v38, %v296_v48  ;;  %v298_v50 = vsub.f32 %v284_v35, %v296_v48  ;;  %v312_v53 = vsub.f32 %v248_v46, %v296_v48 }
 0x31a   : > { %v299_v51 = vmul.f32 1.442695, %v297_v49  ;;  %v301_v52 = vmul.f32 1.442695, %v298_v50  ;;  %v313_v58 = vmul.f32 1.442695, %v312_v53 }
 0x31c   : > { %1889 = vpow2.f32 %v299_v51 }
 0x31d   : > { %1891 = vpow2.f32 %v301_v52 }
 0x31e   : > { %1893 = vpow2.f32 %v313_v58 }
 0x326   : > { %v1890_v54 = vpop.eup %1889 }
 0x327   : > { %v1892_v55 = vpop.eup %1891  ;;  %v303_v56 = vsel %vm175_vm0, %v1890_v54, 0.0 }
 0x328   : > { %v304_v57 = vsel %vm175_vm0, %v1892_v55, 0.0  ;;  %v1894_v2 = vpop.eup %1893 }
 0x329   : > { %v305_v59 = vadd.f32 %v304_v57, %v303_v56 }
 0x32b   : > { %v306_v60 = vrot.slane %v305_v59, 4 }
 0x32d   : > { %v307_v61 = vadd.f32 %v306_v60, %v305_v59 }
 0x32f   : > { %v308_v62 = vrot.slane %v307_v61, 2 }
 0x331   : > { %v309_v63 = vadd.f32 %v308_v62, %v307_v61 }
 0x333   : > { %v310_v0 = vrot.slane %v309_v63, 1 }
 0x335   : > { %v311_v1 = vadd.f32 %v310_v0, %v309_v63 }
 0x337   : > { %v315_v3 = vadd.f32 %v1894_v2, %v311_v1 }
 0x339   : > { %1895 = vlog2.f32 %v315_v3 }
 0x343   : > { %v1896_v4 = vpop.eup %1895 }
 0x344   : > { %v317_v5 = vmul.f32 0.6931472, %v1896_v4 }
 0x346   : > { %v318_v8 = vadd.f32 %v317_v5, %v296_v48 }
 0x348   : > { %v320_v9 = vsub.f32 %v284_v35, %v318_v8  ;;  %v2552_v10 = vsub.f32 %v248_v46, %v318_v8  ;;  %v319_v11 = vsub.f32 %v283_v38, %v318_v8 }
 0x34a   : > { %v325_v12 = vsel %vm175_vm0, %v320_v9, -inf  ;;  %v322_v13 = vsel %vm175_vm0, %v319_v11, -inf }
 0x34b   : > { %326 = vmax.xlane.f32.xlu1 %v325_v12  ;;  %323 = vmax.xlane.f32.xlu0 %v322_v13 }
 0x3d8   : > { %v327_v16 = vpop.xlane.xlu1 %326  ;;  %v324_v17 = vpop.xlane.xlu0 %323 }
 0x3d9   : > { %v329_v18 = vmax.f32 %v327_v16, %v2557_v14  ;;  %v328_v19 = vmax.f32 %v324_v17, %v2560_v15 }
 0x3db   : > { %v331_v20 = vsub.f32 %v320_v9, %v329_v18  ;;  %v330_v21 = vsub.f32 %v319_v11, %v328_v19  ;;  %v343_v26 = vsub.f32 %v2557_v14, %v329_v18  ;;  %v342_v27 = vsub.f32 %v2560_v15, %v328_v19 }
 0x3dd   : > { %v334_v22 = vmul.f32 1.442695, %v331_v20  ;;  %v332_v23 = vmul.f32 1.442695, %v330_v21  ;;  %v346_v28 = vmul.f32 1.442695, %v343_v26 }
 0x3de   : > { %v344_v29 = vmul.f32 1.442695, %v342_v27 }
 0x3df   : > { %1897 = vpow2.f32 %v334_v22 }
 0x3e0   : > { %1899 = vpow2.f32 %v332_v23 }
 0x3e1   : > { %1901 = vpow2.f32 %v346_v28 }
 0x3e2   : > { %1903 = vpow2.f32 %v344_v29 }
 0x3e9   : > { %v1898_v24 = vpop.eup %1897 }
 0x3ea   : > { %v339_v25 = vsel %vm175_vm0, %v1898_v24, 0.0  ;;  %v1900_v6 = vpop.eup %1899 }
 0x3eb   : > { %340 = vadd.xlane.f32.xlu1 %v339_v25  ;;  %v336_v7 = vsel %vm175_vm0, %v1900_v6, 0.0  ;;  %v1902_v30 = vpop.eup %1901 }
 0x3ec   : > { %337 = vadd.xlane.f32.xlu0 %v336_v7  ;;  %v1904_v33 = vpop.eup %1903 }
 0x478   : > { %v341_v31 = vpop.xlane.xlu1 %340 }
 0x479   : > { %v349_v32 = vadd.f32 %v1902_v30, %v341_v31  ;;  %v338_v34 = vpop.xlane.xlu0 %337 }
 0x47a   : > { %v348_v35 = vadd.f32 %v1904_v33, %v338_v34 }
 0x47b   : > { %1905 = vlog2.f32 %v349_v32 }
 0x47c   : > { %1907 = vlog2.f32 %v348_v35 }
 0x485   : > { %v1906_v36 = vpop.eup %1905 }
 0x486   : > { %v353_v37 = vmul.f32 0.6931472, %v1906_v36  ;;  %v1908_v38 = vpop.eup %1907 }
 0x487   : > { %v351_v40 = vmul.f32 0.6931472, %v1908_v38 }
 0x488   : > { %v355_v39 = vadd.f32 %v353_v37, %v329_v18 }
 0x489   : > { %v354_v42 = vadd.f32 %v351_v40, %v328_v19 }
 0x48a   : > { %v357_v41 = vsub.f32 %v320_v9, %v355_v39  ;;  %v2580_v22 = vsub.f32 %v2557_v14, %v355_v39 }
 0x48b   : > { %v356_v44 = vsub.f32 %v319_v11, %v354_v42  ;;  %v2583_v23 = vsub.f32 %v2560_v15, %v354_v42 }
 0x48c   : > { %v361_v43 = vsel %vm175_vm0, %v357_v41, -inf }
 0x48d   : > { %v360_v45 = vsel %vm175_vm0, %v356_v44, -inf }
 0x48e   : > { %v362_v46 = vmax.f32 %v360_v45, %v361_v43 }
 0x490   : > { %v363_v47 = vrot.slane %v362_v46, 4 }
 0x492   : > { %v364_v48 = vmax.f32 %v362_v46, %v363_v47 }
 0x494   : > { %v365_v49 = vrot.slane %v364_v48, 2 }
 0x496   : > { %v366_v50 = vmax.f32 %v364_v48, %v365_v49 }
 0x498   : > { %v367_v51 = vrot.slane %v366_v50, 1 }
 0x49a   : > { %v368_v52 = vmax.f32 %v366_v50, %v367_v51 }
 0x49c   : > { %v369_v53 = vmax.f32 %v368_v52, %v2552_v10 }
 0x49e   : > { %v370_v54 = vsub.f32 %v356_v44, %v369_v53  ;;  %v371_v55 = vsub.f32 %v357_v41, %v369_v53  ;;  %v385_v58 = vsub.f32 %v2552_v10, %v369_v53 }
 0x4a0   : > { %v372_v56 = vmul.f32 1.442695, %v370_v54  ;;  %v374_v57 = vmul.f32 1.442695, %v371_v55  ;;  %v386_v63 = vmul.f32 1.442695, %v385_v58 }
 0x4a2   : > { %1909 = vpow2.f32 %v372_v56 }
 0x4a3   : > { %1911 = vpow2.f32 %v374_v57 }
 0x4a4   : > { %1913 = vpow2.f32 %v386_v63 }
 0x4ac   : > { %v1910_v59 = vpop.eup %1909 }
 0x4ad   : > { %v1912_v60 = vpop.eup %1911  ;;  %v376_v61 = vsel %vm175_vm0, %v1910_v59, 0.0 }
 0x4ae   : > { %v377_v62 = vsel %vm175_vm0, %v1912_v60, 0.0  ;;  %v1914_v9 = vpop.eup %1913 }
 0x4af   : > { %v378_v0 = vadd.f32 %v377_v62, %v376_v61 }
 0x4b1   : > { %v379_v1 = vrot.slane %v378_v0, 4 }
 0x4b3   : > { %v380_v2 = vadd.f32 %v379_v1, %v378_v0 }
 0x4b5   : > { %v381_v3 = vrot.slane %v380_v2, 2 }
 0x4b7   : > { %v382_v4 = vadd.f32 %v381_v3, %v380_v2 }
 0x4b9   : > { %v383_v5 = vrot.slane %v382_v4, 1 }
 0x4bb   : > { %v384_v8 = vadd.f32 %v383_v5, %v382_v4 }
 0x4bd   : > { %v388_v11 = vadd.f32 %v1914_v9, %v384_v8 }
 0x4bf   : > { %1915 = vlog2.f32 %v388_v11 }
 0x4c9   : > { %v1916_v12 = vpop.eup %1915 }
 0x4ca   : > { %v390_v13 = vmul.f32 0.6931472, %v1916_v12 }
 0x4cc   : > { %v391_v16 = vadd.f32 %v390_v13, %v369_v53 }
 0x4ce   : > { %v393_v17 = vsub.f32 %v357_v41, %v391_v16  ;;  %v2575_v18 = vsub.f32 %v2552_v10, %v391_v16  ;;  %v392_v19 = vsub.f32 %v356_v44, %v391_v16 }
 0x4d0   : > { %v398_v20 = vsel %vm175_vm0, %v393_v17, -inf  ;;  %v395_v21 = vsel %vm175_vm0, %v392_v19, -inf }
 0x4d1   : > { %399 = vmax.xlane.f32.xlu1 %v398_v20  ;;  %396 = vmax.xlane.f32.xlu0 %v395_v21 }
 0x55e   : > { %v400_v24 = vpop.xlane.xlu1 %399  ;;  %v397_v25 = vpop.xlane.xlu0 %396 }
 0x55f   : > { %v402_v6 = vmax.f32 %v400_v24, %v2580_v22  ;;  %v401_v10 = vmax.f32 %v397_v25, %v2583_v23 }
 0x561   : > { %v404_v7 = vsub.f32 %v393_v17, %v402_v6  ;;  %v403_v26 = vsub.f32 %v392_v19, %v401_v10  ;;  %v416_v31 = vsub.f32 %v2580_v22, %v402_v6  ;;  %v415_v32 = vsub.f32 %v2583_v23, %v401_v10 }
 0x563   : > { %v407_v27 = vmul.f32 1.442695, %v404_v7  ;;  %v405_v28 = vmul.f32 1.442695, %v403_v26  ;;  %v419_v33 = vmul.f32 1.442695, %v416_v31 }
 0x564   : > { %v417_v34 = vmul.f32 1.442695, %v415_v32 }
 0x565   : > { %1917 = vpow2.f32 %v407_v27 }
 0x566   : > { %1919 = vpow2.f32 %v405_v28 }
 0x567   : > { %1921 = vpow2.f32 %v419_v33 }
 0x568   : > { %1923 = vpow2.f32 %v417_v34 }
 0x56f   : > { %v1918_v29 = vpop.eup %1917 }
 0x570   : > { %v412_v30 = vsel %vm175_vm0, %v1918_v29, 0.0  ;;  %v1920_v14 = vpop.eup %1919 }
 0x571   : > { %413 = vadd.xlane.f32.xlu1 %v412_v30  ;;  %v409_v15 = vsel %vm175_vm0, %v1920_v14, 0.0  ;;  %v1922_v35 = vpop.eup %1921 }
 0x572   : > { %410 = vadd.xlane.f32.xlu0 %v409_v15  ;;  %v1924_v38 = vpop.eup %1923 }
 0x5fe   : > { %v414_v36 = vpop.xlane.xlu1 %413 }
 0x5ff   : > { %v422_v37 = vadd.f32 %v1922_v35, %v414_v36  ;;  %v411_v39 = vpop.xlane.xlu0 %410 }
 0x600   : > { %v421_v40 = vadd.f32 %v1924_v38, %v411_v39 }
 0x601   : > { %1925 = vlog2.f32 %v422_v37 }
 0x602   : > { %1927 = vlog2.f32 %v421_v40 }
 0x60b   : > { %v1926_v41 = vpop.eup %1925 }
 0x60c   : > { %v426_v42 = vmul.f32 0.6931472, %v1926_v41  ;;  %v1928_v43 = vpop.eup %1927 }
 0x60d   : > { %v424_v45 = vmul.f32 0.6931472, %v1928_v43 }
 0x60e   : > { %v428_v44 = vadd.f32 %v426_v42, %v402_v6 }
 0x60f   : > { %v427_v47 = vadd.f32 %v424_v45, %v401_v10 }
 0x610   : > { %v430_v46 = vsub.f32 %v393_v17, %v428_v44  ;;  %v2603_v27 = vsub.f32 %v2580_v22, %v428_v44 }
 0x611   : > { %v429_v49 = vsub.f32 %v392_v19, %v427_v47  ;;  %v2606_v28 = vsub.f32 %v2583_v23, %v427_v47 }
 0x612   : > { %v434_v48 = vsel %vm175_vm0, %v430_v46, -inf }
 0x613   : > { %v433_v50 = vsel %vm175_vm0, %v429_v49, -inf }
 0x614   : > { %v435_v51 = vmax.f32 %v433_v50, %v434_v48 }
 0x616   : > { %v436_v52 = vrot.slane %v435_v51, 4 }
 0x618   : > { %v437_v53 = vmax.f32 %v435_v51, %v436_v52 }
 0x61a   : > { %v438_v54 = vrot.slane %v437_v53, 2 }
 0x61c   : > { %v439_v55 = vmax.f32 %v437_v53, %v438_v54 }
 0x61e   : > { %v440_v56 = vrot.slane %v439_v55, 1 }
 0x620   : > { %v441_v57 = vmax.f32 %v439_v55, %v440_v56 }
 0x622   : > { %v442_v58 = vmax.f32 %v441_v57, %v2575_v18 }
 0x624   : > { %v443_v59 = vsub.f32 %v429_v49, %v442_v58  ;;  %v444_v60 = vsub.f32 %v430_v46, %v442_v58  ;;  %v458_v63 = vsub.f32 %v2575_v18, %v442_v58 }
 0x626   : > { %v445_v61 = vmul.f32 1.442695, %v443_v59  ;;  %v447_v62 = vmul.f32 1.442695, %v444_v60  ;;  %v459_v4 = vmul.f32 1.442695, %v458_v63 }
 0x628   : > { %1929 = vpow2.f32 %v445_v61 }
 0x629   : > { %1931 = vpow2.f32 %v447_v62 }
 0x62a   : > { %1933 = vpow2.f32 %v459_v4 }
 0x632   : > { %v1930_v0 = vpop.eup %1929 }
 0x633   : > { %v1932_v1 = vpop.eup %1931  ;;  %v449_v2 = vsel %vm175_vm0, %v1930_v0, 0.0 }
 0x634   : > { %v450_v3 = vsel %vm175_vm0, %v1932_v1, 0.0  ;;  %v1934_v17 = vpop.eup %1933 }
 0x635   : > { %v451_v5 = vadd.f32 %v450_v3, %v449_v2 }
 0x637   : > { %v452_v8 = vrot.slane %v451_v5, 4 }
 0x639   : > { %v453_v9 = vadd.f32 %v452_v8, %v451_v5 }
 0x63b   : > { %v454_v11 = vrot.slane %v453_v9, 2 }
 0x63d   : > { %v455_v12 = vadd.f32 %v454_v11, %v453_v9 }
 0x63f   : > { %v456_v13 = vrot.slane %v455_v12, 1 }
 0x641   : > { %v457_v16 = vadd.f32 %v456_v13, %v455_v12 }
 0x643   : > { %v461_v19 = vadd.f32 %v1934_v17, %v457_v16 }
 0x645   : > { %1935 = vlog2.f32 %v461_v19 }
 0x64f   : > { %v1936_v20 = vpop.eup %1935 }
 0x650   : > { %v463_v21 = vmul.f32 0.6931472, %v1936_v20 }
 0x652   : > { %v464_v24 = vadd.f32 %v463_v21, %v442_v58 }
 0x654   : > { %v466_v25 = vsub.f32 %v430_v46, %v464_v24  ;;  %v2598_v6 = vsub.f32 %v2575_v18, %v464_v24  ;;  %v465_v10 = vsub.f32 %v429_v49, %v464_v24 }
 0x656   : > { %v471_v7 = vsel %vm175_vm0, %v466_v25, -inf  ;;  %v468_v26 = vsel %vm175_vm0, %v465_v10, -inf }
 0x657   : > { %472 = vmax.xlane.f32.xlu1 %v471_v7  ;;  %469 = vmax.xlane.f32.xlu0 %v468_v26 }
 0x6e4   : > { %v473_v29 = vpop.xlane.xlu1 %472  ;;  %v470_v30 = vpop.xlane.xlu0 %469 }
 0x6e5   : > { %v475_v14 = vmax.f32 %v473_v29, %v2603_v27  ;;  %v474_v18 = vmax.f32 %v470_v30, %v2606_v28 }
 0x6e7   : > { %v477_v15 = vsub.f32 %v466_v25, %v475_v14  ;;  %v476_v31 = vsub.f32 %v465_v10, %v474_v18  ;;  %v489_v36 = vsub.f32 %v2603_v27, %v475_v14  ;;  %v488_v37 = vsub.f32 %v2606_v28, %v474_v18 }
 0x6e9   : > { %v480_v32 = vmul.f32 1.442695, %v477_v15  ;;  %v478_v33 = vmul.f32 1.442695, %v476_v31  ;;  %v492_v38 = vmul.f32 1.442695, %v489_v36 }
 0x6ea   : > { %v490_v39 = vmul.f32 1.442695, %v488_v37 }
 0x6eb   : > { %1937 = vpow2.f32 %v480_v32 }
 0x6ec   : > { %1939 = vpow2.f32 %v478_v33 }
 0x6ed   : > { %1941 = vpow2.f32 %v492_v38 }
 0x6ee   : > { %1943 = vpow2.f32 %v490_v39 }
 0x6f5   : > { %v1938_v34 = vpop.eup %1937 }
 0x6f6   : > { %v485_v35 = vsel %vm175_vm0, %v1938_v34, 0.0  ;;  %v1940_v22 = vpop.eup %1939 }
 0x6f7   : > { %486 = vadd.xlane.f32.xlu1 %v485_v35  ;;  %v482_v23 = vsel %vm175_vm0, %v1940_v22, 0.0  ;;  %v1942_v40 = vpop.eup %1941 }
 0x6f8   : > { %483 = vadd.xlane.f32.xlu0 %v482_v23  ;;  %v1944_v43 = vpop.eup %1943 }
 0x784   : > { %v487_v41 = vpop.xlane.xlu1 %486 }
 0x785   : > { %v495_v42 = vadd.f32 %v1942_v40, %v487_v41  ;;  %v484_v44 = vpop.xlane.xlu0 %483 }
 0x786   : > { %v494_v45 = vadd.f32 %v1944_v43, %v484_v44 }
 0x787   : > { %1945 = vlog2.f32 %v495_v42 }
 0x788   : > { %1947 = vlog2.f32 %v494_v45 }
 0x791   : > { %v1946_v46 = vpop.eup %1945 }
 0x792   : > { %v499_v47 = vmul.f32 0.6931472, %v1946_v46  ;;  %v1948_v48 = vpop.eup %1947 }
 0x793   : > { %v497_v50 = vmul.f32 0.6931472, %v1948_v48 }
 0x794   : > { %v501_v49 = vadd.f32 %v499_v47, %v475_v14 }
 0x795   : > { %v500_v52 = vadd.f32 %v497_v50, %v474_v18 }
 0x796   : > { %v503_v51 = vsub.f32 %v466_v25, %v501_v49  ;;  %v2626_v32 = vsub.f32 %v2603_v27, %v501_v49 }
 0x797   : > { %v502_v54 = vsub.f32 %v465_v10, %v500_v52  ;;  %v2629_v33 = vsub.f32 %v2606_v28, %v500_v52 }
 0x798   : > { %v507_v53 = vsel %vm175_vm0, %v503_v51, -inf }
 0x799   : > { %v506_v55 = vsel %vm175_vm0, %v502_v54, -inf }
 0x79a   : > { %v508_v56 = vmax.f32 %v506_v55, %v507_v53 }
 0x79c   : > { %v509_v57 = vrot.slane %v508_v56, 4 }
 0x79e   : > { %v510_v58 = vmax.f32 %v508_v56, %v509_v57 }
 0x7a0   : > { %v511_v59 = vrot.slane %v510_v58, 2 }
 0x7a2   : > { %v512_v60 = vmax.f32 %v510_v58, %v511_v59 }
 0x7a4   : > { %v513_v61 = vrot.slane %v512_v60, 1 }
 0x7a6   : > { %v514_v62 = vmax.f32 %v512_v60, %v513_v61 }
 0x7a8   : > { %v515_v63 = vmax.f32 %v514_v62, %v2598_v6 }
 0x7aa   : > { %v516_v0 = vsub.f32 %v502_v54, %v515_v63  ;;  %v517_v1 = vsub.f32 %v503_v51, %v515_v63  ;;  %v531_v4 = vsub.f32 %v2598_v6, %v515_v63 }
 0x7ac   : > { %v518_v2 = vmul.f32 1.442695, %v516_v0  ;;  %v520_v3 = vmul.f32 1.442695, %v517_v1  ;;  %v532_v12 = vmul.f32 1.442695, %v531_v4 }
 0x7ae   : > { %1949 = vpow2.f32 %v518_v2 }
 0x7af   : > { %1951 = vpow2.f32 %v520_v3 }
 0x7b0   : > { %1953 = vpow2.f32 %v532_v12 }
 0x7b8   : > { %v1950_v5 = vpop.eup %1949 }
 0x7b9   : > { %v1952_v8 = vpop.eup %1951  ;;  %v522_v9 = vsel %vm175_vm0, %v1950_v5, 0.0 }
 0x7ba   : > { %v523_v11 = vsel %vm175_vm0, %v1952_v8, 0.0  ;;  %v1954_v25 = vpop.eup %1953 }
 0x7bb   : > { %v524_v13 = vadd.f32 %v523_v11, %v522_v9 }
 0x7bd   : > { %v525_v16 = vrot.slane %v524_v13, 4 }
 0x7bf   : > { %v526_v17 = vadd.f32 %v525_v16, %v524_v13 }
 0x7c1   : > { %v527_v19 = vrot.slane %v526_v17, 2 }
 0x7c3   : > { %v528_v20 = vadd.f32 %v527_v19, %v526_v17 }
 0x7c5   : > { %v529_v21 = vrot.slane %v528_v20, 1 }
 0x7c7   : > { %v530_v24 = vadd.f32 %v529_v21, %v528_v20 }
 0x7c9   : > { %v534_v10 = vadd.f32 %v1954_v25, %v530_v24 }
 0x7cb   : > { %1955 = vlog2.f32 %v534_v10 }
 0x7d5   : > { %v1956_v7 = vpop.eup %1955 }
 0x7d6   : > { %v536_v26 = vmul.f32 0.6931472, %v1956_v7 }
 0x7d8   : > { %v537_v29 = vadd.f32 %v536_v26, %v515_v63 }
 0x7da   : > { %v539_v30 = vsub.f32 %v503_v51, %v537_v29  ;;  %v2621_v14 = vsub.f32 %v2598_v6, %v537_v29  ;;  %v538_v18 = vsub.f32 %v502_v54, %v537_v29 }
 0x7dc   : > { %v544_v15 = vsel %vm175_vm0, %v539_v30, -inf  ;;  %v541_v31 = vsel %vm175_vm0, %v538_v18, -inf }
 0x7dd   : > { %545 = vmax.xlane.f32.xlu1 %v544_v15  ;;  %542 = vmax.xlane.f32.xlu0 %v541_v31 }
 0x86a   : > { %v546_v34 = vpop.xlane.xlu1 %545  ;;  %v543_v35 = vpop.xlane.xlu0 %542 }
 0x86b   : > { %v548_v22 = vmax.f32 %v546_v34, %v2626_v32  ;;  %v547_v6 = vmax.f32 %v543_v35, %v2629_v33 }
 0x86d   : > { %v550_v23 = vsub.f32 %v539_v30, %v548_v22  ;;  %v549_v36 = vsub.f32 %v538_v18, %v547_v6  ;;  %v562_v41 = vsub.f32 %v2626_v32, %v548_v22  ;;  %v561_v42 = vsub.f32 %v2629_v33, %v547_v6 }
 0x86f   : > { %v553_v37 = vmul.f32 1.442695, %v550_v23  ;;  %v551_v38 = vmul.f32 1.442695, %v549_v36  ;;  %v565_v43 = vmul.f32 1.442695, %v562_v41 }
 0x870   : > { %v563_v44 = vmul.f32 1.442695, %v561_v42 }
 0x871   : > { %1957 = vpow2.f32 %v553_v37 }
 0x872   : > { %1959 = vpow2.f32 %v551_v38 }
 0x873   : > { %1961 = vpow2.f32 %v565_v43 }
 0x874   : > { %1963 = vpow2.f32 %v563_v44 }
 0x87b   : > { %v1958_v39 = vpop.eup %1957 }
 0x87c   : > { %v558_v40 = vsel %vm175_vm0, %v1958_v39, 0.0  ;;  %v1960_v27 = vpop.eup %1959 }
 0x87d   : > { %559 = vadd.xlane.f32.xlu1 %v558_v40  ;;  %v555_v28 = vsel %vm175_vm0, %v1960_v27, 0.0  ;;  %v1962_v45 = vpop.eup %1961 }
 0x87e   : > { %556 = vadd.xlane.f32.xlu0 %v555_v28  ;;  %v1964_v48 = vpop.eup %1963 }
 0x90a   : > { %v560_v46 = vpop.xlane.xlu1 %559 }
 0x90b   : > { %v568_v47 = vadd.f32 %v1962_v45, %v560_v46  ;;  %v557_v49 = vpop.xlane.xlu0 %556 }
 0x90c   : > { %v567_v50 = vadd.f32 %v1964_v48, %v557_v49 }
 0x90d   : > { %1965 = vlog2.f32 %v568_v47 }
 0x90e   : > { %1967 = vlog2.f32 %v567_v50 }
 0x917   : > { %v1966_v51 = vpop.eup %1965 }
 0x918   : > { %v572_v52 = vmul.f32 0.6931472, %v1966_v51  ;;  %v1968_v53 = vpop.eup %1967 }
 0x919   : > { %v570_v55 = vmul.f32 0.6931472, %v1968_v53 }
 0x91a   : > { %v574_v54 = vadd.f32 %v572_v52, %v548_v22 }
 0x91b   : > { %v573_v57 = vadd.f32 %v570_v55, %v547_v6 }
 0x91c   : > { %v576_v56 = vsub.f32 %v539_v30, %v574_v54  ;;  %v2649_v37 = vsub.f32 %v2626_v32, %v574_v54 }
 0x91d   : > { %v575_v59 = vsub.f32 %v538_v18, %v573_v57  ;;  %v2652_v38 = vsub.f32 %v2629_v33, %v573_v57 }
 0x91e   : > { %v580_v58 = vsel %vm175_vm0, %v576_v56, -inf }
 0x91f   : > { %v579_v60 = vsel %vm175_vm0, %v575_v59, -inf }
 0x920   : > { %v581_v61 = vmax.f32 %v579_v60, %v580_v58 }
 0x922   : > { %v582_v62 = vrot.slane %v581_v61, 4 }
 0x924   : > { %v583_v63 = vmax.f32 %v581_v61, %v582_v62 }
 0x926   : > { %v584_v0 = vrot.slane %v583_v63, 2 }
 0x928   : > { %v585_v1 = vmax.f32 %v583_v63, %v584_v0 }
 0x92a   : > { %v586_v2 = vrot.slane %v585_v1, 1 }
 0x92c   : > { %v587_v3 = vmax.f32 %v585_v1, %v586_v2 }
 0x92e   : > { %v588_v4 = vmax.f32 %v587_v3, %v2621_v14 }
 0x930   : > { %v589_v5 = vsub.f32 %v575_v59, %v588_v4  ;;  %v590_v8 = vsub.f32 %v576_v56, %v588_v4  ;;  %v604_v12 = vsub.f32 %v2621_v14, %v588_v4 }
 0x932   : > { %v591_v9 = vmul.f32 1.442695, %v589_v5  ;;  %v593_v11 = vmul.f32 1.442695, %v590_v8  ;;  %v605_v20 = vmul.f32 1.442695, %v604_v12 }
 0x934   : > { %1969 = vpow2.f32 %v591_v9 }
 0x935   : > { %1971 = vpow2.f32 %v593_v11 }
 0x936   : > { %1973 = vpow2.f32 %v605_v20 }
 0x93e   : > { %v1970_v13 = vpop.eup %1969 }
 0x93f   : > { %v1972_v16 = vpop.eup %1971  ;;  %v595_v17 = vsel %vm175_vm0, %v1970_v13, 0.0 }
 0x940   : > { %v596_v19 = vsel %vm175_vm0, %v1972_v16, 0.0  ;;  %v1974_v30 = vpop.eup %1973 }
 0x941   : > { %v597_v21 = vadd.f32 %v596_v19, %v595_v17 }
 0x943   : > { %v598_v24 = vrot.slane %v597_v21, 4 }
 0x945   : > { %v599_v25 = vadd.f32 %v598_v24, %v597_v21 }
 0x947   : > { %v600_v10 = vrot.slane %v599_v25, 2 }
 0x949   : > { %v601_v7 = vadd.f32 %v600_v10, %v599_v25 }
 0x94b   : > { %v602_v26 = vrot.slane %v601_v7, 1 }
 0x94d   : > { %v603_v29 = vadd.f32 %v602_v26, %v601_v7 }
 0x94f   : > { %v607_v18 = vadd.f32 %v1974_v30, %v603_v29 }
 0x951   : > { %1975 = vlog2.f32 %v607_v18 }
 0x95b   : > { %v1976_v15 = vpop.eup %1975 }
 0x95c   : > { %v609_v31 = vmul.f32 0.6931472, %v1976_v15 }
 0x95e   : > { %v610_v34 = vadd.f32 %v609_v31, %v588_v4 }
 0x960   : > { %v612_v35 = vsub.f32 %v576_v56, %v610_v34  ;;  %v2644_v22 = vsub.f32 %v2621_v14, %v610_v34  ;;  %v611_v6 = vsub.f32 %v575_v59, %v610_v34 }
 0x962   : > { %v617_v23 = vsel %vm175_vm0, %v612_v35, -inf  ;;  %v614_v36 = vsel %vm175_vm0, %v611_v6, -inf }
 0x963   : > { %618 = vmax.xlane.f32.xlu1 %v617_v23  ;;  %615 = vmax.xlane.f32.xlu0 %v614_v36 }
 0x9f0   : > { %v619_v39 = vpop.xlane.xlu1 %618  ;;  %v616_v40 = vpop.xlane.xlu0 %615 }
 0x9f1   : > { %v621_v27 = vmax.f32 %v619_v39, %v2649_v37  ;;  %v620_v14 = vmax.f32 %v616_v40, %v2652_v38 }
 0x9f3   : > { %v623_v28 = vsub.f32 %v612_v35, %v621_v27  ;;  %v622_v41 = vsub.f32 %v611_v6, %v620_v14  ;;  %v635_v46 = vsub.f32 %v2649_v37, %v621_v27  ;;  %v634_v47 = vsub.f32 %v2652_v38, %v620_v14 }
 0x9f5   : > { %v626_v42 = vmul.f32 1.442695, %v623_v28  ;;  %v624_v43 = vmul.f32 1.442695, %v622_v41  ;;  %v638_v48 = vmul.f32 1.442695, %v635_v46 }
 0x9f6   : > { %v636_v49 = vmul.f32 1.442695, %v634_v47 }
 0x9f7   : > { %1977 = vpow2.f32 %v626_v42 }
 0x9f8   : > { %1979 = vpow2.f32 %v624_v43 }
 0x9f9   : > { %1981 = vpow2.f32 %v638_v48 }
 0x9fa   : > { %1983 = vpow2.f32 %v636_v49 }
 0xa01   : > { %v1978_v44 = vpop.eup %1977 }
 0xa02   : > { %v631_v45 = vsel %vm175_vm0, %v1978_v44, 0.0  ;;  %v1980_v32 = vpop.eup %1979 }
 0xa03   : > { %632 = vadd.xlane.f32.xlu1 %v631_v45  ;;  %v628_v33 = vsel %vm175_vm0, %v1980_v32, 0.0  ;;  %v1982_v50 = vpop.eup %1981 }
 0xa04   : > { %629 = vadd.xlane.f32.xlu0 %v628_v33  ;;  %v1984_v53 = vpop.eup %1983 }
 0xa90   : > { %v633_v51 = vpop.xlane.xlu1 %632 }
 0xa91   : > { %v641_v52 = vadd.f32 %v1982_v50, %v633_v51  ;;  %v630_v54 = vpop.xlane.xlu0 %629 }
 0xa92   : > { %v640_v55 = vadd.f32 %v1984_v53, %v630_v54 }
 0xa93   : > { %1985 = vlog2.f32 %v641_v52 }
 0xa94   : > { %1987 = vlog2.f32 %v640_v55 }
 0xa9d   : > { %v1986_v56 = vpop.eup %1985 }
 0xa9e   : > { %v645_v57 = vmul.f32 0.6931472, %v1986_v56  ;;  %v1988_v58 = vpop.eup %1987 }
 0xa9f   : > { %v643_v60 = vmul.f32 0.6931472, %v1988_v58 }
 0xaa0   : > { %v647_v59 = vadd.f32 %v645_v57, %v621_v27 }
 0xaa1   : > { %v646_v62 = vadd.f32 %v643_v60, %v620_v14 }
 0xaa2   : > { %v649_v61 = vsub.f32 %v612_v35, %v647_v59  ;;  %v2672_v42 = vsub.f32 %v2649_v37, %v647_v59 }
 0xaa3   : > { %v648_v0 = vsub.f32 %v611_v6, %v646_v62  ;;  %v2675_v43 = vsub.f32 %v2652_v38, %v646_v62 }
 0xaa4   : > { %v653_v63 = vsel %vm175_vm0, %v649_v61, -inf }
 0xaa5   : > { %v652_v1 = vsel %vm175_vm0, %v648_v0, -inf }
 0xaa6   : > { %v654_v2 = vmax.f32 %v652_v1, %v653_v63 }
 0xaa8   : > { %v655_v3 = vrot.slane %v654_v2, 4 }
 0xaaa   : > { %v656_v4 = vmax.f32 %v654_v2, %v655_v3 }
 0xaac   : > { %v657_v5 = vrot.slane %v656_v4, 2 }
 0xaae   : > { %v658_v8 = vmax.f32 %v656_v4, %v657_v5 }
 0xab0   : > { %v659_v9 = vrot.slane %v658_v8, 1 }
 0xab2   : > { %v660_v11 = vmax.f32 %v658_v8, %v659_v9 }
 0xab4   : > { %v661_v12 = vmax.f32 %v660_v11, %v2644_v22 }
 0xab6   : > { %v662_v13 = vsub.f32 %v648_v0, %v661_v12  ;;  %v663_v16 = vsub.f32 %v649_v61, %v661_v12  ;;  %v677_v20 = vsub.f32 %v2644_v22, %v661_v12 }
 0xab8   : > { %v664_v17 = vmul.f32 1.442695, %v662_v13  ;;  %v666_v19 = vmul.f32 1.442695, %v663_v16  ;;  %v678_v7 = vmul.f32 1.442695, %v677_v20 }
 0xaba   : > { %1989 = vpow2.f32 %v664_v17 }
 0xabb   : > { %1991 = vpow2.f32 %v666_v19 }
 0xabc   : > { %1993 = vpow2.f32 %v678_v7 }
 0xac4   : > { %v1990_v21 = vpop.eup %1989 }
 0xac5   : > { %v1992_v24 = vpop.eup %1991  ;;  %v668_v25 = vsel %vm175_vm0, %v1990_v21, 0.0 }
 0xac6   : > { %v669_v10 = vsel %vm175_vm0, %v1992_v24, 0.0  ;;  %v1994_v35 = vpop.eup %1993 }
 0xac7   : > { %v670_v26 = vadd.f32 %v669_v10, %v668_v25 }
 0xac9   : > { %v671_v29 = vrot.slane %v670_v26, 4 }
 0xacb   : > { %v672_v30 = vadd.f32 %v671_v29, %v670_v26 }
 0xacd   : > { %v673_v18 = vrot.slane %v672_v30, 2 }
 0xacf   : > { %v674_v15 = vadd.f32 %v673_v18, %v672_v30 }
 0xad1   : > { %v675_v31 = vrot.slane %v674_v15, 1 }
 0xad3   : > { %v676_v34 = vadd.f32 %v675_v31, %v674_v15 }
 0xad5   : > { %v680_v6 = vadd.f32 %v1994_v35, %v676_v34 }
 0xad7   : > { %1995 = vlog2.f32 %v680_v6 }
 0xae1   : > { %v1996_v23 = vpop.eup %1995 }
 0xae2   : > { %v682_v36 = vmul.f32 0.6931472, %v1996_v23 }
 0xae4   : > { %v683_v39 = vadd.f32 %v682_v36, %v661_v12 }
 0xae6   : > { %v685_v40 = vsub.f32 %v649_v61, %v683_v39  ;;  %v2667_v27 = vsub.f32 %v2644_v22, %v683_v39  ;;  %v684_v14 = vsub.f32 %v648_v0, %v683_v39 }
 0xae8   : > { %v690_v28 = vsel %vm175_vm0, %v685_v40, -inf  ;;  %v687_v41 = vsel %vm175_vm0, %v684_v14, -inf }
 0xae9   : > { %691 = vmax.xlane.f32.xlu1 %v690_v28  ;;  %688 = vmax.xlane.f32.xlu0 %v687_v41 }
 0xb76   : > { %v692_v44 = vpop.xlane.xlu1 %691  ;;  %v689_v45 = vpop.xlane.xlu0 %688 }
 0xb77   : > { %v694_v32 = vmax.f32 %v692_v44, %v2672_v42  ;;  %v693_v22 = vmax.f32 %v689_v45, %v2675_v43 }
 0xb79   : > { %v696_v33 = vsub.f32 %v685_v40, %v694_v32  ;;  %v695_v46 = vsub.f32 %v684_v14, %v693_v22  ;;  %v708_v51 = vsub.f32 %v2672_v42, %v694_v32  ;;  %v707_v52 = vsub.f32 %v2675_v43, %v693_v22 }
 0xb7b   : > { %v699_v47 = vmul.f32 1.442695, %v696_v33  ;;  %v697_v48 = vmul.f32 1.442695, %v695_v46  ;;  %v711_v53 = vmul.f32 1.442695, %v708_v51 }
 0xb7c   : > { %v709_v54 = vmul.f32 1.442695, %v707_v52 }
 0xb7d   : > { %1997 = vpow2.f32 %v699_v47 }
 0xb7e   : > { %1999 = vpow2.f32 %v697_v48 }
 0xb7f   : > { %2001 = vpow2.f32 %v711_v53 }
 0xb80   : > { %2003 = vpow2.f32 %v709_v54 }
 0xb87   : > { %v1998_v49 = vpop.eup %1997 }
 0xb88   : > { %v704_v50 = vsel %vm175_vm0, %v1998_v49, 0.0  ;;  %v2000_v37 = vpop.eup %1999 }
 0xb89   : > { %705 = vadd.xlane.f32.xlu1 %v704_v50  ;;  %v701_v38 = vsel %vm175_vm0, %v2000_v37, 0.0  ;;  %v2002_v55 = vpop.eup %2001 }
 0xb8a   : > { %702 = vadd.xlane.f32.xlu0 %v701_v38  ;;  %v2004_v58 = vpop.eup %2003 }
 0xc16   : > { %v706_v56 = vpop.xlane.xlu1 %705 }
 0xc17   : > { %v714_v57 = vadd.f32 %v2002_v55, %v706_v56  ;;  %v703_v59 = vpop.xlane.xlu0 %702 }
 0xc18   : > { %v713_v60 = vadd.f32 %v2004_v58, %v703_v59 }
 0xc19   : > { %2005 = vlog2.f32 %v714_v57 }
 0xc1a   : > { %2007 = vlog2.f32 %v713_v60 }
 0xc23   : > { %v2006_v61 = vpop.eup %2005 }
 0xc24   : > { %v718_v62 = vmul.f32 0.6931472, %v2006_v61  ;;  %v2008_v63 = vpop.eup %2007 }
 0xc25   : > { %v716_v1 = vmul.f32 0.6931472, %v2008_v63 }
 0xc26   : > { %v720_v0 = vadd.f32 %v718_v62, %v694_v32 }
 0xc27   : > { %v719_v3 = vadd.f32 %v716_v1, %v693_v22 }
 0xc28   : > { %v722_v2 = vsub.f32 %v685_v40, %v720_v0  ;;  %v2695_v47 = vsub.f32 %v2672_v42, %v720_v0 }
 0xc29   : > { %v721_v5 = vsub.f32 %v684_v14, %v719_v3  ;;  %v2698_v48 = vsub.f32 %v2675_v43, %v719_v3 }
 0xc2a   : > { %v726_v4 = vsel %vm175_vm0, %v722_v2, -inf }
 0xc2b   : > { %v725_v8 = vsel %vm175_vm0, %v721_v5, -inf }
 0xc2c   : > { %v727_v9 = vmax.f32 %v725_v8, %v726_v4 }
 0xc2e   : > { %v728_v11 = vrot.slane %v727_v9, 4 }
 0xc30   : > { %v729_v12 = vmax.f32 %v727_v9, %v728_v11 }
 0xc32   : > { %v730_v13 = vrot.slane %v729_v12, 2 }
 0xc34   : > { %v731_v16 = vmax.f32 %v729_v12, %v730_v13 }
 0xc36   : > { %v732_v17 = vrot.slane %v731_v16, 1 }
 0xc38   : > { %v733_v19 = vmax.f32 %v731_v16, %v732_v17 }
 0xc3a   : > { %v734_v20 = vmax.f32 %v733_v19, %v2667_v27 }
 0xc3c   : > { %v735_v21 = vsub.f32 %v721_v5, %v734_v20  ;;  %v736_v24 = vsub.f32 %v722_v2, %v734_v20  ;;  %v750_v7 = vsub.f32 %v2667_v27, %v734_v20 }
 0xc3e   : > { %v737_v25 = vmul.f32 1.442695, %v735_v21  ;;  %v739_v10 = vmul.f32 1.442695, %v736_v24  ;;  %v751_v15 = vmul.f32 1.442695, %v750_v7 }
 0xc40   : > { %2009 = vpow2.f32 %v737_v25 }
 0xc41   : > { %2011 = vpow2.f32 %v739_v10 }
 0xc42   : > { %2013 = vpow2.f32 %v751_v15 }
 0xc4a   : > { %v2010_v26 = vpop.eup %2009 }
 0xc4b   : > { %v2012_v29 = vpop.eup %2011  ;;  %v741_v30 = vsel %vm175_vm0, %v2010_v26, 0.0 }
 0xc4c   : > { %v742_v18 = vsel %vm175_vm0, %v2012_v29, 0.0  ;;  %v2014_v40 = vpop.eup %2013 }
 0xc4d   : > { %v743_v31 = vadd.f32 %v742_v18, %v741_v30 }
 0xc4f   : > { %v744_v34 = vrot.slane %v743_v31, 4 }
 0xc51   : > { %v745_v35 = vadd.f32 %v744_v34, %v743_v31 }
 0xc53   : > { %v746_v6 = vrot.slane %v745_v35, 2 }
 0xc55   : > { %v747_v23 = vadd.f32 %v746_v6, %v745_v35 }
 0xc57   : > { %v748_v36 = vrot.slane %v747_v23, 1 }
 0xc59   : > { %v749_v39 = vadd.f32 %v748_v36, %v747_v23 }
 0xc5b   : > { %v753_v14 = vadd.f32 %v2014_v40, %v749_v39 }
 0xc5d   : > { %2015 = vlog2.f32 %v753_v14 }
 0xc67   : > { %v2016_v28 = vpop.eup %2015 }
 0xc68   : > { %v755_v41 = vmul.f32 0.6931472, %v2016_v28 }
 0xc6a   : > { %v756_v44 = vadd.f32 %v755_v41, %v734_v20 }
 0xc6c   : > { %v758_v45 = vsub.f32 %v722_v2, %v756_v44  ;;  %v2690_v32 = vsub.f32 %v2667_v27, %v756_v44  ;;  %v757_v22 = vsub.f32 %v721_v5, %v756_v44 }
 0xc6e   : > { %v763_v33 = vsel %vm175_vm0, %v758_v45, -inf  ;;  %v760_v46 = vsel %vm175_vm0, %v757_v22, -inf }
 0xc6f   : > { %764 = vmax.xlane.f32.xlu1 %v763_v33  ;;  %761 = vmax.xlane.f32.xlu0 %v760_v46 }
 0xcfc   : > { %v765_v49 = vpop.xlane.xlu1 %764  ;;  %v762_v50 = vpop.xlane.xlu0 %761 }
 0xcfd   : > { %v767_v37 = vmax.f32 %v765_v49, %v2695_v47  ;;  %v766_v27 = vmax.f32 %v762_v50, %v2698_v48 }
 0xcff   : > { %v769_v38 = vsub.f32 %v758_v45, %v767_v37  ;;  %v768_v51 = vsub.f32 %v757_v22, %v766_v27  ;;  %v781_v56 = vsub.f32 %v2695_v47, %v767_v37  ;;  %v780_v57 = vsub.f32 %v2698_v48, %v766_v27 }
 0xd01   : > { %v772_v52 = vmul.f32 1.442695, %v769_v38  ;;  %v770_v53 = vmul.f32 1.442695, %v768_v51  ;;  %v784_v58 = vmul.f32 1.442695, %v781_v56 }
 0xd02   : > { %v782_v59 = vmul.f32 1.442695, %v780_v57 }
 0xd03   : > { %2017 = vpow2.f32 %v772_v52 }
 0xd04   : > { %2019 = vpow2.f32 %v770_v53 }
 0xd05   : > { %2021 = vpow2.f32 %v784_v58 }
 0xd06   : > { %2023 = vpow2.f32 %v782_v59 }
 0xd0d   : > { %v2018_v54 = vpop.eup %2017 }
 0xd0e   : > { %v777_v55 = vsel %vm175_vm0, %v2018_v54, 0.0  ;;  %v2020_v42 = vpop.eup %2019 }
 0xd0f   : > { %778 = vadd.xlane.f32.xlu1 %v777_v55  ;;  %v774_v43 = vsel %vm175_vm0, %v2020_v42, 0.0  ;;  %v2022_v60 = vpop.eup %2021 }
 0xd10   : > { %775 = vadd.xlane.f32.xlu0 %v774_v43  ;;  %v2024_v63 = vpop.eup %2023 }
 0xd9c   : > { %v779_v61 = vpop.xlane.xlu1 %778 }
 0xd9d   : > { %v787_v62 = vadd.f32 %v2022_v60, %v779_v61  ;;  %v776_v0 = vpop.xlane.xlu0 %775 }
 0xd9e   : > { %v786_v1 = vadd.f32 %v2024_v63, %v776_v0 }
 0xd9f   : > { %2025 = vlog2.f32 %v787_v62 }
 0xda0   : > { %2027 = vlog2.f32 %v786_v1 }
 0xda9   : > { %v2026_v2 = vpop.eup %2025 }
 0xdaa   : > { %v791_v3 = vmul.f32 0.6931472, %v2026_v2  ;;  %v2028_v4 = vpop.eup %2027 }
 0xdab   : > { %v789_v8 = vmul.f32 0.6931472, %v2028_v4 }
 0xdac   : > { %v793_v5 = vadd.f32 %v791_v3, %v767_v37 }
 0xdad   : > { %v792_v11 = vadd.f32 %v789_v8, %v766_v27 }
 0xdae   : > { %v795_v9 = vsub.f32 %v758_v45, %v793_v5  ;;  %v2718_v52 = vsub.f32 %v2695_v47, %v793_v5 }
 0xdaf   : > { %v794_v13 = vsub.f32 %v757_v22, %v792_v11  ;;  %v2721_v53 = vsub.f32 %v2698_v48, %v792_v11 }
 0xdb0   : > { %v799_v12 = vsel %vm175_vm0, %v795_v9, -inf }
 0xdb1   : > { %v798_v16 = vsel %vm175_vm0, %v794_v13, -inf }
 0xdb2   : > { %v800_v17 = vmax.f32 %v798_v16, %v799_v12 }
 0xdb4   : > { %v801_v19 = vrot.slane %v800_v17, 4 }
 0xdb6   : > { %v802_v20 = vmax.f32 %v800_v17, %v801_v19 }
 0xdb8   : > { %v803_v21 = vrot.slane %v802_v20, 2 }
 0xdba   : > { %v804_v24 = vmax.f32 %v802_v20, %v803_v21 }
 0xdbc   : > { %v805_v25 = vrot.slane %v804_v24, 1 }
 0xdbe   : > { %v806_v10 = vmax.f32 %v804_v24, %v805_v25 }
 0xdc0   : > { %v807_v7 = vmax.f32 %v806_v10, %v2690_v32 }
 0xdc2   : > { %v808_v26 = vsub.f32 %v794_v13, %v807_v7  ;;  %v809_v29 = vsub.f32 %v795_v9, %v807_v7  ;;  %v823_v15 = vsub.f32 %v2690_v32, %v807_v7 }
 0xdc4   : > { %v810_v30 = vmul.f32 1.442695, %v808_v26  ;;  %v812_v18 = vmul.f32 1.442695, %v809_v29  ;;  %v824_v23 = vmul.f32 1.442695, %v823_v15 }
 0xdc6   : > { %2029 = vpow2.f32 %v810_v30 }
 0xdc7   : > { %2031 = vpow2.f32 %v812_v18 }
 0xdc8   : > { %2033 = vpow2.f32 %v824_v23 }
 0xdd0   : > { %v2030_v31 = vpop.eup %2029 }
 0xdd1   : > { %v2032_v34 = vpop.eup %2031  ;;  %v814_v35 = vsel %vm175_vm0, %v2030_v31, 0.0 }
 0xdd2   : > { %v815_v6 = vsel %vm175_vm0, %v2032_v34, 0.0  ;;  %v2034_v45 = vpop.eup %2033 }
 0xdd3   : > { %v816_v36 = vadd.f32 %v815_v6, %v814_v35 }
 0xdd5   : > { %v817_v39 = vrot.slane %v816_v36, 4 }
 0xdd7   : > { %v818_v40 = vadd.f32 %v817_v39, %v816_v36 }
 0xdd9   : > { %v819_v14 = vrot.slane %v818_v40, 2 }
 0xddb   : > { %v820_v28 = vadd.f32 %v819_v14, %v818_v40 }
 0xddd   : > { %v821_v41 = vrot.slane %v820_v28, 1 }
 0xddf   : > { %v822_v44 = vadd.f32 %v821_v41, %v820_v28 }
 0xde1   : > { %v826_v22 = vadd.f32 %v2034_v45, %v822_v44 }
 0xde3   : > { %2035 = vlog2.f32 %v826_v22 }
 0xded   : > { %v2036_v33 = vpop.eup %2035 }
 0xdee   : > { %v828_v46 = vmul.f32 0.6931472, %v2036_v33 }
 0xdf0   : > { %v829_v49 = vadd.f32 %v828_v46, %v807_v7 }
 0xdf2   : > { %v831_v50 = vsub.f32 %v795_v9, %v829_v49  ;;  %v2713_v37 = vsub.f32 %v2690_v32, %v829_v49  ;;  %v830_v27 = vsub.f32 %v794_v13, %v829_v49 }
 0xdf4   : > { %v836_v38 = vsel %vm175_vm0, %v831_v50, -inf  ;;  %v833_v51 = vsel %vm175_vm0, %v830_v27, -inf }
 0xdf5   : > { %837 = vmax.xlane.f32.xlu1 %v836_v38  ;;  %834 = vmax.xlane.f32.xlu0 %v833_v51 }
 0xe82   : > { %v838_v54 = vpop.xlane.xlu1 %837  ;;  %v835_v55 = vpop.xlane.xlu0 %834 }
 0xe83   : > { %v840_v42 = vmax.f32 %v838_v54, %v2718_v52  ;;  %v839_v32 = vmax.f32 %v835_v55, %v2721_v53 }
 0xe85   : > { %v842_v43 = vsub.f32 %v831_v50, %v840_v42  ;;  %v841_v56 = vsub.f32 %v830_v27, %v839_v32  ;;  %v854_v61 = vsub.f32 %v2718_v52, %v840_v42  ;;  %v853_v62 = vsub.f32 %v2721_v53, %v839_v32 }
 0xe87   : > { %v845_v57 = vmul.f32 1.442695, %v842_v43  ;;  %v843_v58 = vmul.f32 1.442695, %v841_v56  ;;  %v857_v63 = vmul.f32 1.442695, %v854_v61 }
 0xe88   : > { %v855_v0 = vmul.f32 1.442695, %v853_v62 }
 0xe89   : > { %2037 = vpow2.f32 %v845_v57 }
 0xe8a   : > { %2039 = vpow2.f32 %v843_v58 }
 0xe8b   : > { %2041 = vpow2.f32 %v857_v63 }
 0xe8c   : > { %2043 = vpow2.f32 %v855_v0 }
 0xe93   : > { %v2038_v59 = vpop.eup %2037 }
 0xe94   : > { %v850_v60 = vsel %vm175_vm0, %v2038_v59, 0.0  ;;  %v2040_v47 = vpop.eup %2039 }
 0xe95   : > { %851 = vadd.xlane.f32.xlu1 %v850_v60  ;;  %v847_v48 = vsel %vm175_vm0, %v2040_v47, 0.0  ;;  %v2042_v1 = vpop.eup %2041 }
 0xe96   : > { %848 = vadd.xlane.f32.xlu0 %v847_v48  ;;  %v2044_v4 = vpop.eup %2043 }
 0xf22   : > { %v852_v2 = vpop.xlane.xlu1 %851 }
 0xf23   : > { %v860_v3 = vadd.f32 %v2042_v1, %v852_v2  ;;  %v849_v5 = vpop.xlane.xlu0 %848 }
 0xf24   : > { %v859_v8 = vadd.f32 %v2044_v4, %v849_v5 }
 0xf25   : > { %2045 = vlog2.f32 %v860_v3 }
 0xf26   : > { %2047 = vlog2.f32 %v859_v8 }
 0xf2f   : > { %v2046_v9 = vpop.eup %2045 }
 0xf30   : > { %v864_v11 = vmul.f32 0.6931472, %v2046_v9  ;;  %v2048_v12 = vpop.eup %2047 }
 0xf31   : > { %v862_v16 = vmul.f32 0.6931472, %v2048_v12 }
 0xf32   : > { %v866_v13 = vadd.f32 %v864_v11, %v840_v42 }
 0xf33   : > { %v865_v19 = vadd.f32 %v862_v16, %v839_v32 }
 0xf34   : > { %v868_v17 = vsub.f32 %v831_v50, %v866_v13  ;;  %v2741_v57 = vsub.f32 %v2718_v52, %v866_v13 }
 0xf35   : > { %v867_v21 = vsub.f32 %v830_v27, %v865_v19  ;;  %v2744_v58 = vsub.f32 %v2721_v53, %v865_v19 }
 0xf36   : > { %v872_v20 = vsel %vm175_vm0, %v868_v17, -inf }
 0xf37   : > { %v871_v24 = vsel %vm175_vm0, %v867_v21, -inf }
 0xf38   : > { %v873_v25 = vmax.f32 %v871_v24, %v872_v20 }
 0xf3a   : > { %v874_v10 = vrot.slane %v873_v25, 4 }
 0xf3c   : > { %v875_v7 = vmax.f32 %v873_v25, %v874_v10 }
 0xf3e   : > { %v876_v26 = vrot.slane %v875_v7, 2 }
 0xf40   : > { %v877_v29 = vmax.f32 %v875_v7, %v876_v26 }
 0xf42   : > { %v878_v30 = vrot.slane %v877_v29, 1 }
 0xf44   : > { %v879_v18 = vmax.f32 %v877_v29, %v878_v30 }
 0xf46   : > { %v880_v15 = vmax.f32 %v879_v18, %v2713_v37 }
 0xf48   : > { %v881_v31 = vsub.f32 %v867_v21, %v880_v15  ;;  %v882_v34 = vsub.f32 %v868_v17, %v880_v15  ;;  %v896_v23 = vsub.f32 %v2713_v37, %v880_v15 }
 0xf4a   : > { %v883_v35 = vmul.f32 1.442695, %v881_v31  ;;  %v885_v6 = vmul.f32 1.442695, %v882_v34  ;;  %v897_v28 = vmul.f32 1.442695, %v896_v23 }
 0xf4c   : > { %2049 = vpow2.f32 %v883_v35 }
 0xf4d   : > { %2051 = vpow2.f32 %v885_v6 }
 0xf4e   : > { %2053 = vpow2.f32 %v897_v28 }
 0xf56   : > { %v2050_v36 = vpop.eup %2049 }
 0xf57   : > { %v2052_v39 = vpop.eup %2051  ;;  %v887_v40 = vsel %vm175_vm0, %v2050_v36, 0.0 }
 0xf58   : > { %v888_v14 = vsel %vm175_vm0, %v2052_v39, 0.0  ;;  %v2054_v50 = vpop.eup %2053 }
 0xf59   : > { %v889_v41 = vadd.f32 %v888_v14, %v887_v40 }
 0xf5b   : > { %v890_v44 = vrot.slane %v889_v41, 4 }
 0xf5d   : > { %v891_v45 = vadd.f32 %v890_v44, %v889_v41 }
 0xf5f   : > { %v892_v22 = vrot.slane %v891_v45, 2 }
 0xf61   : > { %v893_v33 = vadd.f32 %v892_v22, %v891_v45 }
 0xf63   : > { %v894_v46 = vrot.slane %v893_v33, 1 }
 0xf65   : > { %v895_v49 = vadd.f32 %v894_v46, %v893_v33 }
 0xf67   : > { %v899_v27 = vadd.f32 %v2054_v50, %v895_v49 }
 0xf69   : > { %2055 = vlog2.f32 %v899_v27 }
 0xf73   : > { %v2056_v38 = vpop.eup %2055 }
 0xf74   : > { %v901_v51 = vmul.f32 0.6931472, %v2056_v38 }
 0xf76   : > { %v902_v54 = vadd.f32 %v901_v51, %v880_v15 }
 0xf78   : > { %v904_v55 = vsub.f32 %v868_v17, %v902_v54  ;;  %v2736_v42 = vsub.f32 %v2713_v37, %v902_v54  ;;  %v903_v32 = vsub.f32 %v867_v21, %v902_v54 }
 0xf7a   : > { %v909_v43 = vsel %vm175_vm0, %v904_v55, -inf  ;;  %v906_v56 = vsel %vm175_vm0, %v903_v32, -inf }
 0xf7b   : > { %910 = vmax.xlane.f32.xlu1 %v909_v43  ;;  %907 = vmax.xlane.f32.xlu0 %v906_v56 }
0x1008   : > { %v911_v59 = vpop.xlane.xlu1 %910  ;;  %v908_v60 = vpop.xlane.xlu0 %907 }
0x1009   : > { %v913_v47 = vmax.f32 %v911_v59, %v2741_v57  ;;  %v912_v37 = vmax.f32 %v908_v60, %v2744_v58 }
0x100b   : > { %v915_v48 = vsub.f32 %v904_v55, %v913_v47  ;;  %v914_v61 = vsub.f32 %v903_v32, %v912_v37  ;;  %v927_v2 = vsub.f32 %v2741_v57, %v913_v47  ;;  %v926_v3 = vsub.f32 %v2744_v58, %v912_v37 }
0x100d   : > { %v918_v62 = vmul.f32 1.442695, %v915_v48  ;;  %v916_v63 = vmul.f32 1.442695, %v914_v61  ;;  %v930_v4 = vmul.f32 1.442695, %v927_v2 }
0x100e   : > { %v928_v5 = vmul.f32 1.442695, %v926_v3 }
0x100f   : > { %2057 = vpow2.f32 %v918_v62 }
0x1010   : > { %2059 = vpow2.f32 %v916_v63 }
0x1011   : > { %2061 = vpow2.f32 %v930_v4 }
0x1012   : > { %2063 = vpow2.f32 %v928_v5 }
0x1019   : > { %v2058_v0 = vpop.eup %2057 }
0x101a   : > { %v923_v1 = vsel %vm175_vm0, %v2058_v0, 0.0  ;;  %v2060_v52 = vpop.eup %2059 }
0x101b   : > { %924 = vadd.xlane.f32.xlu1 %v923_v1  ;;  %v920_v53 = vsel %vm175_vm0, %v2060_v52, 0.0  ;;  %v2062_v8 = vpop.eup %2061 }
0x101c   : > { %921 = vadd.xlane.f32.xlu0 %v920_v53  ;;  %v2064_v12 = vpop.eup %2063 }
0x10a8   : > { %v925_v9 = vpop.xlane.xlu1 %924 }
0x10a9   : > { %v933_v11 = vadd.f32 %v2062_v8, %v925_v9  ;;  %v922_v13 = vpop.xlane.xlu0 %921 }
0x10aa   : > { %v932_v16 = vadd.f32 %v2064_v12, %v922_v13 }
0x10ab   : > { %2065 = vlog2.f32 %v933_v11 }
0x10ac   : > { %2067 = vlog2.f32 %v932_v16 }
0x10b5   : > { %v2066_v17 = vpop.eup %2065 }
0x10b6   : > { %v937_v19 = vmul.f32 0.6931472, %v2066_v17  ;;  %v2068_v20 = vpop.eup %2067 }
0x10b7   : > { %v935_v24 = vmul.f32 0.6931472, %v2068_v20 }
0x10b8   : > { %v939_v21 = vadd.f32 %v937_v19, %v913_v47 }
0x10b9   : > { %v938_v10 = vadd.f32 %v935_v24, %v912_v37 }
0x10ba   : > { %v941_v25 = vsub.f32 %v904_v55, %v939_v21  ;;  %v2764_v62 = vsub.f32 %v2741_v57, %v939_v21 }
0x10bb   : > { %v940_v26 = vsub.f32 %v903_v32, %v938_v10  ;;  %v2767_v63 = vsub.f32 %v2744_v58, %v938_v10 }
0x10bc   : > { %v945_v7 = vsel %vm175_vm0, %v941_v25, -inf }
0x10bd   : > { %v944_v29 = vsel %vm175_vm0, %v940_v26, -inf }
0x10be   : > { %v946_v30 = vmax.f32 %v944_v29, %v945_v7 }
0x10c0   : > { %v947_v18 = vrot.slane %v946_v30, 4 }
0x10c2   : > { %v948_v15 = vmax.f32 %v946_v30, %v947_v18 }
0x10c4   : > { %v949_v31 = vrot.slane %v948_v15, 2 }
0x10c6   : > { %v950_v34 = vmax.f32 %v948_v15, %v949_v31 }
0x10c8   : > { %v951_v35 = vrot.slane %v950_v34, 1 }
0x10ca   : > { %v952_v6 = vmax.f32 %v950_v34, %v951_v35 }
0x10cc   : > { %v953_v23 = vmax.f32 %v952_v6, %v2736_v42 }
0x10ce   : > { %v954_v36 = vsub.f32 %v940_v26, %v953_v23  ;;  %v955_v39 = vsub.f32 %v941_v25, %v953_v23  ;;  %v969_v28 = vsub.f32 %v2736_v42, %v953_v23 }
0x10d0   : > { %v956_v40 = vmul.f32 1.442695, %v954_v36  ;;  %v958_v14 = vmul.f32 1.442695, %v955_v39  ;;  %v970_v33 = vmul.f32 1.442695, %v969_v28 }
0x10d2   : > { %2069 = vpow2.f32 %v956_v40 }
0x10d3   : > { %2071 = vpow2.f32 %v958_v14 }
0x10d4   : > { %2073 = vpow2.f32 %v970_v33 }
0x10dc   : > { %v2070_v41 = vpop.eup %2069 }
0x10dd   : > { %v2072_v44 = vpop.eup %2071  ;;  %v960_v45 = vsel %vm175_vm0, %v2070_v41, 0.0 }
0x10de   : > { %v961_v22 = vsel %vm175_vm0, %v2072_v44, 0.0  ;;  %v2074_v55 = vpop.eup %2073 }
0x10df   : > { %v962_v46 = vadd.f32 %v961_v22, %v960_v45 }
0x10e1   : > { %v963_v49 = vrot.slane %v962_v46, 4 }
0x10e3   : > { %v964_v50 = vadd.f32 %v963_v49, %v962_v46 }
0x10e5   : > { %v965_v27 = vrot.slane %v964_v50, 2 }
0x10e7   : > { %v966_v38 = vadd.f32 %v965_v27, %v964_v50 }
0x10e9   : > { %v967_v51 = vrot.slane %v966_v38, 1 }
0x10eb   : > { %v968_v54 = vadd.f32 %v967_v51, %v966_v38 }
0x10ed   : > { %v972_v32 = vadd.f32 %v2074_v55, %v968_v54 }
0x10ef   : > { %2075 = vlog2.f32 %v972_v32 }
0x10f9   : > { %v2076_v43 = vpop.eup %2075 }
0x10fa   : > { %v974_v56 = vmul.f32 0.6931472, %v2076_v43 }
0x10fc   : > { %v975_v59 = vadd.f32 %v974_v56, %v953_v23 }
0x10fe   : > { %v977_v60 = vsub.f32 %v941_v25, %v975_v59  ;;  %v2759_v47 = vsub.f32 %v2736_v42, %v975_v59  ;;  %v976_v37 = vsub.f32 %v940_v26, %v975_v59 }
0x1100   : > { %v982_v48 = vsel %vm175_vm0, %v977_v60, -inf  ;;  %v979_v61 = vsel %vm175_vm0, %v976_v37, -inf }
0x1101   : > { %983 = vmax.xlane.f32.xlu1 %v982_v48  ;;  %980 = vmax.xlane.f32.xlu0 %v979_v61 }
0x118e   : > { %v984_v0 = vpop.xlane.xlu1 %983  ;;  %v981_v1 = vpop.xlane.xlu0 %980 }
0x118f   : > { %v986_v52 = vmax.f32 %v984_v0, %v2764_v62  ;;  %v985_v42 = vmax.f32 %v981_v1, %v2767_v63 }
0x1191   : > { %v988_v53 = vsub.f32 %v977_v60, %v986_v52  ;;  %v987_v2 = vsub.f32 %v976_v37, %v985_v42  ;;  %v1000_v9 = vsub.f32 %v2764_v62, %v986_v52  ;;  %v999_v11 = vsub.f32 %v2767_v63, %v985_v42 }
0x1193   : > { %v991_v3 = vmul.f32 1.442695, %v988_v53  ;;  %v989_v4 = vmul.f32 1.442695, %v987_v2  ;;  %v1003_v12 = vmul.f32 1.442695, %v1000_v9 }
0x1194   : > { %v1001_v13 = vmul.f32 1.442695, %v999_v11 }
0x1195   : > { %2077 = vpow2.f32 %v991_v3 }
0x1196   : > { %2079 = vpow2.f32 %v989_v4 }
0x1197   : > { %2081 = vpow2.f32 %v1003_v12 }
0x1198   : > { %2083 = vpow2.f32 %v1001_v13 }
0x119f   : > { %v2078_v5 = vpop.eup %2077 }
0x11a0   : > { %v996_v8 = vsel %vm175_vm0, %v2078_v5, 0.0  ;;  %v2080_v57 = vpop.eup %2079 }
0x11a1   : > { %997 = vadd.xlane.f32.xlu1 %v996_v8  ;;  %v993_v58 = vsel %vm175_vm0, %v2080_v57, 0.0  ;;  %v2082_v16 = vpop.eup %2081 }
0x11a2   : > { %994 = vadd.xlane.f32.xlu0 %v993_v58  ;;  %v2084_v20 = vpop.eup %2083 }
0x122e   : > { %v998_v17 = vpop.xlane.xlu1 %997 }
0x122f   : > { %v1006_v19 = vadd.f32 %v2082_v16, %v998_v17  ;;  %v995_v21 = vpop.xlane.xlu0 %994 }
0x1230   : > { %v1005_v24 = vadd.f32 %v2084_v20, %v995_v21 }
0x1231   : > { %2085 = vlog2.f32 %v1006_v19 }
0x1232   : > { %2087 = vlog2.f32 %v1005_v24 }
0x123b   : > { %v2086_v25 = vpop.eup %2085 }
0x123c   : > { %v1010_v10 = vmul.f32 0.6931472, %v2086_v25  ;;  %v2088_v7 = vpop.eup %2087 }
0x123d   : > { %v1008_v29 = vmul.f32 0.6931472, %v2088_v7 }
0x123e   : > { %v1012_v26 = vadd.f32 %v1010_v10, %v986_v52 }
0x123f   : > { %v1011_v18 = vadd.f32 %v1008_v29, %v985_v42 }
0x1240   : > { %v1014_v30 = vsub.f32 %v977_v60, %v1012_v26  ;;  %v2787_v3 = vsub.f32 %v2764_v62, %v1012_v26 }
0x1241   : > { %v1013_v31 = vsub.f32 %v976_v37, %v1011_v18  ;;  %v2790_v4 = vsub.f32 %v2767_v63, %v1011_v18 }
0x1242   : > { %v1018_v15 = vsel %vm175_vm0, %v1014_v30, -inf }
0x1243   : > { %v1017_v34 = vsel %vm175_vm0, %v1013_v31, -inf }
0x1244   : > { %v1019_v35 = vmax.f32 %v1017_v34, %v1018_v15 }
0x1246   : > { %v1020_v6 = vrot.slane %v1019_v35, 4 }
0x1248   : > { %v1021_v23 = vmax.f32 %v1019_v35, %v1020_v6 }
0x124a   : > { %v1022_v36 = vrot.slane %v1021_v23, 2 }
0x124c   : > { %v1023_v39 = vmax.f32 %v1021_v23, %v1022_v36 }
0x124e   : > { %v1024_v40 = vrot.slane %v1023_v39, 1 }
0x1250   : > { %v1025_v14 = vmax.f32 %v1023_v39, %v1024_v40 }
0x1252   : > { %v1026_v28 = vmax.f32 %v1025_v14, %v2759_v47 }
0x1254   : > { %v1027_v41 = vsub.f32 %v1013_v31, %v1026_v28  ;;  %v1028_v44 = vsub.f32 %v1014_v30, %v1026_v28  ;;  %v1042_v33 = vsub.f32 %v2759_v47, %v1026_v28 }
0x1256   : > { %v1029_v45 = vmul.f32 1.442695, %v1027_v41  ;;  %v1031_v22 = vmul.f32 1.442695, %v1028_v44  ;;  %v1043_v38 = vmul.f32 1.442695, %v1042_v33 }
0x1258   : > { %2089 = vpow2.f32 %v1029_v45 }
0x1259   : > { %2091 = vpow2.f32 %v1031_v22 }
0x125a   : > { %2093 = vpow2.f32 %v1043_v38 }
0x1262   : > { %v2090_v46 = vpop.eup %2089 }
0x1263   : > { %v2092_v49 = vpop.eup %2091  ;;  %v1033_v50 = vsel %vm175_vm0, %v2090_v46, 0.0 }
0x1264   : > { %v1034_v27 = vsel %vm175_vm0, %v2092_v49, 0.0  ;;  %v2094_v60 = vpop.eup %2093 }
0x1265   : > { %v1035_v51 = vadd.f32 %v1034_v27, %v1033_v50 }
0x1267   : > { %v1036_v54 = vrot.slane %v1035_v51, 4 }
0x1269   : > { %v1037_v55 = vadd.f32 %v1036_v54, %v1035_v51 }
0x126b   : > { %v1038_v32 = vrot.slane %v1037_v55, 2 }
0x126d   : > { %v1039_v43 = vadd.f32 %v1038_v32, %v1037_v55 }
0x126f   : > { %v1040_v56 = vrot.slane %v1039_v43, 1 }
0x1271   : > { %v1041_v59 = vadd.f32 %v1040_v56, %v1039_v43 }
0x1273   : > { %v1045_v37 = vadd.f32 %v2094_v60, %v1041_v59 }
0x1275   : > { %2095 = vlog2.f32 %v1045_v37 }
0x127f   : > { %v2096_v48 = vpop.eup %2095 }
0x1280   : > { %v1047_v61 = vmul.f32 0.6931472, %v2096_v48 }
0x1282   : > { %v1048_v0 = vadd.f32 %v1047_v61, %v1026_v28 }
0x1284   : > { %v1050_v1 = vsub.f32 %v1014_v30, %v1048_v0  ;;  %v2782_v52 = vsub.f32 %v2759_v47, %v1048_v0  ;;  %v1049_v42 = vsub.f32 %v1013_v31, %v1048_v0 }
0x1286   : > { %v1055_v53 = vsel %vm175_vm0, %v1050_v1, -inf  ;;  %v1052_v2 = vsel %vm175_vm0, %v1049_v42, -inf }
0x1287   : > { %1056 = vmax.xlane.f32.xlu1 %v1055_v53  ;;  %1053 = vmax.xlane.f32.xlu0 %v1052_v2 }
0x1314   : > { %v1057_v5 = vpop.xlane.xlu1 %1056  ;;  %v1054_v8 = vpop.xlane.xlu0 %1053 }
0x1315   : > { %v1059_v57 = vmax.f32 %v1057_v5, %v2787_v3  ;;  %v1058_v47 = vmax.f32 %v1054_v8, %v2790_v4 }
0x1317   : > { %v1061_v58 = vsub.f32 %v1050_v1, %v1059_v57  ;;  %v1060_v9 = vsub.f32 %v1049_v42, %v1058_v47  ;;  %v1073_v17 = vsub.f32 %v2787_v3, %v1059_v57  ;;  %v1072_v19 = vsub.f32 %v2790_v4, %v1058_v47 }
0x1319   : > { %v1064_v11 = vmul.f32 1.442695, %v1061_v58  ;;  %v1062_v12 = vmul.f32 1.442695, %v1060_v9  ;;  %v1076_v20 = vmul.f32 1.442695, %v1073_v17 }
0x131a   : > { %v1074_v21 = vmul.f32 1.442695, %v1072_v19 }
0x131b   : > { %2097 = vpow2.f32 %v1064_v11 }
0x131c   : > { %2099 = vpow2.f32 %v1062_v12 }
0x131d   : > { %2101 = vpow2.f32 %v1076_v20 }
0x131e   : > { %2103 = vpow2.f32 %v1074_v21 }
0x1325   : > { %v2098_v13 = vpop.eup %2097 }
0x1326   : > { %v1069_v16 = vsel %vm175_vm0, %v2098_v13, 0.0  ;;  %v2100_v62 = vpop.eup %2099 }
0x1327   : > { %1070 = vadd.xlane.f32.xlu1 %v1069_v16  ;;  %v1066_v63 = vsel %vm175_vm0, %v2100_v62, 0.0  ;;  %v2102_v24 = vpop.eup %2101 }
0x1328   : > { %1067 = vadd.xlane.f32.xlu0 %v1066_v63  ;;  %v2104_v7 = vpop.eup %2103 }
0x13b4   : > { %v1071_v25 = vpop.xlane.xlu1 %1070 }
0x13b5   : > { %v1079_v10 = vadd.f32 %v2102_v24, %v1071_v25  ;;  %v1068_v26 = vpop.xlane.xlu0 %1067 }
0x13b6   : > { %v1078_v29 = vadd.f32 %v2104_v7, %v1068_v26 }
0x13b7   : > { %2105 = vlog2.f32 %v1079_v10 }
0x13b8   : > { %2107 = vlog2.f32 %v1078_v29 }
0x13c1   : > { %v2106_v30 = vpop.eup %2105 }
0x13c2   : > { %v1083_v18 = vmul.f32 0.6931472, %v2106_v30  ;;  %v2108_v15 = vpop.eup %2107 }
0x13c3   : > { %v1081_v34 = vmul.f32 0.6931472, %v2108_v15 }
0x13c4   : > { %v1085_v31 = vadd.f32 %v1083_v18, %v1059_v57 }
0x13c5   : > { %v1084_v6 = vadd.f32 %v1081_v34, %v1058_v47 }
0x13c6   : > { %v1087_v35 = vsub.f32 %v1050_v1, %v1085_v31  ;;  %v2810_v11 = vsub.f32 %v2787_v3, %v1085_v31 }
0x13c7   : > { %v1086_v36 = vsub.f32 %v1049_v42, %v1084_v6  ;;  %v2813_v12 = vsub.f32 %v2790_v4, %v1084_v6 }
0x13c8   : > { %v1091_v23 = vsel %vm175_vm0, %v1087_v35, -inf }
0x13c9   : > { %v1090_v39 = vsel %vm175_vm0, %v1086_v36, -inf }
0x13ca   : > { %v1092_v40 = vmax.f32 %v1090_v39, %v1091_v23 }
0x13cc   : > { %v1093_v14 = vrot.slane %v1092_v40, 4 }
0x13ce   : > { %v1094_v28 = vmax.f32 %v1092_v40, %v1093_v14 }
0x13d0   : > { %v1095_v41 = vrot.slane %v1094_v28, 2 }
0x13d2   : > { %v1096_v44 = vmax.f32 %v1094_v28, %v1095_v41 }
0x13d4   : > { %v1097_v45 = vrot.slane %v1096_v44, 1 }
0x13d6   : > { %v1098_v22 = vmax.f32 %v1096_v44, %v1097_v45 }
0x13d8   : > { %v1099_v33 = vmax.f32 %v1098_v22, %v2782_v52 }
0x13da   : > { %v1100_v46 = vsub.f32 %v1086_v36, %v1099_v33  ;;  %v1101_v49 = vsub.f32 %v1087_v35, %v1099_v33  ;;  %v1115_v38 = vsub.f32 %v2782_v52, %v1099_v33 }
0x13dc   : > { %v1102_v50 = vmul.f32 1.442695, %v1100_v46  ;;  %v1104_v27 = vmul.f32 1.442695, %v1101_v49  ;;  %v1116_v43 = vmul.f32 1.442695, %v1115_v38 }
0x13de   : > { %2109 = vpow2.f32 %v1102_v50 }
0x13df   : > { %2111 = vpow2.f32 %v1104_v27 }
0x13e0   : > { %2113 = vpow2.f32 %v1116_v43 }
0x13e8   : > { %v2110_v51 = vpop.eup %2109 }
0x13e9   : > { %v2112_v54 = vpop.eup %2111  ;;  %v1106_v55 = vsel %vm175_vm0, %v2110_v51, 0.0 }
0x13ea   : > { %v1107_v32 = vsel %vm175_vm0, %v2112_v54, 0.0  ;;  %v2114_v1 = vpop.eup %2113 }
0x13eb   : > { %v1108_v56 = vadd.f32 %v1107_v32, %v1106_v55 }
0x13ed   : > { %v1109_v59 = vrot.slane %v1108_v56, 4 }
0x13ef   : > { %v1110_v60 = vadd.f32 %v1109_v59, %v1108_v56 }
0x13f1   : > { %v1111_v37 = vrot.slane %v1110_v60, 2 }
0x13f3   : > { %v1112_v48 = vadd.f32 %v1111_v37, %v1110_v60 }
0x13f5   : > { %v1113_v61 = vrot.slane %v1112_v48, 1 }
0x13f7   : > { %v1114_v0 = vadd.f32 %v1113_v61, %v1112_v48 }
0x13f9   : > { %v1118_v42 = vadd.f32 %v2114_v1, %v1114_v0 }
0x13fb   : > { %2115 = vlog2.f32 %v1118_v42 }
0x1405   : > { %v2116_v53 = vpop.eup %2115 }
0x1406   : > { %v1120_v2 = vmul.f32 0.6931472, %v2116_v53 }
0x1408   : > { %v1121_v5 = vadd.f32 %v1120_v2, %v1099_v33 }
0x140a   : > { %v1123_v8 = vsub.f32 %v1087_v35, %v1121_v5  ;;  %v2805_v57 = vsub.f32 %v2782_v52, %v1121_v5  ;;  %v1122_v47 = vsub.f32 %v1086_v36, %v1121_v5 }
0x140c   : > { %v1128_v58 = vsel %vm175_vm0, %v1123_v8, -inf  ;;  %v1125_v9 = vsel %vm175_vm0, %v1122_v47, -inf }
0x140d   : > { %1129 = vmax.xlane.f32.xlu1 %v1128_v58  ;;  %1126 = vmax.xlane.f32.xlu0 %v1125_v9 }
0x149a   : > { %v1130_v13 = vpop.xlane.xlu1 %1129  ;;  %v1127_v16 = vpop.xlane.xlu0 %1126 }
0x149b   : > { %v1132_v62 = vmax.f32 %v1130_v13, %v2810_v11  ;;  %v1131_v52 = vmax.f32 %v1127_v16, %v2813_v12 }
0x149d   : > { %v1134_v63 = vsub.f32 %v1123_v8, %v1132_v62  ;;  %v1133_v17 = vsub.f32 %v1122_v47, %v1131_v52  ;;  %v1146_v25 = vsub.f32 %v2810_v11, %v1132_v62  ;;  %v1145_v10 = vsub.f32 %v2813_v12, %v1131_v52 }
0x149f   : > { %v1137_v19 = vmul.f32 1.442695, %v1134_v63  ;;  %v1135_v20 = vmul.f32 1.442695, %v1133_v17  ;;  %v1149_v7 = vmul.f32 1.442695, %v1146_v25 }
0x14a0   : > { %v1147_v26 = vmul.f32 1.442695, %v1145_v10 }
0x14a1   : > { %2117 = vpow2.f32 %v1137_v19 }
0x14a2   : > { %2119 = vpow2.f32 %v1135_v20 }
0x14a3   : > { %2121 = vpow2.f32 %v1149_v7 }
0x14a4   : > { %2123 = vpow2.f32 %v1147_v26 }
0x14ab   : > { %v2118_v21 = vpop.eup %2117 }
0x14ac   : > { %v1142_v24 = vsel %vm175_vm0, %v2118_v21, 0.0  ;;  %v2120_v3 = vpop.eup %2119 }
0x14ad   : > { %1143 = vadd.xlane.f32.xlu1 %v1142_v24  ;;  %v1139_v4 = vsel %vm175_vm0, %v2120_v3, 0.0  ;;  %v2122_v29 = vpop.eup %2121 }
0x14ae   : > { %1140 = vadd.xlane.f32.xlu0 %v1139_v4  ;;  %v2124_v15 = vpop.eup %2123 }
0x153a   : > { %v1144_v30 = vpop.xlane.xlu1 %1143 }
0x153b   : > { %v1152_v18 = vadd.f32 %v2122_v29, %v1144_v30  ;;  %v1141_v31 = vpop.xlane.xlu0 %1140 }
0x153c   : > { %v1151_v34 = vadd.f32 %v2124_v15, %v1141_v31 }
0x153d   : > { %2125 = vlog2.f32 %v1152_v18 }
0x153e   : > { %2127 = vlog2.f32 %v1151_v34 }
0x1547   : > { %v2126_v35 = vpop.eup %2125 }
0x1548   : > { %v1156_v6 = vmul.f32 0.6931472, %v2126_v35  ;;  %v2128_v23 = vpop.eup %2127 }
0x1549   : > { %v1154_v39 = vmul.f32 0.6931472, %v2128_v23 }
0x154a   : > { %v1158_v36 = vadd.f32 %v1156_v6, %v1132_v62 }
0x154b   : > { %v1157_v14 = vadd.f32 %v1154_v39, %v1131_v52 }
0x154c   : > { %v1160_v40 = vsub.f32 %v1123_v8, %v1158_v36  ;;  %v2833_v19 = vsub.f32 %v2810_v11, %v1158_v36 }
0x154d   : > { %v1159_v41 = vsub.f32 %v1122_v47, %v1157_v14  ;;  %v2836_v20 = vsub.f32 %v2813_v12, %v1157_v14 }
0x154e   : > { %v1164_v28 = vsel %vm175_vm0, %v1160_v40, -inf }
0x154f   : > { %v1163_v44 = vsel %vm175_vm0, %v1159_v41, -inf }
0x1550   : > { %v1165_v45 = vmax.f32 %v1163_v44, %v1164_v28 }
0x1552   : > { %v1166_v22 = vrot.slane %v1165_v45, 4 }
0x1554   : > { %v1167_v33 = vmax.f32 %v1165_v45, %v1166_v22 }
0x1556   : > { %v1168_v46 = vrot.slane %v1167_v33, 2 }
0x1558   : > { %v1169_v49 = vmax.f32 %v1167_v33, %v1168_v46 }
0x155a   : > { %v1170_v50 = vrot.slane %v1169_v49, 1 }
0x155c   : > { %v1171_v27 = vmax.f32 %v1169_v49, %v1170_v50 }
0x155e   : > { %v1172_v38 = vmax.f32 %v1171_v27, %v2805_v57 }
0x1560   : > { %v1173_v51 = vsub.f32 %v1159_v41, %v1172_v38  ;;  %v1174_v54 = vsub.f32 %v1160_v40, %v1172_v38  ;;  %v1188_v43 = vsub.f32 %v2805_v57, %v1172_v38 }
0x1562   : > { %v1175_v55 = vmul.f32 1.442695, %v1173_v51  ;;  %v1177_v32 = vmul.f32 1.442695, %v1174_v54  ;;  %v1189_v48 = vmul.f32 1.442695, %v1188_v43 }
0x1564   : > { %2129 = vpow2.f32 %v1175_v55 }
0x1565   : > { %2131 = vpow2.f32 %v1177_v32 }
0x1566   : > { %2133 = vpow2.f32 %v1189_v48 }
0x156e   : > { %v2130_v56 = vpop.eup %2129 }
0x156f   : > { %v2132_v59 = vpop.eup %2131  ;;  %v1179_v60 = vsel %vm175_vm0, %v2130_v56, 0.0 }
0x1570   : > { %v1180_v37 = vsel %vm175_vm0, %v2132_v59, 0.0  ;;  %v2134_v8 = vpop.eup %2133 }
0x1571   : > { %v1181_v61 = vadd.f32 %v1180_v37, %v1179_v60 }
0x1573   : > { %v1182_v0 = vrot.slane %v1181_v61, 4 }
0x1575   : > { %v1183_v1 = vadd.f32 %v1182_v0, %v1181_v61 }
0x1577   : > { %v1184_v42 = vrot.slane %v1183_v1, 2 }
0x1579   : > { %v1185_v53 = vadd.f32 %v1184_v42, %v1183_v1 }
0x157b   : > { %v1186_v2 = vrot.slane %v1185_v53, 1 }
0x157d   : > { %v1187_v5 = vadd.f32 %v1186_v2, %v1185_v53 }
0x157f   : > { %v1191_v47 = vadd.f32 %v2134_v8, %v1187_v5 }
0x1581   : > { %2135 = vlog2.f32 %v1191_v47 }
0x158b   : > { %v2136_v58 = vpop.eup %2135 }
0x158c   : > { %v1193_v9 = vmul.f32 0.6931472, %v2136_v58 }
0x158e   : > { %v1194_v13 = vadd.f32 %v1193_v9, %v1172_v38 }
0x1590   : > { %v1196_v16 = vsub.f32 %v1160_v40, %v1194_v13  ;;  %v2828_v62 = vsub.f32 %v2805_v57, %v1194_v13  ;;  %v1195_v52 = vsub.f32 %v1159_v41, %v1194_v13 }
0x1592   : > { %v1201_v63 = vsel %vm175_vm0, %v1196_v16, -inf  ;;  %v1198_v17 = vsel %vm175_vm0, %v1195_v52, -inf }
0x1593   : > { %1202 = vmax.xlane.f32.xlu1 %v1201_v63  ;;  %1199 = vmax.xlane.f32.xlu0 %v1198_v17 }
0x1620   : > { %v1203_v21 = vpop.xlane.xlu1 %1202  ;;  %v1200_v24 = vpop.xlane.xlu0 %1199 }
0x1621   : > { %v1205_v3 = vmax.f32 %v1203_v21, %v2833_v19  ;;  %v1204_v57 = vmax.f32 %v1200_v24, %v2836_v20 }
0x1623   : > { %v1207_v4 = vsub.f32 %v1196_v16, %v1205_v3  ;;  %v1206_v25 = vsub.f32 %v1195_v52, %v1204_v57  ;;  %v1219_v30 = vsub.f32 %v2833_v19, %v1205_v3  ;;  %v1218_v18 = vsub.f32 %v2836_v20, %v1204_v57 }
0x1625   : > { %v1210_v10 = vmul.f32 1.442695, %v1207_v4  ;;  %v1208_v7 = vmul.f32 1.442695, %v1206_v25  ;;  %v1222_v15 = vmul.f32 1.442695, %v1219_v30 }
0x1626   : > { %v1220_v31 = vmul.f32 1.442695, %v1218_v18 }
0x1627   : > { %2137 = vpow2.f32 %v1210_v10 }
0x1628   : > { %2139 = vpow2.f32 %v1208_v7 }
0x1629   : > { %2141 = vpow2.f32 %v1222_v15 }
0x162a   : > { %2143 = vpow2.f32 %v1220_v31 }
0x1631   : > { %v2138_v26 = vpop.eup %2137 }
0x1632   : > { %v1215_v29 = vsel %vm175_vm0, %v2138_v26, 0.0  ;;  %v2140_v11 = vpop.eup %2139 }
0x1633   : > { %1216 = vadd.xlane.f32.xlu1 %v1215_v29  ;;  %v1212_v12 = vsel %vm175_vm0, %v2140_v11, 0.0  ;;  %v2142_v34 = vpop.eup %2141 }
0x1634   : > { %1213 = vadd.xlane.f32.xlu0 %v1212_v12  ;;  %v2144_v23 = vpop.eup %2143 }
0x16c0   : > { %v1217_v35 = vpop.xlane.xlu1 %1216 }
0x16c1   : > { %v1225_v6 = vadd.f32 %v2142_v34, %v1217_v35  ;;  %v1214_v36 = vpop.xlane.xlu0 %1213 }
0x16c2   : > { %v1224_v39 = vadd.f32 %v2144_v23, %v1214_v36 }
0x16c3   : > { %2145 = vlog2.f32 %v1225_v6 }
0x16c4   : > { %2147 = vlog2.f32 %v1224_v39 }
0x16cd   : > { %v2146_v40 = vpop.eup %2145 }
0x16ce   : > { %v1229_v14 = vmul.f32 0.6931472, %v2146_v40  ;;  %v2148_v28 = vpop.eup %2147 }
0x16cf   : > { %v1227_v44 = vmul.f32 0.6931472, %v2148_v28 }
0x16d0   : > { %v1231_v41 = vadd.f32 %v1229_v14, %v1205_v3 }
0x16d1   : > { %v1230_v22 = vadd.f32 %v1227_v44, %v1204_v57 }
0x16d2   : > { %v1233_v45 = vsub.f32 %v1196_v16, %v1231_v41  ;;  %v2856_v10 = vsub.f32 %v2833_v19, %v1231_v41 }
0x16d3   : > { %v1232_v46 = vsub.f32 %v1195_v52, %v1230_v22  ;;  %v2859_v7 = vsub.f32 %v2836_v20, %v1230_v22 }
0x16d4   : > { %v1237_v33 = vsel %vm175_vm0, %v1233_v45, -inf }
0x16d5   : > { %v1236_v49 = vsel %vm175_vm0, %v1232_v46, -inf }
0x16d6   : > { %v1238_v50 = vmax.f32 %v1236_v49, %v1237_v33 }
0x16d8   : > { %v1239_v27 = vrot.slane %v1238_v50, 4 }
0x16da   : > { %v1240_v38 = vmax.f32 %v1238_v50, %v1239_v27 }
0x16dc   : > { %v1241_v51 = vrot.slane %v1240_v38, 2 }
0x16de   : > { %v1242_v54 = vmax.f32 %v1240_v38, %v1241_v51 }
0x16e0   : > { %v1243_v55 = vrot.slane %v1242_v54, 1 }
0x16e2   : > { %v1244_v32 = vmax.f32 %v1242_v54, %v1243_v55 }
0x16e4   : > { %v1245_v43 = vmax.f32 %v1244_v32, %v2828_v62 }
0x16e6   : > { %v1246_v56 = vsub.f32 %v1232_v46, %v1245_v43  ;;  %v1247_v59 = vsub.f32 %v1233_v45, %v1245_v43  ;;  %v1261_v48 = vsub.f32 %v2828_v62, %v1245_v43 }
0x16e8   : > { %v1248_v60 = vmul.f32 1.442695, %v1246_v56  ;;  %v1250_v37 = vmul.f32 1.442695, %v1247_v59  ;;  %v1262_v53 = vmul.f32 1.442695, %v1261_v48 }
0x16ea   : > { %2149 = vpow2.f32 %v1248_v60 }
0x16eb   : > { %2151 = vpow2.f32 %v1250_v37 }
0x16ec   : > { %2153 = vpow2.f32 %v1262_v53 }
0x16f4   : > { %v2150_v61 = vpop.eup %2149 }
0x16f5   : > { %v2152_v0 = vpop.eup %2151  ;;  %v1252_v1 = vsel %vm175_vm0, %v2150_v61, 0.0 }
0x16f6   : > { %v1253_v42 = vsel %vm175_vm0, %v2152_v0, 0.0  ;;  %v2154_v16 = vpop.eup %2153 }
0x16f7   : > { %v1254_v2 = vadd.f32 %v1253_v42, %v1252_v1 }
0x16f9   : > { %v1255_v5 = vrot.slane %v1254_v2, 4 }
0x16fb   : > { %v1256_v8 = vadd.f32 %v1255_v5, %v1254_v2 }
0x16fd   : > { %v1257_v47 = vrot.slane %v1256_v8, 2 }
0x16ff   : > { %v1258_v58 = vadd.f32 %v1257_v47, %v1256_v8 }
0x1701   : > { %v1259_v9 = vrot.slane %v1258_v58, 1 }
0x1703   : > { %v1260_v13 = vadd.f32 %v1259_v9, %v1258_v58 }
0x1705   : > { %v1264_v52 = vadd.f32 %v2154_v16, %v1260_v13 }
0x1707   : > { %2155 = vlog2.f32 %v1264_v52 }
0x1711   : > { %v2156_v63 = vpop.eup %2155 }
0x1712   : > { %v1266_v17 = vmul.f32 0.6931472, %v2156_v63 }
0x1714   : > { %v1267_v21 = vadd.f32 %v1266_v17, %v1245_v43 }
0x1716   : > { %v1269_v24 = vsub.f32 %v1233_v45, %v1267_v21  ;;  %v2851_v3 = vsub.f32 %v2828_v62, %v1267_v21  ;;  %v1268_v57 = vsub.f32 %v1232_v46, %v1267_v21 }
0x1718   : > { %v1274_v4 = vsel %vm175_vm0, %v1269_v24, -inf  ;;  %v1271_v25 = vsel %vm175_vm0, %v1268_v57, -inf }
0x1719   : > { %1275 = vmax.xlane.f32.xlu1 %v1274_v4  ;;  %1272 = vmax.xlane.f32.xlu0 %v1271_v25 }
0x17a6   : > { %v1276_v26 = vpop.xlane.xlu1 %1275  ;;  %v1273_v29 = vpop.xlane.xlu0 %1272 }
0x17a7   : > { %v1278_v11 = vmax.f32 %v1276_v26, %v2856_v10  ;;  %v1277_v62 = vmax.f32 %v1273_v29, %v2859_v7 }
0x17a9   : > { %v1280_v12 = vsub.f32 %v1269_v24, %v1278_v11  ;;  %v1279_v30 = vsub.f32 %v1268_v57, %v1277_v62  ;;  %v1292_v35 = vsub.f32 %v2856_v10, %v1278_v11  ;;  %v1291_v6 = vsub.f32 %v2859_v7, %v1277_v62 }
0x17ab   : > { %v1283_v18 = vmul.f32 1.442695, %v1280_v12  ;;  %v1281_v15 = vmul.f32 1.442695, %v1279_v30  ;;  %v1295_v23 = vmul.f32 1.442695, %v1292_v35 }
0x17ac   : > { %v1293_v36 = vmul.f32 1.442695, %v1291_v6 }
0x17ad   : > { %2157 = vpow2.f32 %v1283_v18 }
0x17ae   : > { %2159 = vpow2.f32 %v1281_v15 }
0x17af   : > { %2161 = vpow2.f32 %v1295_v23 }
0x17b0   : > { %2163 = vpow2.f32 %v1293_v36 }
0x17b7   : > { %v2158_v31 = vpop.eup %2157 }
0x17b8   : > { %v1288_v34 = vsel %vm175_vm0, %v2158_v31, 0.0  ;;  %v2160_v19 = vpop.eup %2159 }
0x17b9   : > { %1289 = vadd.xlane.f32.xlu1 %v1288_v34  ;;  %v1285_v20 = vsel %vm175_vm0, %v2160_v19, 0.0  ;;  %v2162_v39 = vpop.eup %2161 }
0x17ba   : > { %1286 = vadd.xlane.f32.xlu0 %v1285_v20  ;;  %v2164_v28 = vpop.eup %2163 }
0x1846   : > { %v1290_v40 = vpop.xlane.xlu1 %1289 }
0x1847   : > { %v1298_v14 = vadd.f32 %v2162_v39, %v1290_v40  ;;  %v1287_v41 = vpop.xlane.xlu0 %1286 }
0x1848   : > { %v1297_v44 = vadd.f32 %v2164_v28, %v1287_v41 }
0x1849   : > { %2165 = vlog2.f32 %v1298_v14 }
0x184a   : > { %2167 = vlog2.f32 %v1297_v44 }
0x1853   : > { %v2166_v45 = vpop.eup %2165 }
0x1854   : > { %v1302_v22 = vmul.f32 0.6931472, %v2166_v45  ;;  %v2168_v33 = vpop.eup %2167 }
0x1855   : > { %v1300_v49 = vmul.f32 0.6931472, %v2168_v33 }
0x1856   : > { %v1304_v46 = vadd.f32 %v1302_v22, %v1278_v11 }
0x1857   : > { %v1303_v27 = vadd.f32 %v1300_v49, %v1277_v62 }
0x1858   : > { %v1306_v50 = vsub.f32 %v1269_v24, %v1304_v46  ;;  %v2879_v18 = vsub.f32 %v2856_v10, %v1304_v46 }
0x1859   : > { %v1305_v51 = vsub.f32 %v1268_v57, %v1303_v27  ;;  %v2882_v15 = vsub.f32 %v2859_v7, %v1303_v27 }
0x185a   : > { %v1310_v38 = vsel %vm175_vm0, %v1306_v50, -inf }
0x185b   : > { %v1309_v54 = vsel %vm175_vm0, %v1305_v51, -inf }
0x185c   : > { %v1311_v55 = vmax.f32 %v1309_v54, %v1310_v38 }
0x185e   : > { %v1312_v32 = vrot.slane %v1311_v55, 4 }
0x1860   : > { %v1313_v43 = vmax.f32 %v1311_v55, %v1312_v32 }
0x1862   : > { %v1314_v56 = vrot.slane %v1313_v43, 2 }
0x1864   : > { %v1315_v59 = vmax.f32 %v1313_v43, %v1314_v56 }
0x1866   : > { %v1316_v60 = vrot.slane %v1315_v59, 1 }
0x1868   : > { %v1317_v37 = vmax.f32 %v1315_v59, %v1316_v60 }
0x186a   : > { %v1318_v48 = vmax.f32 %v1317_v37, %v2851_v3 }
0x186c   : > { %v1319_v61 = vsub.f32 %v1305_v51, %v1318_v48  ;;  %v1320_v0 = vsub.f32 %v1306_v50, %v1318_v48  ;;  %v1334_v53 = vsub.f32 %v2851_v3, %v1318_v48 }
0x186e   : > { %v1321_v1 = vmul.f32 1.442695, %v1319_v61  ;;  %v1323_v42 = vmul.f32 1.442695, %v1320_v0  ;;  %v1335_v58 = vmul.f32 1.442695, %v1334_v53 }
0x1870   : > { %2169 = vpow2.f32 %v1321_v1 }
0x1871   : > { %2171 = vpow2.f32 %v1323_v42 }
0x1872   : > { %2173 = vpow2.f32 %v1335_v58 }
0x187a   : > { %v2170_v2 = vpop.eup %2169 }
0x187b   : > { %v2172_v5 = vpop.eup %2171  ;;  %v1325_v8 = vsel %vm175_vm0, %v2170_v2, 0.0 }
0x187c   : > { %v1326_v47 = vsel %vm175_vm0, %v2172_v5, 0.0  ;;  %v2174_v24 = vpop.eup %2173 }
0x187d   : > { %v1327_v9 = vadd.f32 %v1326_v47, %v1325_v8 }
0x187f   : > { %v1328_v13 = vrot.slane %v1327_v9, 4 }
0x1881   : > { %v1329_v16 = vadd.f32 %v1328_v13, %v1327_v9 }
0x1883   : > { %v1330_v52 = vrot.slane %v1329_v16, 2 }
0x1885   : > { %v1331_v63 = vadd.f32 %v1330_v52, %v1329_v16 }
0x1887   : > { %v1332_v17 = vrot.slane %v1331_v63, 1 }
0x1889   : > { %v1333_v21 = vadd.f32 %v1332_v17, %v1331_v63 }
0x188b   : > { %v1337_v57 = vadd.f32 %v2174_v24, %v1333_v21 }
0x188d   : > { %2175 = vlog2.f32 %v1337_v57 }
0x1897   : > { %v2176_v4 = vpop.eup %2175 }
0x1898   : > { %v1339_v25 = vmul.f32 0.6931472, %v2176_v4 }
0x189a   : > { %v1340_v26 = vadd.f32 %v1339_v25, %v1318_v48 }
0x189c   : > { %v1342_v29 = vsub.f32 %v1306_v50, %v1340_v26  ;;  %v2874_v11 = vsub.f32 %v2851_v3, %v1340_v26  ;;  %v1341_v62 = vsub.f32 %v1305_v51, %v1340_v26 }
0x189e   : > { %v1347_v12 = vsel %vm175_vm0, %v1342_v29, -inf  ;;  %v1344_v30 = vsel %vm175_vm0, %v1341_v62, -inf }
0x189f   : > { %1348 = vmax.xlane.f32.xlu1 %v1347_v12  ;;  %1345 = vmax.xlane.f32.xlu0 %v1344_v30 }
0x192c   : > { %v1349_v31 = vpop.xlane.xlu1 %1348  ;;  %v1346_v34 = vpop.xlane.xlu0 %1345 }
0x192d   : > { %v1351_v19 = vmax.f32 %v1349_v31, %v2879_v18  ;;  %v1350_v3 = vmax.f32 %v1346_v34, %v2882_v15 }
0x192f   : > { %v1353_v20 = vsub.f32 %v1342_v29, %v1351_v19  ;;  %v1352_v35 = vsub.f32 %v1341_v62, %v1350_v3  ;;  %v1365_v40 = vsub.f32 %v2879_v18, %v1351_v19  ;;  %v1364_v14 = vsub.f32 %v2882_v15, %v1350_v3 }
0x1931   : > { %v1356_v6 = vmul.f32 1.442695, %v1353_v20  ;;  %v1354_v23 = vmul.f32 1.442695, %v1352_v35  ;;  %v1368_v28 = vmul.f32 1.442695, %v1365_v40 }
0x1932   : > { %v1366_v41 = vmul.f32 1.442695, %v1364_v14 }
0x1933   : > { %2177 = vpow2.f32 %v1356_v6 }
0x1934   : > { %2179 = vpow2.f32 %v1354_v23 }
0x1935   : > { %2181 = vpow2.f32 %v1368_v28 }
0x1936   : > { %2183 = vpow2.f32 %v1366_v41 }
0x193d   : > { %v2178_v36 = vpop.eup %2177 }
0x193e   : > { %v1361_v39 = vsel %vm175_vm0, %v2178_v36, 0.0  ;;  %v2180_v10 = vpop.eup %2179 }
0x193f   : > { %1362 = vadd.xlane.f32.xlu1 %v1361_v39  ;;  %v1358_v7 = vsel %vm175_vm0, %v2180_v10, 0.0  ;;  %v2182_v44 = vpop.eup %2181 }
0x1940   : > { %1359 = vadd.xlane.f32.xlu0 %v1358_v7  ;;  %v2184_v33 = vpop.eup %2183 }
0x19cc   : > { %v1363_v45 = vpop.xlane.xlu1 %1362 }
0x19cd   : > { %v1371_v22 = vadd.f32 %v2182_v44, %v1363_v45  ;;  %v1360_v46 = vpop.xlane.xlu0 %1359 }
0x19ce   : > { %v1370_v49 = vadd.f32 %v2184_v33, %v1360_v46 }
0x19cf   : > { %2185 = vlog2.f32 %v1371_v22 }
0x19d0   : > { %2187 = vlog2.f32 %v1370_v49 }
0x19d9   : > { %v2186_v50 = vpop.eup %2185 }
0x19da   : > { %v1375_v27 = vmul.f32 0.6931472, %v2186_v50  ;;  %v2188_v38 = vpop.eup %2187 }
0x19db   : > { %v1373_v54 = vmul.f32 0.6931472, %v2188_v38 }
0x19dc   : > { %v1377_v51 = vadd.f32 %v1375_v27, %v1351_v19 }
0x19dd   : > { %v1376_v32 = vadd.f32 %v1373_v54, %v1350_v3 }
0x19de   : > { %v1379_v55 = vsub.f32 %v1342_v29, %v1377_v51  ;;  %v2902_v6 = vsub.f32 %v2879_v18, %v1377_v51 }
0x19df   : > { %v1378_v56 = vsub.f32 %v1341_v62, %v1376_v32  ;;  %v2905_v23 = vsub.f32 %v2882_v15, %v1376_v32 }
0x19e0   : > { %v1383_v43 = vsel %vm175_vm0, %v1379_v55, -inf }
0x19e1   : > { %v1382_v59 = vsel %vm175_vm0, %v1378_v56, -inf }
0x19e2   : > { %v1384_v60 = vmax.f32 %v1382_v59, %v1383_v43 }
0x19e4   : > { %v1385_v37 = vrot.slane %v1384_v60, 4 }
0x19e6   : > { %v1386_v48 = vmax.f32 %v1384_v60, %v1385_v37 }
0x19e8   : > { %v1387_v61 = vrot.slane %v1386_v48, 2 }
0x19ea   : > { %v1388_v0 = vmax.f32 %v1386_v48, %v1387_v61 }
0x19ec   : > { %v1389_v1 = vrot.slane %v1388_v0, 1 }
0x19ee   : > { %v1390_v42 = vmax.f32 %v1388_v0, %v1389_v1 }
0x19f0   : > { %v1391_v53 = vmax.f32 %v1390_v42, %v2874_v11 }
0x19f2   : > { %v1392_v2 = vsub.f32 %v1378_v56, %v1391_v53  ;;  %v1393_v5 = vsub.f32 %v1379_v55, %v1391_v53  ;;  %v1407_v58 = vsub.f32 %v2874_v11, %v1391_v53 }
0x19f4   : > { %v1394_v8 = vmul.f32 1.442695, %v1392_v2  ;;  %v1396_v47 = vmul.f32 1.442695, %v1393_v5  ;;  %v1408_v63 = vmul.f32 1.442695, %v1407_v58 }
0x19f6   : > { %2189 = vpow2.f32 %v1394_v8 }
0x19f7   : > { %2191 = vpow2.f32 %v1396_v47 }
0x19f8   : > { %2193 = vpow2.f32 %v1408_v63 }
0x1a00   : > { %v2190_v9 = vpop.eup %2189 }
0x1a01   : > { %v2192_v13 = vpop.eup %2191  ;;  %v1398_v16 = vsel %vm175_vm0, %v2190_v9, 0.0 }
0x1a02   : > { %v1399_v52 = vsel %vm175_vm0, %v2192_v13, 0.0  ;;  %v2194_v29 = vpop.eup %2193 }
0x1a03   : > { %v1400_v17 = vadd.f32 %v1399_v52, %v1398_v16 }
0x1a05   : > { %v1401_v21 = vrot.slane %v1400_v17, 4 }
0x1a07   : > { %v1402_v24 = vadd.f32 %v1401_v21, %v1400_v17 }
0x1a09   : > { %v1403_v57 = vrot.slane %v1402_v24, 2 }
0x1a0b   : > { %v1404_v4 = vadd.f32 %v1403_v57, %v1402_v24 }
0x1a0d   : > { %v1405_v25 = vrot.slane %v1404_v4, 1 }
0x1a0f   : > { %v1406_v26 = vadd.f32 %v1405_v25, %v1404_v4 }
0x1a11   : > { %v1410_v62 = vadd.f32 %v2194_v29, %v1406_v26 }
0x1a13   : > { %2195 = vlog2.f32 %v1410_v62 }
0x1a1d   : > { %v2196_v12 = vpop.eup %2195 }
0x1a1e   : > { %v1412_v30 = vmul.f32 0.6931472, %v2196_v12 }
0x1a20   : > { %v1413_v31 = vadd.f32 %v1412_v30, %v1391_v53 }
0x1a22   : > { %v1415_v34 = vsub.f32 %v1379_v55, %v1413_v31  ;;  %v2897_v19 = vsub.f32 %v2874_v11, %v1413_v31  ;;  %v1414_v3 = vsub.f32 %v1378_v56, %v1413_v31 }
0x1a24   : > { %v1420_v20 = vsel %vm175_vm0, %v1415_v34, -inf  ;;  %v1417_v35 = vsel %vm175_vm0, %v1414_v3, -inf }
0x1a25   : > { %1421 = vmax.xlane.f32.xlu1 %v1420_v20  ;;  %1418 = vmax.xlane.f32.xlu0 %v1417_v35 }
0x1ab2   : > { %v1422_v36 = vpop.xlane.xlu1 %1421  ;;  %v1419_v39 = vpop.xlane.xlu0 %1418 }
0x1ab3   : > { %v1424_v10 = vmax.f32 %v1422_v36, %v2902_v6  ;;  %v1423_v11 = vmax.f32 %v1419_v39, %v2905_v23 }
0x1ab5   : > { %v1426_v7 = vsub.f32 %v1415_v34, %v1424_v10  ;;  %v1425_v40 = vsub.f32 %v1414_v3, %v1423_v11  ;;  %v1438_v45 = vsub.f32 %v2902_v6, %v1424_v10  ;;  %v1437_v22 = vsub.f32 %v2905_v23, %v1423_v11 }
0x1ab7   : > { %v1429_v14 = vmul.f32 1.442695, %v1426_v7  ;;  %v1427_v28 = vmul.f32 1.442695, %v1425_v40  ;;  %v1441_v33 = vmul.f32 1.442695, %v1438_v45 }
0x1ab8   : > { %v1439_v46 = vmul.f32 1.442695, %v1437_v22 }
0x1ab9   : > { %2197 = vpow2.f32 %v1429_v14 }
0x1aba   : > { %2199 = vpow2.f32 %v1427_v28 }
0x1abb   : > { %2201 = vpow2.f32 %v1441_v33 }
0x1abc   : > { %2203 = vpow2.f32 %v1439_v46 }
0x1ac3   : > { %v2198_v41 = vpop.eup %2197 }
0x1ac4   : > { %v1434_v44 = vsel %vm175_vm0, %v2198_v41, 0.0  ;;  %v2200_v18 = vpop.eup %2199 }
0x1ac5   : > { %1435 = vadd.xlane.f32.xlu1 %v1434_v44  ;;  %v1431_v15 = vsel %vm175_vm0, %v2200_v18, 0.0  ;;  %v2202_v49 = vpop.eup %2201 }
0x1ac6   : > { %1432 = vadd.xlane.f32.xlu0 %v1431_v15  ;;  %v2204_v38 = vpop.eup %2203 }
0x1b52   : > { %v1436_v50 = vpop.xlane.xlu1 %1435 }
0x1b53   : > { %v1444_v27 = vadd.f32 %v2202_v49, %v1436_v50  ;;  %v1433_v51 = vpop.xlane.xlu0 %1432 }
0x1b54   : > { %v1443_v54 = vadd.f32 %v2204_v38, %v1433_v51 }
0x1b55   : > { %2205 = vlog2.f32 %v1444_v27 }
0x1b56   : > { %2207 = vlog2.f32 %v1443_v54 }
0x1b5f   : > { %v2206_v55 = vpop.eup %2205 }
0x1b60   : > { %v1448_v32 = vmul.f32 0.6931472, %v2206_v55  ;;  %v2208_v43 = vpop.eup %2207 }
0x1b61   : > { %v1446_v59 = vmul.f32 0.6931472, %v2208_v43 }
0x1b62   : > { %v1450_v56 = vadd.f32 %v1448_v32, %v1424_v10 }
0x1b63   : > { %v1449_v37 = vadd.f32 %v1446_v59, %v1423_v11 }
0x1b64   : > { %v1452_v60 = vsub.f32 %v1415_v34, %v1450_v56  ;;  %v2925_v14 = vsub.f32 %v2902_v6, %v1450_v56 }
0x1b65   : > { %v1451_v61 = vsub.f32 %v1414_v3, %v1449_v37  ;;  %v2928_v28 = vsub.f32 %v2905_v23, %v1449_v37 }
0x1b66   : > { %v1456_v48 = vsel %vm175_vm0, %v1452_v60, -inf }
0x1b67   : > { %v1455_v0 = vsel %vm175_vm0, %v1451_v61, -inf }
0x1b68   : > { %v1457_v1 = vmax.f32 %v1455_v0, %v1456_v48 }
0x1b6a   : > { %v1458_v42 = vrot.slane %v1457_v1, 4 }
0x1b6c   : > { %v1459_v53 = vmax.f32 %v1457_v1, %v1458_v42 }
0x1b6e   : > { %v1460_v2 = vrot.slane %v1459_v53, 2 }
0x1b70   : > { %v1461_v5 = vmax.f32 %v1459_v53, %v1460_v2 }
0x1b72   : > { %v1462_v8 = vrot.slane %v1461_v5, 1 }
0x1b74   : > { %v1463_v47 = vmax.f32 %v1461_v5, %v1462_v8 }
0x1b76   : > { %v1464_v58 = vmax.f32 %v1463_v47, %v2897_v19 }
0x1b78   : > { %v1465_v9 = vsub.f32 %v1451_v61, %v1464_v58  ;;  %v1466_v13 = vsub.f32 %v1452_v60, %v1464_v58  ;;  %v1480_v63 = vsub.f32 %v2897_v19, %v1464_v58 }
0x1b7a   : > { %v1467_v16 = vmul.f32 1.442695, %v1465_v9  ;;  %v1469_v52 = vmul.f32 1.442695, %v1466_v13  ;;  %v1481_v4 = vmul.f32 1.442695, %v1480_v63 }
0x1b7c   : > { %2209 = vpow2.f32 %v1467_v16 }
0x1b7d   : > { %2211 = vpow2.f32 %v1469_v52 }
0x1b7e   : > { %2213 = vpow2.f32 %v1481_v4 }
0x1b86   : > { %v2210_v17 = vpop.eup %2209 }
0x1b87   : > { %v2212_v21 = vpop.eup %2211  ;;  %v1471_v24 = vsel %vm175_vm0, %v2210_v17, 0.0 }
0x1b88   : > { %v1472_v57 = vsel %vm175_vm0, %v2212_v21, 0.0  ;;  %v2214_v34 = vpop.eup %2213 }
0x1b89   : > { %v1473_v25 = vadd.f32 %v1472_v57, %v1471_v24 }
0x1b8b   : > { %v1474_v26 = vrot.slane %v1473_v25, 4 }
0x1b8d   : > { %v1475_v29 = vadd.f32 %v1474_v26, %v1473_v25 }
0x1b8f   : > { %v1476_v62 = vrot.slane %v1475_v29, 2 }
0x1b91   : > { %v1477_v12 = vadd.f32 %v1476_v62, %v1475_v29 }
0x1b93   : > { %v1478_v30 = vrot.slane %v1477_v12, 1 }
0x1b95   : > { %v1479_v31 = vadd.f32 %v1478_v30, %v1477_v12 }
0x1b97   : > { %v1483_v3 = vadd.f32 %v2214_v34, %v1479_v31 }
0x1b99   : > { %2215 = vlog2.f32 %v1483_v3 }
0x1ba3   : > { %v2216_v20 = vpop.eup %2215 }
0x1ba4   : > { %v1485_v35 = vmul.f32 0.6931472, %v2216_v20 }
0x1ba6   : > { %v1486_v36 = vadd.f32 %v1485_v35, %v1464_v58 }
0x1ba8   : > { %v1488_v39 = vsub.f32 %v1452_v60, %v1486_v36  ;;  %v2920_v10 = vsub.f32 %v2897_v19, %v1486_v36  ;;  %v1487_v11 = vsub.f32 %v1451_v61, %v1486_v36 }
0x1baa   : > { %v1493_v7 = vsel %vm175_vm0, %v1488_v39, -inf  ;;  %v1490_v40 = vsel %vm175_vm0, %v1487_v11, -inf }
0x1bab   : > { %1494 = vmax.xlane.f32.xlu1 %v1493_v7  ;;  %1491 = vmax.xlane.f32.xlu0 %v1490_v40 }
0x1c38   : > { %v1495_v41 = vpop.xlane.xlu1 %1494  ;;  %v1492_v44 = vpop.xlane.xlu0 %1491 }
0x1c39   : > { %v1497_v18 = vmax.f32 %v1495_v41, %v2925_v14  ;;  %v1496_v19 = vmax.f32 %v1492_v44, %v2928_v28 }
0x1c3b   : > { %v1499_v15 = vsub.f32 %v1488_v39, %v1497_v18  ;;  %v1498_v45 = vsub.f32 %v1487_v11, %v1496_v19  ;;  %v1511_v50 = vsub.f32 %v2925_v14, %v1497_v18  ;;  %v1510_v27 = vsub.f32 %v2928_v28, %v1496_v19 }
0x1c3d   : > { %v1502_v22 = vmul.f32 1.442695, %v1499_v15  ;;  %v1500_v33 = vmul.f32 1.442695, %v1498_v45  ;;  %v1514_v38 = vmul.f32 1.442695, %v1511_v50 }
0x1c3e   : > { %v1512_v51 = vmul.f32 1.442695, %v1510_v27 }
0x1c3f   : > { %2217 = vpow2.f32 %v1502_v22 }
0x1c40   : > { %2219 = vpow2.f32 %v1500_v33 }
0x1c41   : > { %2221 = vpow2.f32 %v1514_v38 }
0x1c42   : > { %2223 = vpow2.f32 %v1512_v51 }
0x1c49   : > { %v2218_v46 = vpop.eup %2217 }
0x1c4a   : > { %v1507_v49 = vsel %vm175_vm0, %v2218_v46, 0.0  ;;  %v2220_v6 = vpop.eup %2219 }
0x1c4b   : > { %1508 = vadd.xlane.f32.xlu1 %v1507_v49  ;;  %v1504_v23 = vsel %vm175_vm0, %v2220_v6, 0.0  ;;  %v2222_v54 = vpop.eup %2221 }
0x1c4c   : > { %1505 = vadd.xlane.f32.xlu0 %v1504_v23  ;;  %v2224_v43 = vpop.eup %2223 }
0x1cd8   : > { %v1509_v55 = vpop.xlane.xlu1 %1508 }
0x1cd9   : > { %v1517_v32 = vadd.f32 %v2222_v54, %v1509_v55  ;;  %v1506_v56 = vpop.xlane.xlu0 %1505 }
0x1cda   : > { %v1516_v59 = vadd.f32 %v2224_v43, %v1506_v56 }
0x1cdb   : > { %2225 = vlog2.f32 %v1517_v32 }
0x1cdc   : > { %2227 = vlog2.f32 %v1516_v59 }
0x1ce5   : > { %v2226_v60 = vpop.eup %2225 }
0x1ce6   : > { %v1521_v37 = vmul.f32 0.6931472, %v2226_v60  ;;  %v2228_v48 = vpop.eup %2227 }
0x1ce7   : > { %v1519_v0 = vmul.f32 0.6931472, %v2228_v48 }
0x1ce8   : > { %v1523_v61 = vadd.f32 %v1521_v37, %v1497_v18 }
0x1ce9   : > { %v1522_v42 = vadd.f32 %v1519_v0, %v1496_v19 }
0x1cea   : > { %v1525_v1 = vsub.f32 %v1488_v39, %v1523_v61  ;;  %v1527_v22 = vsub.f32 %v2925_v14, %v1523_v61 }
0x1ceb   : > { %v1524_v2 = vsub.f32 %v1487_v11, %v1522_v42  ;;  %v1526_v33 = vsub.f32 %v2928_v28, %v1522_v42 }
0x1cec   : > { %v1529_v53 = vsel %vm175_vm0, %v1525_v1, -inf }
0x1ced   : > { %v1528_v5 = vsel %vm175_vm0, %v1524_v2, -inf }
0x1cee   : > { %v1530_v8 = vmax.f32 %v1528_v5, %v1529_v53 }
0x1cf0   : > { %v1531_v47 = vrot.slane %v1530_v8, 4 }
0x1cf2   : > { %v1532_v58 = vmax.f32 %v1530_v8, %v1531_v47 }
0x1cf4   : > { %v1533_v9 = vrot.slane %v1532_v58, 2 }
0x1cf6   : > { %v1534_v13 = vmax.f32 %v1532_v58, %v1533_v9 }
0x1cf8   : > { %v1535_v16 = vrot.slane %v1534_v13, 1 }
0x1cfa   : > { %v1536_v52 = vmax.f32 %v1534_v13, %v1535_v16 }
0x1cfc   : > { %v1537_v63 = vmax.f32 %v1536_v52, %v2920_v10 }
0x1cfe   : > { %v1538_v17 = vsub.f32 %v1524_v2, %v1537_v63  ;;  %v1539_v21 = vsub.f32 %v1525_v1, %v1537_v63  ;;  %v1553_v4 = vsub.f32 %v2920_v10, %v1537_v63 }
0x1d00   : > { %v1540_v24 = vmul.f32 1.442695, %v1538_v17  ;;  %v1542_v57 = vmul.f32 1.442695, %v1539_v21  ;;  %v1554_v12 = vmul.f32 1.442695, %v1553_v4 }
0x1d02   : > { %2229 = vpow2.f32 %v1540_v24 }
0x1d03   : > { %2231 = vpow2.f32 %v1542_v57 }
0x1d04   : > { %2233 = vpow2.f32 %v1554_v12 }
0x1d0c   : > { %v2230_v25 = vpop.eup %2229 }
0x1d0d   : > { %v2232_v26 = vpop.eup %2231  ;;  %v1544_v29 = vsel %vm175_vm0, %v2230_v25, 0.0 }
0x1d0e   : > { %v1545_v62 = vsel %vm175_vm0, %v2232_v26, 0.0  ;;  %v2234_v39 = vpop.eup %2233 }
0x1d0f   : > { %v1546_v30 = vadd.f32 %v1545_v62, %v1544_v29 }
0x1d11   : > { %v1547_v31 = vrot.slane %v1546_v30, 4 }
0x1d13   : > { %v1548_v34 = vadd.f32 %v1547_v31, %v1546_v30 }
0x1d15   : > { %v1549_v3 = vrot.slane %v1548_v34, 2 }
0x1d17   : > { %v1550_v20 = vadd.f32 %v1549_v3, %v1548_v34 }
0x1d19   : > { %v1551_v35 = vrot.slane %v1550_v20, 1 }
0x1d1b   : > { %v1552_v36 = vadd.f32 %v1551_v35, %v1550_v20 }
0x1d1d   : > { %v1556_v11 = vadd.f32 %v2234_v39, %v1552_v36 }
0x1d1f   : > { %2235 = vlog2.f32 %v1556_v11 }
0x1d29   : > { %v2236_v7 = vpop.eup %2235 }
0x1d2a   : > { %v1558_v40 = vmul.f32 0.6931472, %v2236_v7 }
0x1d2c   : > { %v1559_v41 = vadd.f32 %v1558_v40, %v1537_v63 }
0x1d2e   : > { %v1561_v44 = vsub.f32 %v1525_v1, %v1559_v41  ;;  %v2943_v18 = vsub.f32 %v2920_v10, %v1559_v41  ;;  %v1560_v19 = vsub.f32 %v1524_v2, %v1559_v41 }
0x1d30   : > { %v1566_v15 = vsel %vm175_vm0, %v1561_v44, -inf  ;;  %v1563_v45 = vsel %vm175_vm0, %v1560_v19, -inf }
0x1d31   : > { %1567 = vmax.xlane.f32.xlu1 %v1566_v15  ;;  %1564 = vmax.xlane.f32.xlu0 %v1563_v45 }
0x1dbe   : > { %v1568_v46 = vpop.xlane.xlu1 %1567  ;;  %v1565_v49 = vpop.xlane.xlu0 %1564 }
0x1dbf   : > { %v1570_v6 = vmax.f32 %v1568_v46, %v1527_v22  ;;  %v1569_v23 = vmax.f32 %v1565_v49, %v1526_v33 }
0x1dc1   : > { %v1572_v50 = vsub.f32 %v1561_v44, %v1570_v6  ;;  %v1571_v27 = vsub.f32 %v1560_v19, %v1569_v23  ;;  %v1584_v14 = vsub.f32 %v1527_v22, %v1570_v6  ;;  %v1583_v28 = vsub.f32 %v1526_v33, %v1569_v23 }
0x1dc3   : > { %v1575_v38 = vmul.f32 1.442695, %v1572_v50  ;;  %v1573_v10 = vmul.f32 1.442695, %v1571_v27  ;;  %v1587_v43 = vmul.f32 1.442695, %v1584_v14 }
0x1dc4   : > { %v1585_v56 = vmul.f32 1.442695, %v1583_v28 }
0x1dc5   : > { %2237 = vpow2.f32 %v1575_v38 }
0x1dc6   : > { %2239 = vpow2.f32 %v1573_v10 }
0x1dc7   : > { %2241 = vpow2.f32 %v1587_v43 }
0x1dc8   : > { %2243 = vpow2.f32 %v1585_v56 }
0x1dcf   : > { %v2238_v51 = vpop.eup %2237 }
0x1dd0   : > { %v1580_v54 = vsel %vm175_vm0, %v2238_v51, 0.0  ;;  %v2240_v55 = vpop.eup %2239 }
0x1dd1   : > { %1581 = vadd.xlane.f32.xlu1 %v1580_v54  ;;  %v1577_v32 = vsel %vm175_vm0, %v2240_v55, 0.0  ;;  %v2242_v59 = vpop.eup %2241 }
0x1dd2   : > { %1578 = vadd.xlane.f32.xlu0 %v1577_v32  ;;  %v2244_v48 = vpop.eup %2243 }
0x1e5e   : > { %v1582_v60 = vpop.xlane.xlu1 %1581 }
0x1e5f   : > { %v1590_v37 = vadd.f32 %v2242_v59, %v1582_v60  ;;  %v1579_v61 = vpop.xlane.xlu0 %1578 }
0x1e60   : > { %v1589_v0 = vadd.f32 %v2244_v48, %v1579_v61 }
0x1e61   : > { %2245 = vlog2.f32 %v1590_v37 }
0x1e62   : > { %2247 = vlog2.f32 %v1589_v0 }
0x1e6b   : > { %v2246_v1 = vpop.eup %2245 }
0x1e6c   : > { %v1594_v42 = vmul.f32 0.6931472, %v2246_v1  ;;  %v2248_v53 = vpop.eup %2247 }
0x1e6d   : > { %v1592_v5 = vmul.f32 0.6931472, %v2248_v53 }
0x1e6e   : > { %v1596_v2 = vadd.f32 %v1594_v42, %v1570_v6 }
0x1e6f   : > { %v1595_v47 = vadd.f32 %v1592_v5, %v1569_v23 }
0x1e70   : > { %v1598_v8 = vsub.f32 %v1561_v44, %v1596_v2 }
0x1e71   : > { %v1597_v9 = vsub.f32 %v1560_v19, %v1595_v47 }
0x1e72   : > { %v1600_v58 = vsel %vm175_vm0, %v1598_v8, -inf }
0x1e73   : > { %v1599_v13 = vsel %vm175_vm0, %v1597_v9, -inf }
0x1e74   : > { %v1601_v16 = vmax.f32 %v1599_v13, %v1600_v58 }
0x1e76   : > { %v1602_v52 = vrot.slane %v1601_v16, 4 }
0x1e78   : > { %v1603_v63 = vmax.f32 %v1601_v16, %v1602_v52 }
0x1e7a   : > { %v1604_v17 = vrot.slane %v1603_v63, 2 }
0x1e7c   : > { %v1605_v21 = vmax.f32 %v1603_v63, %v1604_v17 }
0x1e7e   : > { %v1606_v24 = vrot.slane %v1605_v21, 1 }
0x1e80   : > { %v1607_v57 = vmax.f32 %v1605_v21, %v1606_v24 }
0x1e82   : > { %v1608_v4 = vmax.f32 %v1607_v57, %v2943_v18 }
0x1e84   : > { %v1609_v25 = vsub.f32 %v1597_v9, %v1608_v4  ;;  %v1610_v26 = vsub.f32 %v1598_v8, %v1608_v4  ;;  %v1624_v29 = vsub.f32 %v2943_v18, %v1608_v4 }
0x1e86   : > { %v1611_v62 = vmul.f32 1.442695, %v1609_v25  ;;  %v1613_v12 = vmul.f32 1.442695, %v1610_v26  ;;  %v1625_v20 = vmul.f32 1.442695, %v1624_v29 }
0x1e88   : > { %2249 = vpow2.f32 %v1611_v62 }
0x1e89   : > { %2251 = vpow2.f32 %v1613_v12 }
0x1e8a   : > { %2253 = vpow2.f32 %v1625_v20 }
0x1e92   : > { %v2250_v30 = vpop.eup %2249 }
0x1e93   : > { %v2252_v31 = vpop.eup %2251  ;;  %v1615_v34 = vsel %vm175_vm0, %v2250_v30, 0.0 }
0x1e94   : > { %v1616_v3 = vsel %vm175_vm0, %v2252_v31, 0.0  ;;  %v2254_v44 = vpop.eup %2253 }
0x1e95   : > { %v1617_v35 = vadd.f32 %v1616_v3, %v1615_v34 }
0x1e97   : > { %v1618_v36 = vrot.slane %v1617_v35, 4 }
0x1e99   : > { %v1619_v39 = vadd.f32 %v1618_v36, %v1617_v35 }
0x1e9b   : > { %v1620_v11 = vrot.slane %v1619_v39, 2 }
0x1e9d   : > { %v1621_v7 = vadd.f32 %v1620_v11, %v1619_v39 }
0x1e9f   : > { %v1622_v40 = vrot.slane %v1621_v7, 1 }
0x1ea1   : > { %v1623_v41 = vadd.f32 %v1622_v40, %v1621_v7 }
0x1ea3   : > { %v1627_v18 = vadd.f32 %v2254_v44, %v1623_v41 }
0x1ea5   : > { %2255 = vlog2.f32 %v1627_v18 }
0x1eaf   : > { %v2256_v19 = vpop.eup %2255 }
0x1eb0   : > { %v1629_v15 = vmul.f32 0.6931472, %v2256_v19 }
0x1eb2   : > { %v1630_v45 = vadd.f32 %v1629_v15, %v1608_v4 }
0x1eb4   : > { %v1631_v22 = vsub.f32 %v1597_v9, %v1630_v45  ;;  %v1632_v33 = vsub.f32 %v1598_v8, %v1630_v45 }
0x1eb6   : > { %v1635_v46 = vmul.f32 1.442695, %v1631_v22  ;;  %v1637_v49 = vmul.f32 1.442695, %v1632_v33  ;;  %1633 = vst.msk [vmem:[%s165_s28] sm:$0xff] %vm175_vm0, %v1631_v22  ;;  %1634 = vst.msk [vmem:[%s165_s28 + $0x8] sm:$0xff] %vm175_vm0, %v1632_v33 }
0x1eb7   : > { %2304 = shalt.err (!%p2301_p2)
}
0x1eb8   : > { %s2305_s23 = scalar_lea.hbm %s2964_s7, 256  ;;  %s2309_s26 = scalar_lea.hbm %s3055_s1, 512 }
0x1eb9   : > { %p2306_p4 = scmp.ne.s32.totalorder %s2964_s7, %s2305_s23  ;;  %p2310_p9 = scmp.lt.u32.totalorder %s2964_s7, %s3055_s1 }
0x1eba   : > { %p2311_p1 = scmp.lt.u32.totalorder %s2309_s26, %s2305_s23  ;;  %p2313_p6 = scmp.lt.u32.totalorder %s2305_s23, %s2964_s7 }
0x1ebb   : > { %p2307_p5 = pnand %p2306_p4, %p3063_p11 }
0x1ebc   : > { %p2312_p3 = por %p2311_p1, %p2310_p9 }
0x1ebd   : > { %p2308_p7 = pneg %p2307_p5 }
0x1ebe   : > { %p2314_p12 = por %p2313_p6, %p2312_p3 }
0x1ec0   : > { %p2315_p13 = pnand %p2314_p12, %p2308_p7 }
0x1ec2   : > { %2318 = shalt.err (!%p2315_p13)
}
0x1ec3   : > { %s2395_s28 = smov 128   ;;  %s2396_s3 = smov 8   ;;  %2257 = vpow2.f32 %v1635_v46 }
0x1ec4   : > { %1804 = dma.vmem_to_hbm [thread:$0]  (%p3063_p11), %s2966_s30, 256, %s2964_s7, %s1642_s8, %s2395_s28, %s2395_s28, %s2396_s3   ;;  %2259 = vpow2.f32 %v1637_v49 }
0x1ec5   : > { %s172_s4 = scalar_lea.vmem [#allocation6], %s2520_s29  ;;  %s3003_s19 = scalar_lea.hbm %s3056_s2, %s1800_s20 }
0x1ec6   : > { %s1676_s14 = sshll.u32 %s172_s4, 4  ;;  %s1647_s30 = scalar_lea.sflag [#allocation7], %s2517_s27  ;;  %s3005_s14 = int_to_ptr.vmem [resolvable:$true] %s1676_s14 }
0x1ec7   : > { %s2319_s29 = scalar_lea.vmem %s3005_s14, 256  ;;  %s2397_s13 = smov [#allocation6]  }
0x1ec8   : > { %p2320_p8 = scmp.ne.s32.totalorder %s3005_s14, %s2319_s29  ;;  %s2323_s7 = sshll.u32 %s2397_s13, 4  ;;  %s2324_s7 = int_to_ptr.vmem [resolvable:$false] %s2323_s7 }
0x1ec9   : > { %s2325_s20 = scalar_lea.vmem %s2324_s7, 512  ;;  %p2326_p2 = scmp.lt.s32.totalorder %s3005_s14, %s2324_s7 }
0x1eca   : > { %p2321_p10 = pnand %p2320_p8, %p3063_p11  ;;  %p2327_p4 = scmp.lt.s32.totalorder %s2325_s20, %s2319_s29 }
0x1ecc   : > { %p2322_p0 = pneg %p2321_p10  ;;  %p2328_p5 = por %p2327_p4, %p2326_p2 }
0x1ecd   : > { %v2258_v6 = vpop.eup %2257 }
0x1ece   : > { %v2260_v23 = vpop.eup %2259  ;;  %1639 = vst.msk [vmem:[%s172_s4] sm:$0xff] %vm175_vm0, %v2258_v6  ;;  %p2329_p7 = pnand %p2328_p5, %p2322_p0 }
0x1ecf   : > { %1640 = vst.msk [vmem:[%s172_s4 + $0x8] sm:$0xff] %vm175_vm0, %v2260_v23 }
0x1ed0   : > { %2332 = shalt.err (!%p2329_p7)
}
0x1ed1   : > { %s2333_s8 = scalar_lea.hbm %s3003_s19, 256  ;;  %s2337_s25 = scalar_lea.hbm %s3056_s2, 512 }
0x1ed2   : > { %p2334_p9 = scmp.ne.s32.totalorder %s3003_s19, %s2333_s8  ;;  %p2338_p6 = scmp.lt.u32.totalorder %s3003_s19, %s3056_s2 }
0x1ed3   : > { %p2339_p12 = scmp.lt.u32.totalorder %s2337_s25, %s2333_s8  ;;  %p2341_p8 = scmp.lt.u32.totalorder %s2333_s8, %s3003_s19 }
0x1ed4   : > { %p2335_p1 = pnand %p2334_p9, %p3063_p11 }
0x1ed5   : > { %p2340_p13 = por %p2339_p12, %p2338_p6 }
0x1ed6   : > { %p2336_p3 = pneg %p2335_p1 }
0x1ed7   : > { %p2342_p10 = por %p2341_p8, %p2340_p13 }
0x1ed9   : > { %p2343_p0 = pnand %p2342_p10, %p2336_p3 }
0x1edb   : > { %2346 = shalt.err (!%p2343_p0)
}
0x1edc   : > { %1805 = dma.vmem_to_hbm [thread:$0]  (%p3063_p11), %s3005_s14, 256, %s3003_s19, %s1647_s30, %s2395_s28, %s2395_s28, %s2396_s3  }
0x1edd PF: > { %s1691_s6 = sand.u32 1, %s2377_s9   ;;  %p3064_p2 = scmp.ne.s32.totalorder %s3061_s22, 0 }
0x1ede   : > { %p3065_p4 = scmp.ge.s32.totalorder %s2389_s12, 2  ;;  %s1692_s4 = scalar_lea.sflag [#allocation4], %s1691_s6 }
0x1ee0   : > { %p1813_p5 = pnand %p3065_p4, %p3064_p2 }
0x1ee2   : > { %2368 = dma.done.wait (!%p1813_p5), %s1692_s4, 256  }
0x1ee3   : > { %2370 = vsyncadd (!%p1813_p5), %s1692_s4, 4294967040  ;;  %s1701_s21 = scalar_lea.sflag [#allocation7], %s1691_s6 }
0x1ee4   : > { %2372 = dma.done.wait (!%p1813_p5), %s1701_s21, 256  }
0x1ee5   : > { %2374 = vsyncadd (!%p1813_p5), %s1701_s21, 4294967040  ;;  %p19_p11 = scmp.ge.s32.totalorder %s2438_s15, 4   ;;  %s3066_s9 = smov %s2381_s10 }
0x1ee6   : > { %s3067_s10 = smov %s2385_s11  ;;  %s3068_s11 = smov %s2450_s18 }
0x1ee7   : > { %s3069_s12 = smov %s2438_s15  ;;  %21 = sbr.rel (!%p19_p11) target bundleno = 7 (0x7), region = 86 }
0x1eee   :  { %1706 = vsyncpa [#allocation3], 1 }
0x1eef   :  { %1708 = vsyncpa [#allocation3 + $0x1], 1 }
0x1ef0   :  { %1709 = vsyncpa [#allocation4], 1 }
0x1ef1   :  { %1711 = vsyncpa [#allocation4 + $0x1], 1 }
0x1ef2   :  { %1712 = vsyncpa [#allocation7], 1 }
0x1ef3   :  { %1714 = vsyncpa [#allocation7 + $0x1], 1 }

</bundles_post_ra>
